<compile_context>
chip_gen: v6e
topology: v6e:2x2x1
jax: 0.10.0
libtpu: 0.0.40
codegen_flags: <defaults>
</compile_context>

<pallas_src>
import numpy as np
import jax
import jax.numpy as jnp
from jax.experimental import pallas as pl
from jax.experimental.pallas import tpu as pltpu


_KP_ORDER = ("w1b", "b1r", "r1e", "r1o", "c1e", "c1o",
             "w2b", "b2r", "r2e", "r2o", "c2e", "c2o",
             "wfc1", "bfc1", "wfc2", "bfc2", "wfc3", "bfc3")


# ----------------------------------------------------------------------------
# Fused forward kernel (one grid step = one batch block of bb samples)
# ----------------------------------------------------------------------------
def _lenet_kernel(x_ref,                       # (bb*32, 32)  f32 input slab
                  w1b_ref, b1r_ref,            # (5,32,168) bf16, (1,168) f32
                  r1e_ref, r1o_ref,            # (bb*14, bb*32-4) bf16
                  c1e_ref, c1o_ref,            # (168, 84) bf16
                  w2b_ref, b2r_ref,            # (5,84,160) bf16, (1,160) f32
                  r2e_ref, r2o_ref,            # (5*bb, bb*14-4) bf16
                  c2e_ref, c2o_ref,            # (160, 80) bf16
                  wfc1_ref, bfc1_ref,          # (5,80,120) bf16, (1,120) f32
                  wfc2_ref, bfc2_ref,          # (120,84) bf16, (1,84) f32
                  wfc3_ref, bfc3_ref,          # (84,128) bf16, (1,128) f32
                  o_ref,                       # (bb, 128) f32
                  p1_ref):                     # VMEM (bb*14, 84) f32 scratch
    f32, bf16 = jnp.float32, jnp.bfloat16
    bb = o_ref.shape[0]
    L1 = bb * 32 - 4      # conv1 band window over the input slab
    L2 = bb * 14 - 4      # conv2 band window over the pooled slab

    # ---- conv1 (1->6, 5x5) + bias + relu over the whole batch slab ---------
    # banded form: acc1[r] = sum_i x[r+i] @ w1b[i]; rows b*32+h, h<28 valid.
    acc1 = jnp.dot(x_ref[0:L1, :].astype(bf16), w1b_ref[0],
                   preferred_element_type=f32)
    for i in range(1, 5):
        acc1 = acc1 + jnp.dot(x_ref[i:i + L1, :].astype(bf16), w1b_ref[i],
                              preferred_element_type=f32)
    a1 = jnp.maximum(acc1 + b1r_ref[...], 0.0).astype(bf16)     # (L1, 168)

    # ---- 2x2 maxpool #1: exact 0/1 row/col selection matmuls + max ---------
    t1 = jnp.maximum(
        jnp.dot(r1e_ref[...], a1, preferred_element_type=f32),
        jnp.dot(r1o_ref[...], a1, preferred_element_type=f32)).astype(bf16)
    p1_ref[...] = jnp.maximum(
        jnp.dot(t1, c1e_ref[...], preferred_element_type=f32),
        jnp.dot(t1, c1o_ref[...], preferred_element_type=f32))  # (bb*14, 84)

    # ---- conv2 (6->16, 5x5) + bias + relu -----------------------------------
    acc2 = jnp.dot(p1_ref[0:L2, :].astype(bf16), w2b_ref[0],
                   preferred_element_type=f32)
    for i in range(1, 5):
        acc2 = acc2 + jnp.dot(p1_ref[i:i + L2, :].astype(bf16), w2b_ref[i],
                              preferred_element_type=f32)
    a2 = jnp.maximum(acc2 + b2r_ref[...], 0.0).astype(bf16)     # (L2, 160)

    # ---- 2x2 maxpool #2 -> (5*bb, 80), grouped by pooled spatial row --------
    t2 = jnp.maximum(
        jnp.dot(r2e_ref[...], a2, preferred_element_type=f32),
        jnp.dot(r2o_ref[...], a2, preferred_element_type=f32)).astype(bf16)
    p2 = jnp.maximum(
        jnp.dot(t2, c2e_ref[...], preferred_element_type=f32),
        jnp.dot(t2, c2o_ref[...], preferred_element_type=f32))  # (5*bb, 80)

    # ---- fc1 + relu: 5 batched matmuls of (bb, 80) @ (80, 120) --------------
    # (torch's NCHW flatten permutation is folded into wfc1 at pack time)
    h1 = jnp.dot(p2[0:bb, :].astype(bf16), wfc1_ref[0],
                 preferred_element_type=f32)
    for r in range(1, 5):
        h1 = h1 + jnp.dot(p2[r * bb:(r + 1) * bb, :].astype(bf16),
                          wfc1_ref[r], preferred_element_type=f32)
    h1 = jnp.maximum(h1 + bfc1_ref[...], 0.0)

    # ---- fc2 + relu, fc3 (output padded to 128 lanes) -----------------------
    h2 = jnp.maximum(
        jnp.dot(h1.astype(bf16), wfc2_ref[...], preferred_element_type=f32)
        + bfc2_ref[...], 0.0)
    out = (jnp.dot(h2.astype(bf16), wfc3_ref[...], preferred_element_type=f32)
           + bfc3_ref[...])
    o_ref[...] = out.astype(o_ref.dtype)


# ----------------------------------------------------------------------------
# Wrapper
# ----------------------------------------------------------------------------
def lenet_forward(x_nchw, kp):
    """x_nchw: (B, 1, 32, 32) f32.  kp: packed params from pack_params()."""
    B = x_nchw.shape[0]
    assert x_nchw.shape[1:] == (1, 32, 32)
    bb = kp["r1e"].shape[0] // 14        # batch block the params were packed for
    assert bb % 8 == 0 and bb >= 8
    nblk = pl.cdiv(B, bb)
    Bp = nblk * bb

    x2d = x_nchw.reshape(B * 32, 32)     # free layout change
    if Bp != B:                          # pad batch to a whole number of blocks
        x2d = jnp.pad(x2d, ((0, (Bp - B) * 32), (0, 0)))

    def _full(arr):
        nd = arr.ndim
        return pl.BlockSpec(arr.shape, lambda m, _nd=nd: (0,) * _nd)

    in_specs = [pl.BlockSpec((bb * 32, 32), lambda m: (m, 0))]
    in_specs += [_full(kp[name]) for name in _KP_ORDER]

    out = pl.pallas_call(
        _lenet_kernel,
        out_shape=jax.ShapeDtypeStruct((Bp, 128), jnp.float32),
        grid=(nblk,),
        in_specs=in_specs,
        out_specs=pl.BlockSpec((bb, 128), lambda m: (m, 0)),
        scratch_shapes=[pltpu.VMEM((bb * 14, 84), jnp.float32)],
        compiler_params=pltpu.CompilerParams(
            dimension_semantics=("parallel",)),
    )(x2d, *[kp[name] for name in _KP_ORDER])
    return out[:B, :3]


# ----------------------------------------------------------------------------
# Host-side parameter init / packing (pure data layout, no runtime cost)
# ----------------------------------------------------------------------------
def init_params(key):
    """Parameters in the original torch layout, PyTorch-default uniform init."""
    def uniform(k, shape, fan_in):
        bound = 1.0 / np.sqrt(float(fan_in))
        return jax.random.uniform(k, shape, jnp.float32, -bound, bound)

    ks = jax.random.split(key, 10)
    return {
        "conv1_w": uniform(ks[0], (6, 1, 5, 5), 25),
        "conv1_b": uniform(ks[1], (6,), 25),
        "conv2_w": uniform(ks[2], (16, 6, 5, 5), 150),
        "conv2_b": uniform(ks[3], (16,), 150),
        "fc1_w":   uniform(ks[4], (120, 400), 400),
        "fc1_b":   uniform(ks[5], (120,), 400),
        "fc2_w":   uniform(ks[6], (84, 120), 120),
        "fc2_b":   uniform(ks[7], (84,), 120),
        "fc3_w":   uniform(ks[8], (3, 84), 84),
        "fc3_b":   uniform(ks[9], (3,), 84),
    }


def pack_params(tp, batch_block=8):
    """Torch-layout params -> banded conv weights, slab-level 0/1 pooling
    selectors and permuted fc weights for the fused kernel.

    batch_block (bb): samples per grid step; multiple of 8.  The batch is
    padded to a multiple of bb in the wrapper.  With bb <= B/2 the parallel
    grid has >= 2 steps (uses both TensorCores on v7x)."""
    bb = batch_block
    assert bb % 8 == 0 and bb >= 8

    w1 = np.asarray(tp["conv1_w"], np.float32)   # (6,1,5,5)
    b1 = np.asarray(tp["conv1_b"], np.float32)
    w2 = np.asarray(tp["conv2_w"], np.float32)   # (16,6,5,5)
    b2 = np.asarray(tp["conv2_b"], np.float32)
    wf1 = np.asarray(tp["fc1_w"], np.float32)    # (120,400)
    bf1 = np.asarray(tp["fc1_b"], np.float32)
    wf2 = np.asarray(tp["fc2_w"], np.float32)
    bf2 = np.asarray(tp["fc2_b"], np.float32)
    wf3 = np.asarray(tp["fc3_w"], np.float32)
    bf3 = np.asarray(tp["fc3_b"], np.float32)

    # conv1 as 5 banded matmuls: acc1[r] = sum_i slab[r+i] @ w1b[i] -> (*, 28*6)
    w1b = np.zeros((5, 32, 28 * 6), np.float32)
    for i in range(5):
        for j in range(5):
            for w in range(28):
                w1b[i, w + j, w * 6:(w + 1) * 6] = w1[:, 0, i, j]
    b1r = np.tile(b1, 28).reshape(1, 28 * 6)

    # conv2 as 5 banded matmuls on the pooled (w*6 + ic) layout -> (*, 10*16)
    w2b = np.zeros((5, 14 * 6, 10 * 16), np.float32)
    for i in range(5):
        for j in range(5):
            for w in range(10):
                for ic in range(6):
                    w2b[i, (w + j) * 6 + ic, w * 16:(w + 1) * 16] = w2[:, ic, i, j]
    b2r = np.tile(b2, 10).reshape(1, 10 * 16)

    # pool1 row selectors over the conv1 slab: pick rows b*32+2p / b*32+2p+1,
    # write them to slab row b*14 + p.
    L1 = bb * 32 - 4
    r1e = np.zeros((bb * 14, L1), np.float32)
    r1o = np.zeros((bb * 14, L1), np.float32)
    for b in range(bb):
        for p in range(14):
            r1e[b * 14 + p, b * 32 + 2 * p] = 1.0
            r1o[b * 14 + p, b * 32 + 2 * p + 1] = 1.0

    # pool1 column selectors (168 -> 84, channel-fastest layout)
    c1e = np.zeros((28 * 6, 14 * 6), np.float32)
    c1o = np.zeros((28 * 6, 14 * 6), np.float32)
    for w in range(14):
        for c in range(6):
            c1e[(2 * w) * 6 + c, w * 6 + c] = 1.0
            c1o[(2 * w + 1) * 6 + c, w * 6 + c] = 1.0

    # pool2 row selectors: pick conv2 slab rows b*14+2p / +2p+1 and GROUP the
    # result by pooled spatial row p (output row p*bb + b) so that fc1 becomes
    # 5 batched (bb,80)@(80,120) matmuls.
    L2 = bb * 14 - 4
    r2e = np.zeros((5 * bb, L2), np.float32)
    r2o = np.zeros((5 * bb, L2), np.float32)
    for p in range(5):
        for b in range(bb):
            r2e[p * bb + b, b * 14 + 2 * p] = 1.0
            r2o[p * bb + b, b * 14 + 2 * p + 1] = 1.0

    # pool2 column selectors (160 -> 80)
    c2e = np.zeros((10 * 16, 5 * 16), np.float32)
    c2o = np.zeros((10 * 16, 5 * 16), np.float32)
    for w in range(5):
        for c in range(16):
            c2e[(2 * w) * 16 + c, w * 16 + c] = 1.0
            c2o[(2 * w + 1) * 16 + c, w * 16 + c] = 1.0

    # fc1: fold torch's NCHW flatten (idx = c*25 + h*5 + w) into the weight so
    # it consumes the kernel's (pooled-row-grouped, w*16 + c) layout directly.
    wfc1 = np.zeros((5, 5 * 16, 120), np.float32)
    for h in range(5):
        for w in range(5):
            for c in range(16):
                wfc1[h, w * 16 + c, :] = wf1[:, c * 25 + h * 5 + w]

    # fc3 padded to 128 output lanes (unmasked stores); wrapper slices [:, :3].
    wfc3 = np.zeros((84, 128), np.float32)
    wfc3[:, :3] = wf3.T
    bfc3 = np.zeros((1, 128), np.float32)
    bfc3[0, :3] = bf3

    bf16, f32 = jnp.bfloat16, jnp.float32
    packed = {
        "w1b": (w1b, bf16), "b1r": (b1r, f32),
        "r1e": (r1e, bf16), "r1o": (r1o, bf16),
        "c1e": (c1e, bf16), "c1o": (c1o, bf16),
        "w2b": (w2b, bf16), "b2r": (b2r, f32),
        "r2e": (r2e, bf16), "r2o": (r2o, bf16),
        "c2e": (c2e, bf16), "c2o": (c2o, bf16),
        "wfc1": (wfc1, bf16), "bfc1": (bf1.reshape(1, 120), f32),
        "wfc2": (wf2.T.copy(), bf16), "bfc2": (bf2.reshape(1, 84), f32),
        "wfc3": (wfc3, bf16), "bfc3": (bfc3, f32),
    }
    return {k: jnp.asarray(v, dtype=d) for k, (v, d) in packed.items()}


# ----------------------------------------------------------------------------
# Pure-XLA reference with the exact torch `Net.forward` semantics (self-check)
# ----------------------------------------------------------------------------
def reference_forward(x, tp):
    hi = jax.lax.Precision.HIGHEST
    y = jax.lax.conv_general_dilated(
        x, tp["conv1_w"], (1, 1), "VALID",
        dimension_numbers=("NCHW", "OIHW", "NCHW"), precision=hi)
    y = jax.nn.relu(y + tp["conv1_b"][None, :, None, None])
    y = jax.lax.reduce_window(y, jnp.array(-jnp.inf, y.dtype), jax.lax.max,
                              (1, 1, 2, 2), (1, 1, 2, 2), "VALID")
    y = jax.lax.conv_general_dilated(
        y, tp["conv2_w"], (1, 1), "VALID",
        dimension_numbers=("NCHW", "OIHW", "NCHW"), precision=hi)
    y = jax.nn.relu(y + tp["conv2_b"][None, :, None, None])
    y = jax.lax.reduce_window(y, jnp.array(-jnp.inf, y.dtype), jax.lax.max,
                              (1, 1, 2, 2), (1, 1, 2, 2), "VALID")
    f = y.reshape(y.shape[0], -1)                       # torch.flatten(x, 1)
    h = jax.nn.relu(jnp.dot(f, tp["fc1_w"].T, precision=hi) + tp["fc1_b"])
    h = jax.nn.relu(jnp.dot(h, tp["fc2_w"].T, precision=hi) + tp["fc2_b"])
    return jnp.dot(h, tp["fc3_w"].T, precision=hi) + tp["fc3_b"]


if __name__ == "__main__":
    key = jax.random.PRNGKey(0)
    k_x, k_p = jax.random.split(key)

    # Input must be (B, 1, 32, 32) so that the flatten is 16*5*5 = 400.
    x = jax.random.normal(k_x, (2, 1, 32, 32), dtype=jnp.float32)
    torch_params = init_params(k_p)
    kparams = pack_params(torch_params, batch_block=8)

    fwd = jax.jit(lenet_forward)
    out = jax.block_until_ready(fwd(x, kparams))
    assert out.shape == (2, 3), out.shape
    assert out.dtype == jnp.float32

    # Functional self-check against the f32 XLA reference.  Tolerance leaves
    # margin for the bf16 MXU operands (exact 0/1 selectors, ~1e-2-level
    # relative error from bf16 weight/activation rounding); any layout or
    # indexing bug would be O(1) off.
    ref = jax.block_until_ready(reference_forward(x, torch_params))
    np.testing.assert_allclose(np.asarray(out), np.asarray(ref),
                               rtol=3e-2, atol=3e-2)
    print("KERNEL_OK")
</pallas_src>

<mosaic_0001>
module attributes {stable_mosaic.version = 11 : i64} {
  func.func @_lenet_kernel(%arg0: i32, %arg1: memref<256x32xf32, #tpu.memory_space<vmem>>, %arg2: memref<5x32x168xbf16, #tpu.memory_space<vmem>>, %arg3: memref<1x168xf32, #tpu.memory_space<vmem>>, %arg4: memref<112x252xbf16, #tpu.memory_space<vmem>>, %arg5: memref<112x252xbf16, #tpu.memory_space<vmem>>, %arg6: memref<168x84xbf16, #tpu.memory_space<vmem>>, %arg7: memref<168x84xbf16, #tpu.memory_space<vmem>>, %arg8: memref<5x84x160xbf16, #tpu.memory_space<vmem>>, %arg9: memref<1x160xf32, #tpu.memory_space<vmem>>, %arg10: memref<40x108xbf16, #tpu.memory_space<vmem>>, %arg11: memref<40x108xbf16, #tpu.memory_space<vmem>>, %arg12: memref<160x80xbf16, #tpu.memory_space<vmem>>, %arg13: memref<160x80xbf16, #tpu.memory_space<vmem>>, %arg14: memref<5x80x120xbf16, #tpu.memory_space<vmem>>, %arg15: memref<1x120xf32, #tpu.memory_space<vmem>>, %arg16: memref<120x84xbf16, #tpu.memory_space<vmem>>, %arg17: memref<1x84xf32, #tpu.memory_space<vmem>>, %arg18: memref<84x128xbf16, #tpu.memory_space<vmem>>, %arg19: memref<1x128xf32, #tpu.memory_space<vmem>>, %arg20: memref<8x128xf32, #tpu.memory_space<vmem>>, %arg21: memref<112x84xf32, #tpu.memory_space<vmem>>) attributes {dimension_semantics = [#tpu.dimension_semantics<parallel>], iteration_bounds = array<i64: 1>, scalar_prefetch = 0 : i64, scratch_operands = 1 : i64, tpu.core_type = #tpu.core_type<tc>, window_params = [{transform_indices = @transform_0, window_bounds = array<i64: 256, 32>}, {pipeline_mode = #tpu.pipeline_mode<synchronous>, transform_indices = @transform_1, window_bounds = array<i64: 5, 32, 168>}, {pipeline_mode = #tpu.pipeline_mode<synchronous>, transform_indices = @transform_2, window_bounds = array<i64: 1, 168>}, {pipeline_mode = #tpu.pipeline_mode<synchronous>, transform_indices = @transform_3, window_bounds = array<i64: 112, 252>}, {pipeline_mode = #tpu.pipeline_mode<synchronous>, transform_indices = @transform_4, window_bounds = array<i64: 112, 252>}, {pipeline_mode = #tpu.pipeline_mode<synchronous>, transform_indices = @transform_5, window_bounds = array<i64: 168, 84>}, {pipeline_mode = #tpu.pipeline_mode<synchronous>, transform_indices = @transform_6, window_bounds = array<i64: 168, 84>}, {pipeline_mode = #tpu.pipeline_mode<synchronous>, transform_indices = @transform_7, window_bounds = array<i64: 5, 84, 160>}, {pipeline_mode = #tpu.pipeline_mode<synchronous>, transform_indices = @transform_8, window_bounds = array<i64: 1, 160>}, {pipeline_mode = #tpu.pipeline_mode<synchronous>, transform_indices = @transform_9, window_bounds = array<i64: 40, 108>}, {pipeline_mode = #tpu.pipeline_mode<synchronous>, transform_indices = @transform_10, window_bounds = array<i64: 40, 108>}, {pipeline_mode = #tpu.pipeline_mode<synchronous>, transform_indices = @transform_11, window_bounds = array<i64: 160, 80>}, {pipeline_mode = #tpu.pipeline_mode<synchronous>, transform_indices = @transform_12, window_bounds = array<i64: 160, 80>}, {pipeline_mode = #tpu.pipeline_mode<synchronous>, transform_indices = @transform_13, window_bounds = array<i64: 5, 80, 120>}, {pipeline_mode = #tpu.pipeline_mode<synchronous>, transform_indices = @transform_14, window_bounds = array<i64: 1, 120>}, {pipeline_mode = #tpu.pipeline_mode<synchronous>, transform_indices = @transform_15, window_bounds = array<i64: 120, 84>}, {pipeline_mode = #tpu.pipeline_mode<synchronous>, transform_indices = @transform_16, window_bounds = array<i64: 1, 84>}, {pipeline_mode = #tpu.pipeline_mode<synchronous>, transform_indices = @transform_17, window_bounds = array<i64: 84, 128>}, {pipeline_mode = #tpu.pipeline_mode<synchronous>, transform_indices = @transform_18, window_bounds = array<i64: 1, 128>}, {transform_indices = @transform_19, window_bounds = array<i64: 8, 128>}]} {
    %c0 = arith.constant 0 : index
    %c0_0 = arith.constant 0 : index
    %0 = vector.load %arg1[%c0, %c0_0] : memref<256x32xf32, #tpu.memory_space<vmem>>, vector<252x32xf32>
    %1 = arith.truncf %0 : vector<252x32xf32> to vector<252x32xbf16>
    %c0_1 = arith.constant 0 : index
    %c0_2 = arith.constant 0 : index
    %c0_3 = arith.constant 0 : index
    %2 = vector.load %arg2[%c0_1, %c0_2, %c0_3] : memref<5x32x168xbf16, #tpu.memory_space<vmem>>, vector<1x32x168xbf16>
    %3 = vector.shape_cast %2 : vector<1x32x168xbf16> to vector<32x168xbf16>
    %cst = arith.constant dense<0.000000e+00> : vector<252x168xf32>
    %4 = tpu.matmul %1, %3, %cst {dimension_numbers = #tpu.dot_dimension_numbers<[1], [0], [0], [1], [0, 0, 1, 1], [], []>} : vector<252x32xbf16>, vector<32x168xbf16>, vector<252x168xf32> -> vector<252x168xf32>
    %c1 = arith.constant 1 : index
    %c0_4 = arith.constant 0 : index
    %5 = vector.load %arg1[%c1, %c0_4] : memref<256x32xf32, #tpu.memory_space<vmem>>, vector<252x32xf32>
    %6 = arith.truncf %5 : vector<252x32xf32> to vector<252x32xbf16>
    %c1_5 = arith.constant 1 : index
    %c0_6 = arith.constant 0 : index
    %c0_7 = arith.constant 0 : index
    %7 = vector.load %arg2[%c1_5, %c0_6, %c0_7] : memref<5x32x168xbf16, #tpu.memory_space<vmem>>, vector<1x32x168xbf16>
    %8 = vector.shape_cast %7 : vector<1x32x168xbf16> to vector<32x168xbf16>
    %cst_8 = arith.constant dense<0.000000e+00> : vector<252x168xf32>
    %9 = tpu.matmul %6, %8, %cst_8 {dimension_numbers = #tpu.dot_dimension_numbers<[1], [0], [0], [1], [0, 0, 1, 1], [], []>} : vector<252x32xbf16>, vector<32x168xbf16>, vector<252x168xf32> -> vector<252x168xf32>
    %10 = arith.addf %4, %9 : vector<252x168xf32>
    %c2 = arith.constant 2 : index
    %c0_9 = arith.constant 0 : index
    %11 = vector.load %arg1[%c2, %c0_9] : memref<256x32xf32, #tpu.memory_space<vmem>>, vector<252x32xf32>
    %12 = arith.truncf %11 : vector<252x32xf32> to vector<252x32xbf16>
    %c2_10 = arith.constant 2 : index
    %c0_11 = arith.constant 0 : index
    %c0_12 = arith.constant 0 : index
    %13 = vector.load %arg2[%c2_10, %c0_11, %c0_12] : memref<5x32x168xbf16, #tpu.memory_space<vmem>>, vector<1x32x168xbf16>
    %14 = vector.shape_cast %13 : vector<1x32x168xbf16> to vector<32x168xbf16>
    %cst_13 = arith.constant dense<0.000000e+00> : vector<252x168xf32>
    %15 = tpu.matmul %12, %14, %cst_13 {dimension_numbers = #tpu.dot_dimension_numbers<[1], [0], [0], [1], [0, 0, 1, 1], [], []>} : vector<252x32xbf16>, vector<32x168xbf16>, vector<252x168xf32> -> vector<252x168xf32>
    %16 = arith.addf %10, %15 : vector<252x168xf32>
    %c3 = arith.constant 3 : index
    %c0_14 = arith.constant 0 : index
    %17 = vector.load %arg1[%c3, %c0_14] : memref<256x32xf32, #tpu.memory_space<vmem>>, vector<252x32xf32>
    %18 = arith.truncf %17 : vector<252x32xf32> to vector<252x32xbf16>
    %c3_15 = arith.constant 3 : index
    %c0_16 = arith.constant 0 : index
    %c0_17 = arith.constant 0 : index
    %19 = vector.load %arg2[%c3_15, %c0_16, %c0_17] : memref<5x32x168xbf16, #tpu.memory_space<vmem>>, vector<1x32x168xbf16>
    %20 = vector.shape_cast %19 : vector<1x32x168xbf16> to vector<32x168xbf16>
    %cst_18 = arith.constant dense<0.000000e+00> : vector<252x168xf32>
    %21 = tpu.matmul %18, %20, %cst_18 {dimension_numbers = #tpu.dot_dimension_numbers<[1], [0], [0], [1], [0, 0, 1, 1], [], []>} : vector<252x32xbf16>, vector<32x168xbf16>, vector<252x168xf32> -> vector<252x168xf32>
    %22 = arith.addf %16, %21 : vector<252x168xf32>
    %c4 = arith.constant 4 : index
    %c0_19 = arith.constant 0 : index
    %23 = vector.load %arg1[%c4, %c0_19] : memref<256x32xf32, #tpu.memory_space<vmem>>, vector<252x32xf32>
    %24 = arith.truncf %23 : vector<252x32xf32> to vector<252x32xbf16>
    %c4_20 = arith.constant 4 : index
    %c0_21 = arith.constant 0 : index
    %c0_22 = arith.constant 0 : index
    %25 = vector.load %arg2[%c4_20, %c0_21, %c0_22] : memref<5x32x168xbf16, #tpu.memory_space<vmem>>, vector<1x32x168xbf16>
    %26 = vector.shape_cast %25 : vector<1x32x168xbf16> to vector<32x168xbf16>
    %cst_23 = arith.constant dense<0.000000e+00> : vector<252x168xf32>
    %27 = tpu.matmul %24, %26, %cst_23 {dimension_numbers = #tpu.dot_dimension_numbers<[1], [0], [0], [1], [0, 0, 1, 1], [], []>} : vector<252x32xbf16>, vector<32x168xbf16>, vector<252x168xf32> -> vector<252x168xf32>
    %28 = arith.addf %22, %27 : vector<252x168xf32>
    %c0_24 = arith.constant 0 : index
    %c0_25 = arith.constant 0 : index
    %29 = vector.load %arg3[%c0_24, %c0_25] : memref<1x168xf32, #tpu.memory_space<vmem>>, vector<1x168xf32>
    %30 = vector.broadcast %29 : vector<1x168xf32> to vector<252x168xf32>
    %31 = arith.addf %28, %30 : vector<252x168xf32>
    %cst_26 = arith.constant 0.000000e+00 : f32
    %32 = vector.broadcast %cst_26 : f32 to vector<252x168xf32>
    %33 = arith.maximumf %31, %32 : vector<252x168xf32>
    %34 = arith.truncf %33 : vector<252x168xf32> to vector<252x168xbf16>
    %c0_27 = arith.constant 0 : index
    %c0_28 = arith.constant 0 : index
    %35 = vector.load %arg4[%c0_27, %c0_28] : memref<112x252xbf16, #tpu.memory_space<vmem>>, vector<112x252xbf16>
    %cst_29 = arith.constant dense<0.000000e+00> : vector<112x168xf32>
    %36 = tpu.matmul %35, %34, %cst_29 {dimension_numbers = #tpu.dot_dimension_numbers<[1], [0], [0], [1], [0, 0, 1, 1], [], []>} : vector<112x252xbf16>, vector<252x168xbf16>, vector<112x168xf32> -> vector<112x168xf32>
    %c0_30 = arith.constant 0 : index
    %c0_31 = arith.constant 0 : index
    %37 = vector.load %arg5[%c0_30, %c0_31] : memref<112x252xbf16, #tpu.memory_space<vmem>>, vector<112x252xbf16>
    %cst_32 = arith.constant dense<0.000000e+00> : vector<112x168xf32>
    %38 = tpu.matmul %37, %34, %cst_32 {dimension_numbers = #tpu.dot_dimension_numbers<[1], [0], [0], [1], [0, 0, 1, 1], [], []>} : vector<112x252xbf16>, vector<252x168xbf16>, vector<112x168xf32> -> vector<112x168xf32>
    %39 = arith.maximumf %36, %38 : vector<112x168xf32>
    %40 = arith.truncf %39 : vector<112x168xf32> to vector<112x168xbf16>
    %c0_33 = arith.constant 0 : index
    %c0_34 = arith.constant 0 : index
    %41 = vector.load %arg6[%c0_33, %c0_34] : memref<168x84xbf16, #tpu.memory_space<vmem>>, vector<168x84xbf16>
    %cst_35 = arith.constant dense<0.000000e+00> : vector<112x84xf32>
    %42 = tpu.matmul %40, %41, %cst_35 {dimension_numbers = #tpu.dot_dimension_numbers<[1], [0], [0], [1], [0, 0, 1, 1], [], []>} : vector<112x168xbf16>, vector<168x84xbf16>, vector<112x84xf32> -> vector<112x84xf32>
    %c0_36 = arith.constant 0 : index
    %c0_37 = arith.constant 0 : index
    %43 = vector.load %arg7[%c0_36, %c0_37] : memref<168x84xbf16, #tpu.memory_space<vmem>>, vector<168x84xbf16>
    %cst_38 = arith.constant dense<0.000000e+00> : vector<112x84xf32>
    %44 = tpu.matmul %40, %43, %cst_38 {dimension_numbers = #tpu.dot_dimension_numbers<[1], [0], [0], [1], [0, 0, 1, 1], [], []>} : vector<112x168xbf16>, vector<168x84xbf16>, vector<112x84xf32> -> vector<112x84xf32>
    %45 = arith.maximumf %42, %44 : vector<112x84xf32>
    %c0_39 = arith.constant 0 : index
    %c0_40 = arith.constant 0 : index
    %46 = vector.load %arg21[%c0_39, %c0_40] : memref<112x84xf32, #tpu.memory_space<vmem>>, vector<112x84xf32>
    tpu.vector_store %arg21[%c0_39, %c0_40], %45 {strides = array<i32>} : memref<112x84xf32, #tpu.memory_space<vmem>>, vector<112x84xf32>,
    %c0_41 = arith.constant 0 : index
    %c0_42 = arith.constant 0 : index
    %47 = vector.load %arg21[%c0_41, %c0_42] : memref<112x84xf32, #tpu.memory_space<vmem>>, vector<108x84xf32>
    %48 = arith.truncf %47 : vector<108x84xf32> to vector<108x84xbf16>
    %c0_43 = arith.constant 0 : index
    %c0_44 = arith.constant 0 : index
    %c0_45 = arith.constant 0 : index
    %49 = vector.load %arg8[%c0_43, %c0_44, %c0_45] : memref<5x84x160xbf16, #tpu.memory_space<vmem>>, vector<1x84x160xbf16>
    %50 = vector.shape_cast %49 : vector<1x84x160xbf16> to vector<84x160xbf16>
    %cst_46 = arith.constant dense<0.000000e+00> : vector<108x160xf32>
    %51 = tpu.matmul %48, %50, %cst_46 {dimension_numbers = #tpu.dot_dimension_numbers<[1], [0], [0], [1], [0, 0, 1, 1], [], []>} : vector<108x84xbf16>, vector<84x160xbf16>, vector<108x160xf32> -> vector<108x160xf32>
    %c1_47 = arith.constant 1 : index
    %c0_48 = arith.constant 0 : index
    %52 = vector.load %arg21[%c1_47, %c0_48] : memref<112x84xf32, #tpu.memory_space<vmem>>, vector<108x84xf32>
    %53 = arith.truncf %52 : vector<108x84xf32> to vector<108x84xbf16>
    %c1_49 = arith.constant 1 : index
    %c0_50 = arith.constant 0 : index
    %c0_51 = arith.constant 0 : index
    %54 = vector.load %arg8[%c1_49, %c0_50, %c0_51] : memref<5x84x160xbf16, #tpu.memory_space<vmem>>, vector<1x84x160xbf16>
    %55 = vector.shape_cast %54 : vector<1x84x160xbf16> to vector<84x160xbf16>
    %cst_52 = arith.constant dense<0.000000e+00> : vector<108x160xf32>
    %56 = tpu.matmul %53, %55, %cst_52 {dimension_numbers = #tpu.dot_dimension_numbers<[1], [0], [0], [1], [0, 0, 1, 1], [], []>} : vector<108x84xbf16>, vector<84x160xbf16>, vector<108x160xf32> -> vector<108x160xf32>
    %57 = arith.addf %51, %56 : vector<108x160xf32>
    %c2_53 = arith.constant 2 : index
    %c0_54 = arith.constant 0 : index
    %58 = vector.load %arg21[%c2_53, %c0_54] : memref<112x84xf32, #tpu.memory_space<vmem>>, vector<108x84xf32>
    %59 = arith.truncf %58 : vector<108x84xf32> to vector<108x84xbf16>
    %c2_55 = arith.constant 2 : index
    %c0_56 = arith.constant 0 : index
    %c0_57 = arith.constant 0 : index
    %60 = vector.load %arg8[%c2_55, %c0_56, %c0_57] : memref<5x84x160xbf16, #tpu.memory_space<vmem>>, vector<1x84x160xbf16>
    %61 = vector.shape_cast %60 : vector<1x84x160xbf16> to vector<84x160xbf16>
    %cst_58 = arith.constant dense<0.000000e+00> : vector<108x160xf32>
    %62 = tpu.matmul %59, %61, %cst_58 {dimension_numbers = #tpu.dot_dimension_numbers<[1], [0], [0], [1], [0, 0, 1, 1], [], []>} : vector<108x84xbf16>, vector<84x160xbf16>, vector<108x160xf32> -> vector<108x160xf32>
    %63 = arith.addf %57, %62 : vector<108x160xf32>
    %c3_59 = arith.constant 3 : index
    %c0_60 = arith.constant 0 : index
    %64 = vector.load %arg21[%c3_59, %c0_60] : memref<112x84xf32, #tpu.memory_space<vmem>>, vector<108x84xf32>
    %65 = arith.truncf %64 : vector<108x84xf32> to vector<108x84xbf16>
    %c3_61 = arith.constant 3 : index
    %c0_62 = arith.constant 0 : index
    %c0_63 = arith.constant 0 : index
    %66 = vector.load %arg8[%c3_61, %c0_62, %c0_63] : memref<5x84x160xbf16, #tpu.memory_space<vmem>>, vector<1x84x160xbf16>
    %67 = vector.shape_cast %66 : vector<1x84x160xbf16> to vector<84x160xbf16>
    %cst_64 = arith.constant dense<0.000000e+00> : vector<108x160xf32>
    %68 = tpu.matmul %65, %67, %cst_64 {dimension_numbers = #tpu.dot_dimension_numbers<[1], [0], [0], [1], [0, 0, 1, 1], [], []>} : vector<108x84xbf16>, vector<84x160xbf16>, vector<108x160xf32> -> vector<108x160xf32>
    %69 = arith.addf %63, %68 : vector<108x160xf32>
    %c4_65 = arith.constant 4 : index
    %c0_66 = arith.constant 0 : index
    %70 = vector.load %arg21[%c4_65, %c0_66] : memref<112x84xf32, #tpu.memory_space<vmem>>, vector<108x84xf32>
    %71 = arith.truncf %70 : vector<108x84xf32> to vector<108x84xbf16>
    %c4_67 = arith.constant 4 : index
    %c0_68 = arith.constant 0 : index
    %c0_69 = arith.constant 0 : index
    %72 = vector.load %arg8[%c4_67, %c0_68, %c0_69] : memref<5x84x160xbf16, #tpu.memory_space<vmem>>, vector<1x84x160xbf16>
    %73 = vector.shape_cast %72 : vector<1x84x160xbf16> to vector<84x160xbf16>
    %cst_70 = arith.constant dense<0.000000e+00> : vector<108x160xf32>
    %74 = tpu.matmul %71, %73, %cst_70 {dimension_numbers = #tpu.dot_dimension_numbers<[1], [0], [0], [1], [0, 0, 1, 1], [], []>} : vector<108x84xbf16>, vector<84x160xbf16>, vector<108x160xf32> -> vector<108x160xf32>
    %75 = arith.addf %69, %74 : vector<108x160xf32>
    %c0_71 = arith.constant 0 : index
    %c0_72 = arith.constant 0 : index
    %76 = vector.load %arg9[%c0_71, %c0_72] : memref<1x160xf32, #tpu.memory_space<vmem>>, vector<1x160xf32>
    %77 = vector.broadcast %76 : vector<1x160xf32> to vector<108x160xf32>
    %78 = arith.addf %75, %77 : vector<108x160xf32>
    %cst_73 = arith.constant 0.000000e+00 : f32
    %79 = vector.broadcast %cst_73 : f32 to vector<108x160xf32>
    %80 = arith.maximumf %78, %79 : vector<108x160xf32>
    %81 = arith.truncf %80 : vector<108x160xf32> to vector<108x160xbf16>
    %c0_74 = arith.constant 0 : index
    %c0_75 = arith.constant 0 : index
    %82 = vector.load %arg10[%c0_74, %c0_75] : memref<40x108xbf16, #tpu.memory_space<vmem>>, vector<40x108xbf16>
    %cst_76 = arith.constant dense<0.000000e+00> : vector<40x160xf32>
    %83 = tpu.matmul %82, %81, %cst_76 {dimension_numbers = #tpu.dot_dimension_numbers<[1], [0], [0], [1], [0, 0, 1, 1], [], []>} : vector<40x108xbf16>, vector<108x160xbf16>, vector<40x160xf32> -> vector<40x160xf32>
    %c0_77 = arith.constant 0 : index
    %c0_78 = arith.constant 0 : index
    %84 = vector.load %arg11[%c0_77, %c0_78] : memref<40x108xbf16, #tpu.memory_space<vmem>>, vector<40x108xbf16>
    %cst_79 = arith.constant dense<0.000000e+00> : vector<40x160xf32>
    %85 = tpu.matmul %84, %81, %cst_79 {dimension_numbers = #tpu.dot_dimension_numbers<[1], [0], [0], [1], [0, 0, 1, 1], [], []>} : vector<40x108xbf16>, vector<108x160xbf16>, vector<40x160xf32> -> vector<40x160xf32>
    %86 = arith.maximumf %83, %85 : vector<40x160xf32>
    %87 = arith.truncf %86 : vector<40x160xf32> to vector<40x160xbf16>
    %c0_80 = arith.constant 0 : index
    %c0_81 = arith.constant 0 : index
    %88 = vector.load %arg12[%c0_80, %c0_81] : memref<160x80xbf16, #tpu.memory_space<vmem>>, vector<160x80xbf16>
    %cst_82 = arith.constant dense<0.000000e+00> : vector<40x80xf32>
    %89 = tpu.matmul %87, %88, %cst_82 {dimension_numbers = #tpu.dot_dimension_numbers<[1], [0], [0], [1], [0, 0, 1, 1], [], []>} : vector<40x160xbf16>, vector<160x80xbf16>, vector<40x80xf32> -> vector<40x80xf32>
    %c0_83 = arith.constant 0 : index
    %c0_84 = arith.constant 0 : index
    %90 = vector.load %arg13[%c0_83, %c0_84] : memref<160x80xbf16, #tpu.memory_space<vmem>>, vector<160x80xbf16>
    %cst_85 = arith.constant dense<0.000000e+00> : vector<40x80xf32>
    %91 = tpu.matmul %87, %90, %cst_85 {dimension_numbers = #tpu.dot_dimension_numbers<[1], [0], [0], [1], [0, 0, 1, 1], [], []>} : vector<40x160xbf16>, vector<160x80xbf16>, vector<40x80xf32> -> vector<40x80xf32>
    %92 = arith.maximumf %89, %91 : vector<40x80xf32>
    %93 = vector.extract_strided_slice %92 {offsets = [0, 0], sizes = [8, 80], strides = [1, 1]} : vector<40x80xf32> to vector<8x80xf32>
    %94 = arith.truncf %93 : vector<8x80xf32> to vector<8x80xbf16>
    %c0_86 = arith.constant 0 : index
    %c0_87 = arith.constant 0 : index
    %c0_88 = arith.constant 0 : index
    %95 = vector.load %arg14[%c0_86, %c0_87, %c0_88] : memref<5x80x120xbf16, #tpu.memory_space<vmem>>, vector<1x80x120xbf16>
    %96 = vector.shape_cast %95 : vector<1x80x120xbf16> to vector<80x120xbf16>
    %cst_89 = arith.constant dense<0.000000e+00> : vector<8x120xf32>
    %97 = tpu.matmul %94, %96, %cst_89 {dimension_numbers = #tpu.dot_dimension_numbers<[1], [0], [0], [1], [0, 0, 1, 1], [], []>} : vector<8x80xbf16>, vector<80x120xbf16>, vector<8x120xf32> -> vector<8x120xf32>
    %98 = vector.extract_strided_slice %92 {offsets = [8, 0], sizes = [8, 80], strides = [1, 1]} : vector<40x80xf32> to vector<8x80xf32>
    %99 = arith.truncf %98 : vector<8x80xf32> to vector<8x80xbf16>
    %c1_90 = arith.constant 1 : index
    %c0_91 = arith.constant 0 : index
    %c0_92 = arith.constant 0 : index
    %100 = vector.load %arg14[%c1_90, %c0_91, %c0_92] : memref<5x80x120xbf16, #tpu.memory_space<vmem>>, vector<1x80x120xbf16>
    %101 = vector.shape_cast %100 : vector<1x80x120xbf16> to vector<80x120xbf16>
    %cst_93 = arith.constant dense<0.000000e+00> : vector<8x120xf32>
    %102 = tpu.matmul %99, %101, %cst_93 {dimension_numbers = #tpu.dot_dimension_numbers<[1], [0], [0], [1], [0, 0, 1, 1], [], []>} : vector<8x80xbf16>, vector<80x120xbf16>, vector<8x120xf32> -> vector<8x120xf32>
    %103 = arith.addf %97, %102 : vector<8x120xf32>
    %104 = vector.extract_strided_slice %92 {offsets = [16, 0], sizes = [8, 80], strides = [1, 1]} : vector<40x80xf32> to vector<8x80xf32>
    %105 = arith.truncf %104 : vector<8x80xf32> to vector<8x80xbf16>
    %c2_94 = arith.constant 2 : index
    %c0_95 = arith.constant 0 : index
    %c0_96 = arith.constant 0 : index
    %106 = vector.load %arg14[%c2_94, %c0_95, %c0_96] : memref<5x80x120xbf16, #tpu.memory_space<vmem>>, vector<1x80x120xbf16>
    %107 = vector.shape_cast %106 : vector<1x80x120xbf16> to vector<80x120xbf16>
    %cst_97 = arith.constant dense<0.000000e+00> : vector<8x120xf32>
    %108 = tpu.matmul %105, %107, %cst_97 {dimension_numbers = #tpu.dot_dimension_numbers<[1], [0], [0], [1], [0, 0, 1, 1], [], []>} : vector<8x80xbf16>, vector<80x120xbf16>, vector<8x120xf32> -> vector<8x120xf32>
    %109 = arith.addf %103, %108 : vector<8x120xf32>
    %110 = vector.extract_strided_slice %92 {offsets = [24, 0], sizes = [8, 80], strides = [1, 1]} : vector<40x80xf32> to vector<8x80xf32>
    %111 = arith.truncf %110 : vector<8x80xf32> to vector<8x80xbf16>
    %c3_98 = arith.constant 3 : index
    %c0_99 = arith.constant 0 : index
    %c0_100 = arith.constant 0 : index
    %112 = vector.load %arg14[%c3_98, %c0_99, %c0_100] : memref<5x80x120xbf16, #tpu.memory_space<vmem>>, vector<1x80x120xbf16>
    %113 = vector.shape_cast %112 : vector<1x80x120xbf16> to vector<80x120xbf16>
    %cst_101 = arith.constant dense<0.000000e+00> : vector<8x120xf32>
    %114 = tpu.matmul %111, %113, %cst_101 {dimension_numbers = #tpu.dot_dimension_numbers<[1], [0], [0], [1], [0, 0, 1, 1], [], []>} : vector<8x80xbf16>, vector<80x120xbf16>, vector<8x120xf32> -> vector<8x120xf32>
    %115 = arith.addf %109, %114 : vector<8x120xf32>
    %116 = vector.extract_strided_slice %92 {offsets = [32, 0], sizes = [8, 80], strides = [1, 1]} : vector<40x80xf32> to vector<8x80xf32>
    %117 = arith.truncf %116 : vector<8x80xf32> to vector<8x80xbf16>
    %c4_102 = arith.constant 4 : index
    %c0_103 = arith.constant 0 : index
    %c0_104 = arith.constant 0 : index
    %118 = vector.load %arg14[%c4_102, %c0_103, %c0_104] : memref<5x80x120xbf16, #tpu.memory_space<vmem>>, vector<1x80x120xbf16>
    %119 = vector.shape_cast %118 : vector<1x80x120xbf16> to vector<80x120xbf16>
    %cst_105 = arith.constant dense<0.000000e+00> : vector<8x120xf32>
    %120 = tpu.matmul %117, %119, %cst_105 {dimension_numbers = #tpu.dot_dimension_numbers<[1], [0], [0], [1], [0, 0, 1, 1], [], []>} : vector<8x80xbf16>, vector<80x120xbf16>, vector<8x120xf32> -> vector<8x120xf32>
    %121 = arith.addf %115, %120 : vector<8x120xf32>
    %c0_106 = arith.constant 0 : index
    %c0_107 = arith.constant 0 : index
    %122 = vector.load %arg15[%c0_106, %c0_107] : memref<1x120xf32, #tpu.memory_space<vmem>>, vector<1x120xf32>
    %123 = vector.broadcast %122 : vector<1x120xf32> to vector<8x120xf32>
    %124 = arith.addf %121, %123 : vector<8x120xf32>
    %cst_108 = arith.constant 0.000000e+00 : f32
    %125 = vector.broadcast %cst_108 : f32 to vector<8x120xf32>
    %126 = arith.maximumf %124, %125 : vector<8x120xf32>
    %127 = arith.truncf %126 : vector<8x120xf32> to vector<8x120xbf16>
    %c0_109 = arith.constant 0 : index
    %c0_110 = arith.constant 0 : index
    %128 = vector.load %arg16[%c0_109, %c0_110] : memref<120x84xbf16, #tpu.memory_space<vmem>>, vector<120x84xbf16>
    %cst_111 = arith.constant dense<0.000000e+00> : vector<8x84xf32>
    %129 = tpu.matmul %127, %128, %cst_111 {dimension_numbers = #tpu.dot_dimension_numbers<[1], [0], [0], [1], [0, 0, 1, 1], [], []>} : vector<8x120xbf16>, vector<120x84xbf16>, vector<8x84xf32> -> vector<8x84xf32>
    %c0_112 = arith.constant 0 : index
    %c0_113 = arith.constant 0 : index
    %130 = vector.load %arg17[%c0_112, %c0_113] : memref<1x84xf32, #tpu.memory_space<vmem>>, vector<1x84xf32>
    %131 = vector.broadcast %130 : vector<1x84xf32> to vector<8x84xf32>
    %132 = arith.addf %129, %131 : vector<8x84xf32>
    %cst_114 = arith.constant 0.000000e+00 : f32
    %133 = vector.broadcast %cst_114 : f32 to vector<8x84xf32>
    %134 = arith.maximumf %132, %133 : vector<8x84xf32>
    %135 = arith.truncf %134 : vector<8x84xf32> to vector<8x84xbf16>
    %c0_115 = arith.constant 0 : index
    %c0_116 = arith.constant 0 : index
    %136 = vector.load %arg18[%c0_115, %c0_116] : memref<84x128xbf16, #tpu.memory_space<vmem>>, vector<84x128xbf16>
    %cst_117 = arith.constant dense<0.000000e+00> : vector<8x128xf32>
    %137 = tpu.matmul %135, %136, %cst_117 {dimension_numbers = #tpu.dot_dimension_numbers<[1], [0], [0], [1], [0, 0, 1, 1], [], []>} : vector<8x84xbf16>, vector<84x128xbf16>, vector<8x128xf32> -> vector<8x128xf32>
    %c0_118 = arith.constant 0 : index
    %c0_119 = arith.constant 0 : index
    %138 = vector.load %arg19[%c0_118, %c0_119] : memref<1x128xf32, #tpu.memory_space<vmem>>, vector<1x128xf32>
    %139 = vector.broadcast %138 : vector<1x128xf32> to vector<8x128xf32>
    %140 = arith.addf %137, %139 : vector<8x128xf32>
    %c0_120 = arith.constant 0 : index
    %c0_121 = arith.constant 0 : index
    %141 = vector.load %arg20[%c0_120, %c0_121] : memref<8x128xf32, #tpu.memory_space<vmem>>, vector<8x128xf32>
    tpu.vector_store %arg20[%c0_120, %c0_121], %140 {strides = array<i32>} : memref<8x128xf32, #tpu.memory_space<vmem>>, vector<8x128xf32>,
    return
  }
  func.func @transform_0(%arg0: i32) -> (i32, i32) {
    %c0_i32 = arith.constant 0 : i32
    %c0_i32_0 = arith.constant 0 : i32
    return %arg0, %c0_i32 : i32, i32
  }
  func.func @transform_1(%arg0: i32) -> (i32, i32, i32) {
    %c0_i32 = arith.constant 0 : i32
    %c0_i32_0 = arith.constant 0 : i32
    %c0_i32_1 = arith.constant 0 : i32
    %c0_i32_2 = arith.constant 0 : i32
    return %c0_i32, %c0_i32_0, %c0_i32_1 : i32, i32, i32
  }
  func.func @transform_2(%arg0: i32) -> (i32, i32) {
    %c0_i32 = arith.constant 0 : i32
    %c0_i32_0 = arith.constant 0 : i32
    %c0_i32_1 = arith.constant 0 : i32
    return %c0_i32, %c0_i32_0 : i32, i32
  }
  func.func @transform_3(%arg0: i32) -> (i32, i32) {
    %c0_i32 = arith.constant 0 : i32
    %c0_i32_0 = arith.constant 0 : i32
    %c0_i32_1 = arith.constant 0 : i32
    return %c0_i32, %c0_i32_0 : i32, i32
  }
  func.func @transform_4(%arg0: i32) -> (i32, i32) {
    %c0_i32 = arith.constant 0 : i32
    %c0_i32_0 = arith.constant 0 : i32
    %c0_i32_1 = arith.constant 0 : i32
    return %c0_i32, %c0_i32_0 : i32, i32
  }
  func.func @transform_5(%arg0: i32) -> (i32, i32) {
    %c0_i32 = arith.constant 0 : i32
    %c0_i32_0 = arith.constant 0 : i32
    %c0_i32_1 = arith.constant 0 : i32
    return %c0_i32, %c0_i32_0 : i32, i32
  }
  func.func @transform_6(%arg0: i32) -> (i32, i32) {
    %c0_i32 = arith.constant 0 : i32
    %c0_i32_0 = arith.constant 0 : i32
    %c0_i32_1 = arith.constant 0 : i32
    return %c0_i32, %c0_i32_0 : i32, i32
  }
  func.func @transform_7(%arg0: i32) -> (i32, i32, i32) {
    %c0_i32 = arith.constant 0 : i32
    %c0_i32_0 = arith.constant 0 : i32
    %c0_i32_1 = arith.constant 0 : i32
    %c0_i32_2 = arith.constant 0 : i32
    return %c0_i32, %c0_i32_0, %c0_i32_1 : i32, i32, i32
  }
  func.func @transform_8(%arg0: i32) -> (i32, i32) {
    %c0_i32 = arith.constant 0 : i32
    %c0_i32_0 = arith.constant 0 : i32
    %c0_i32_1 = arith.constant 0 : i32
    return %c0_i32, %c0_i32_0 : i32, i32
  }
  func.func @transform_9(%arg0: i32) -> (i32, i32) {
    %c0_i32 = arith.constant 0 : i32
    %c0_i32_0 = arith.constant 0 : i32
    %c0_i32_1 = arith.constant 0 : i32
    return %c0_i32, %c0_i32_0 : i32, i32
  }
  func.func @transform_10(%arg0: i32) -> (i32, i32) {
    %c0_i32 = arith.constant 0 : i32
    %c0_i32_0 = arith.constant 0 : i32
    %c0_i32_1 = arith.constant 0 : i32
    return %c0_i32, %c0_i32_0 : i32, i32
  }
  func.func @transform_11(%arg0: i32) -> (i32, i32) {
    %c0_i32 = arith.constant 0 : i32
    %c0_i32_0 = arith.constant 0 : i32
    %c0_i32_1 = arith.constant 0 : i32
    return %c0_i32, %c0_i32_0 : i32, i32
  }
  func.func @transform_12(%arg0: i32) -> (i32, i32) {
    %c0_i32 = arith.constant 0 : i32
    %c0_i32_0 = arith.constant 0 : i32
    %c0_i32_1 = arith.constant 0 : i32
    return %c0_i32, %c0_i32_0 : i32, i32
  }
  func.func @transform_13(%arg0: i32) -> (i32, i32, i32) {
    %c0_i32 = arith.constant 0 : i32
    %c0_i32_0 = arith.constant 0 : i32
    %c0_i32_1 = arith.constant 0 : i32
    %c0_i32_2 = arith.constant 0 : i32
    return %c0_i32, %c0_i32_0, %c0_i32_1 : i32, i32, i32
  }
  func.func @transform_14(%arg0: i32) -> (i32, i32) {
    %c0_i32 = arith.constant 0 : i32
    %c0_i32_0 = arith.constant 0 : i32
    %c0_i32_1 = arith.constant 0 : i32
    return %c0_i32, %c0_i32_0 : i32, i32
  }
  func.func @transform_15(%arg0: i32) -> (i32, i32) {
    %c0_i32 = arith.constant 0 : i32
    %c0_i32_0 = arith.constant 0 : i32
    %c0_i32_1 = arith.constant 0 : i32
    return %c0_i32, %c0_i32_0 : i32, i32
  }
  func.func @transform_16(%arg0: i32) -> (i32, i32) {
    %c0_i32 = arith.constant 0 : i32
    %c0_i32_0 = arith.constant 0 : i32
    %c0_i32_1 = arith.constant 0 : i32
    return %c0_i32, %c0_i32_0 : i32, i32
  }
  func.func @transform_17(%arg0: i32) -> (i32, i32) {
    %c0_i32 = arith.constant 0 : i32
    %c0_i32_0 = arith.constant 0 : i32
    %c0_i32_1 = arith.constant 0 : i32
    return %c0_i32, %c0_i32_0 : i32, i32
  }
  func.func @transform_18(%arg0: i32) -> (i32, i32) {
    %c0_i32 = arith.constant 0 : i32
    %c0_i32_0 = arith.constant 0 : i32
    %c0_i32_1 = arith.constant 0 : i32
    return %c0_i32, %c0_i32_0 : i32, i32
  }
  func.func @transform_19(%arg0: i32) -> (i32, i32) {
    %c0_i32 = arith.constant 0 : i32
    %c0_i32_0 = arith.constant 0 : i32
    return %arg0, %c0_i32 : i32, i32
  }
}

</mosaic_0001>

<bundles_post_ra>
// kernel: lenet_forward.1
= control target key start
LH: loop header
LB: loop body
LE: loop exit
PB: predicated region body
PF: predicated region fallthrough
CT: control target
= control target key end

     0   :  { %s8871_s0 = inlined_call_operand.vmem [shape: f32[256,32], index: 0, kind: input, shape index: {}]   ;;  %s8872_s1 = inlined_call_operand.vmem [shape: bf16[5,32,168], index: 1, kind: input, shape index: {}]   ;;  %s8873_s2 = inlined_call_operand.vmem [shape: f32[1,168], index: 2, kind: input, shape index: {}]   ;;  %s8874_s3 = inlined_call_operand.vmem [shape: bf16[112,252], index: 3, kind: input, shape index: {}]   ;;  %s8875_s4 = inlined_call_operand.vmem [shape: bf16[112,252], index: 4, kind: input, shape index: {}]   ;;  %s8876_s5 = inlined_call_operand.vmem [shape: bf16[168,84], index: 5, kind: input, shape index: {}]   ;;  %s8877_s6 = inlined_call_operand.vmem [shape: bf16[168,84], index: 6, kind: input, shape index: {}]   ;;  %s8878_s7 = inlined_call_operand.vmem [shape: bf16[5,84,160], index: 7, kind: input, shape index: {}]   ;;  %s8879_s8 = inlined_call_operand.vmem [shape: f32[1,160], index: 8, kind: input, shape index: {}]   ;;  %s8880_s9 = inlined_call_operand.hbm [shape: bf16[40,108], index: 9, kind: input, shape index: {}]   ;;  %s8881_s10 = inlined_call_operand.hbm [shape: bf16[40,108], index: 10, kind: input, shape index: {}]   ;;  %s8882_s11 = inlined_call_operand.vmem [shape: bf16[160,80], index: 11, kind: input, shape index: {}]   ;;  %s8883_s12 = inlined_call_operand.hbm [shape: bf16[160,80], index: 12, kind: input, shape index: {}]   ;;  %s8884_s13 = inlined_call_operand.vmem [shape: bf16[5,80,120], index: 13, kind: input, shape index: {}]   ;;  %s8885_s14 = inlined_call_operand.vmem [shape: f32[1,120], index: 14, kind: input, shape index: {}]   ;;  %s8886_s15 = inlined_call_operand.vmem [shape: bf16[120,84], index: 15, kind: input, shape index: {}]   ;;  %s8887_s16 = inlined_call_operand.vmem [shape: f32[1,84], index: 16, kind: input, shape index: {}]   ;;  %s8888_s17 = inlined_call_operand.vmem [shape: bf16[84,128], index: 17, kind: input, shape index: {}]   ;;  %s8889_s18 = inlined_call_operand.vmem [shape: f32[1,128], index: 18, kind: input, shape index: {}]   ;;  %s8890_s19 = inlined_call_operand.vmem [shape: f32[8,128], index: 19, kind: output, shape index: {}]  }
   0x1   :  { %8901 = sst [smem:[#allocation80_spill]] %s8871_s0 }
   0x2   :  { %8902 = sst [smem:[#allocation81_spill]] %s8872_s1 }
   0x3   :  { %8903 = sst [smem:[#allocation82_spill]] %s8873_s2 }
   0x4   :  { %8904 = sst [smem:[#allocation83_spill]] %s8874_s3 }
   0x5   :  { %24 = vsyncpa [#allocation4], 0 }
   0x6   :  { %25 = vsyncpa [#allocation6], 0  ;;  %s6230_s0 = smov [#allocation5]   ;;  %s6231_s20 = smov [#allocation3]  }
   0x7   :  { %s61_s30 = sshll.u32 %s6230_s0, 4  ;;  %s49_s21 = sshll.u32 %s6231_s20, 4  ;;  %s62_s30 = int_to_ptr.vmem [resolvable:$true] %s61_s30  ;;  %s50_s21 = int_to_ptr.vmem [resolvable:$true] %s49_s21 }
   0x8   :  { %s6174_s1 = scalar_lea.vmem %s62_s30, 320  ;;  %p6179_p1 = scmp.lt.s32.totalorder %s62_s30, %s62_s30 }
   0x9   :  { %p6175_p0 = scmp.ne.s32.totalorder %s62_s30, %s6174_s1  ;;  %p6180_p2 = scmp.lt.s32.totalorder %s6174_s1, %s6174_s1 }
   0xb   :  { %p6181_p3 = por %p6180_p2, %p6179_p1 }
   0xd   :  { %p6182_p4 = pnand %p6181_p3, %p6175_p0 }
   0xf   :  { %6185 = shalt.err (!%p6182_p4)
}
  0x10   :  { %s6232_s22 = smov 64   ;;  %s6233_s2 = smov 4  }
  0x11   :  { %67 = dma.hbm_to_vmem [thread:$0]  %s8881_s10, 320, %s62_s30, [#allocation6], %s6232_s22, %s6232_s22, %s6233_s2  }
  0x12   :  { %s6194_s25 = scalar_lea.vmem %s50_s21, 320  ;;  %p6199_p6 = scmp.lt.s32.totalorder %s50_s21, %s50_s21 }
  0x13   :  { %p6195_p5 = scmp.ne.s32.totalorder %s50_s21, %s6194_s25  ;;  %p6200_p7 = scmp.lt.s32.totalorder %s6194_s25, %s6194_s25 }
  0x15   :  { %p6201_p8 = por %p6200_p7, %p6199_p6 }
  0x17   :  { %p6202_p9 = pnand %p6201_p8, %p6195_p5 }
  0x19   :  { %6205 = shalt.err (!%p6202_p9)
}
  0x1a   :  { %55 = dma.hbm_to_vmem [thread:$0]  %s8880_s9, 320, %s50_s21, [#allocation4], %s6232_s22, %s6232_s22, %s6233_s2  }
  0x1b   :  { %s6234_s27 = smov [#allocation7]  }
  0x1c   :  { %s75_s28 = sshll.u32 %s6234_s27, 4  ;;  %s76_s28 = int_to_ptr.vmem [resolvable:$true] %s75_s28 }
  0x1d   :  { %s6214_s29 = scalar_lea.vmem %s76_s28, 1280  ;;  %p6219_p11 = scmp.lt.s32.totalorder %s76_s28, %s76_s28 }
  0x1e   :  { %p6215_p10 = scmp.ne.s32.totalorder %s76_s28, %s6214_s29  ;;  %p6220_p12 = scmp.lt.s32.totalorder %s6214_s29, %s6214_s29 }
  0x20   :  { %p6221_p13 = por %p6220_p12, %p6219_p11 }
  0x22   :  { %p6222_p0 = pnand %p6221_p13, %p6215_p10 }
  0x24   :  { %6225 = shalt.err (!%p6222_p0)
}
  0x25   :  { %81 = dma.hbm_to_vmem [thread:$0]  %s8883_s12, 1280, %s76_s28, [#allocation6], %s6232_s22, %s6232_s22, %s6233_s2  }
  0x26   :  { %6226 = dma.done.wait [#allocation4], 320  }
  0x27   :  { %6227 = vsyncadd [#allocation4], 4294966976 }
  0x28   :  { %6228 = dma.done.wait [#allocation6], 1600  }
  0x29   :  { %6229 = vsyncadd [#allocation6], 4294965696  ;;  %v8894_v0 = vmov 0   ;;  %s8905_s20 = sld [smem:[#allocation81_spill]]  ;;  %vm229_vm0 = vcmask 261120   ;;  %vm2115_vm1 = vcmask 1014784  }
  0x2a   :  { %310 = vmatprep.mubr.bf16.mxu0 %v8894_v0  ;;  %571 = vmatprep.mubr.bf16.mxu1 %v8894_v0  ;;  %s8906_s30 = sld [smem:[#allocation80_spill]]  ;;  %vm2137_vm2 = vcmask 1045504   ;;  %vm2596_vm3 = vcmask 1043456   ;;  %vm3035_vm4 = vcmask 1041408   ;;  %vm2574_vm5 = vcmask 326656  }
  0x2b   :  { %s8990_s29 = sld [smem:[#allocation82_spill]]  ;;  %vm2879_vm6 = vcmask 687104   ;;  %vm4168_vm7 = vcmask 883712   ;;  %vm6237_vm8 = vmmov 0   ;;  %vm4688_vm9 = vcmask 654336  }
  0x2c   :  { %s9001_s9 = sld [smem:[#allocation83_spill]]  ;;  %vm5140_vm10 = vcmask 982016  }
  0x2f   :  { %v5922_v1 = vld [vmem:[%s8905_s20 + $0x34] ss:$8 sps:$4 sm:$0xff]   ;;  %v5926_v3 = vld [vmem:[%s8905_s20 + $0x30] ss:$8 sps:$4 sm:$0xff]   ;;  %v5928_v5 = vld [vmem:[%s8905_s20 + $0x24] ss:$8 sps:$4 sm:$0xff]  }
  0x30   :  { %v5924_v2 = vld [vmem:[%s8905_s20 + $0x14] ss:$8 sps:$4 sm:$0xff]   ;;  %290 = vmatprep.subr.bf16.mxu0 %v5922_v1  ;;  %v5927_v4 = vld [vmem:[%s8905_s20 + $0x10] ss:$8 sps:$4 sm:$0xff]   ;;  %v5930_v6 = vld [vmem:[%s8905_s20 + $0x4] ss:$8 sps:$4 sm:$0xff]  }
  0x31   :  { %551 = vmatprep.subr.bf16.mxu1 %v5924_v2  ;;  %291 = vmatpush1.bf16.msra.mxu0 %v5926_v3  ;;  %v5932_v7 = vld [vmem:[%s8905_s20 + $0x20] ss:$8 sps:$4 sm:$0xff]   ;;  %v158_v15 = vld [vmem:[%s8906_s30 + $0x11] sm:$0xff]  ;;  %v5939_v30 = vld [vmem:[%s8905_s20 + $0x44] ss:$8 sps:$4 sm:$0xff]  }
  0x32   :  { %552 = vmatpush1.bf16.msra.mxu1 %v5927_v4  ;;  %292 = vmatprep.subr.bf16.mxu0 %v5928_v5  ;;  %v5933_v8 = vld [vmem:[%s8905_s20] ss:$8 sps:$4 sm:$0xff]   ;;  %v5934_v16 = vld [vmem:[%s8905_s20 + $0x50] ss:$8 sps:$4 sm:$0xff]   ;;  %v5936_v17 = vld [vmem:[%s8905_s20 + $0x54] ss:$8 sps:$4 sm:$0xff]  }
  0x33   :  { %v156_v9 = vld [vmem:[%s8906_s30 + $0x1] sm:$0xff]  ;;  %v157_v10 = vld [vmem:[%s8906_s30 + $0x9] sm:$0xff]  ;;  %553 = vmatprep.subr.bf16.mxu1 %v5930_v6  ;;  %v159_v18 = vld [vmem:[%s8906_s30 + $0x19] sm:$0xff] }
  0x34   :  { %v104_v11 = vld [vmem:[%s8906_s30] sm:$0xff]  ;;  %v105_v12 = vld [vmem:[%s8906_s30 + $0x8] sm:$0xff]  ;;  %v188_v13 = vpack.c.bf16 %v157_v10, %v156_v9  ;;  %v106_v19 = vld [vmem:[%s8906_s30 + $0x10] sm:$0xff]  ;;  %v189_v21 = vpack.c.bf16 %v159_v18, %v158_v15 }
  0x35   :  { %v136_v14 = vpack.c.bf16 %v105_v12, %v104_v11  ;;  %293 = vmatpush1.bf16.msra.mxu0 %v5932_v7  ;;  %v107_v20 = vld [vmem:[%s8906_s30 + $0x18] sm:$0xff]  ;;  %v160_v23 = vld [vmem:[%s8906_s30 + $0x21] sm:$0xff]  ;;  %v161_v24 = vld [vmem:[%s8906_s30 + $0x29] sm:$0xff] }
  0x36   :  { %554 = vmatpush1.bf16.msra.mxu1 %v5933_v8  ;;  %865 = vmatprep.subr.bf16.mxu0 %v5936_v17  ;;  %v137_v22 = vpack.c.bf16 %v107_v20, %v106_v19  ;;  %v108_v25 = vld [vmem:[%s8906_s30 + $0x20] sm:$0xff]  ;;  %v109_v26 = vld [vmem:[%s8906_s30 + $0x28] sm:$0xff]  ;;  %v190_v27 = vpack.c.bf16 %v161_v24, %v160_v23  ;;  %v162_v31 = vld [vmem:[%s8906_s30 + $0x31] sm:$0xff] }
  0x37   :  { %v138_v28 = vpack.c.bf16 %v109_v26, %v108_v25  ;;  %v5937_v29 = vld [vmem:[%s8905_s20 + $0x40] ss:$8 sps:$4 sm:$0xff]   ;;  %v110_v33 = vld [vmem:[%s8906_s30 + $0x30] sm:$0xff]  ;;  %v111_v34 = vld [vmem:[%s8906_s30 + $0x38] sm:$0xff] }
  0x38   :  { %5301 = vmatmul.mubr.msk.bf16.vlgmr.msra.gmra.mxu0 %vm229_vm0, %v188_v13  ;;  %v163_v32 = vld [vmem:[%s8906_s30 + $0x39] sm:$0xff]  ;;  %v139_v38 = vpack.c.bf16 %v111_v34, %v110_v33  ;;  %v5945_v39 = vld [vmem:[%s8905_s20 + $0x64] ss:$8 sps:$4 sm:$0xff]   ;;  %v166_v48 = vld [vmem:[%s8906_s30 + $0x51] sm:$0xff] }
  0x39   :  { %5321 = vmatmul.mubr.msk.bf16.vlgmr.msra.gmra.mxu1 %vm229_vm0, %v136_v14  ;;  %320 = vmatprep.mubr.bf16.mxu0 %v8894_v0  ;;  %v5940_v35 = vld [vmem:[%s8905_s20 + $0x70] ss:$8 sps:$4 sm:$0xff]   ;;  %v5942_v36 = vld [vmem:[%s8905_s20 + $0x74] ss:$8 sps:$4 sm:$0xff]   ;;  %v191_v37 = vpack.c.bf16 %v163_v32, %v162_v31  ;;  %v5943_v40 = vld [vmem:[%s8905_s20 + $0x60] ss:$8 sps:$4 sm:$0xff]  }
  0x3a   :  { %581 = vmatprep.mubr.bf16.mxu1 %v8894_v0  ;;  %866 = vmatpush1.bf16.msra.mxu0 %v5934_v16  ;;  %v164_v41 = vld [vmem:[%s8906_s30 + $0x41] sm:$0xff]  ;;  %v165_v42 = vld [vmem:[%s8906_s30 + $0x49] sm:$0xff]  ;;  %v5948_v45 = vld [vmem:[%s8905_s20 + $0x94] ss:$8 sps:$4 sm:$0xff]  }
  0x3b   :  { %867 = vmatprep.subr.bf16.mxu0 %v5939_v30  ;;  %1243 = vmatprep.subr.bf16.mxu1 %v5942_v36  ;;  %v112_v43 = vld [vmem:[%s8906_s30 + $0x40] sm:$0xff]  ;;  %v113_v44 = vld [vmem:[%s8906_s30 + $0x48] sm:$0xff]  ;;  %v192_v46 = vpack.c.bf16 %v165_v42, %v164_v41  ;;  %v114_v50 = vld [vmem:[%s8906_s30 + $0x50] sm:$0xff] }
  0x3c   :  { %1244 = vmatpush1.bf16.msra.mxu1 %v5940_v35  ;;  %v140_v47 = vpack.c.bf16 %v113_v44, %v112_v43  ;;  %v167_v49 = vld [vmem:[%s8906_s30 + $0x59] sm:$0xff]  ;;  %v168_v54 = vld [vmem:[%s8906_s30 + $0x61] sm:$0xff]  ;;  %v169_v55 = vld [vmem:[%s8906_s30 + $0x69] sm:$0xff] }
  0x3d   :  { %1245 = vmatprep.subr.bf16.mxu1 %v5945_v39  ;;  %v115_v51 = vld [vmem:[%s8906_s30 + $0x58] sm:$0xff]  ;;  %v193_v52 = vpack.c.bf16 %v167_v49, %v166_v48  ;;  %v116_v56 = vld [vmem:[%s8906_s30 + $0x60] sm:$0xff]  ;;  %v117_v57 = vld [vmem:[%s8906_s30 + $0x68] sm:$0xff]  ;;  %v194_v58 = vpack.c.bf16 %v169_v55, %v168_v54 }
  0x3e   :  { %868 = vmatpush1.bf16.msra.mxu0 %v5937_v29  ;;  %v141_v53 = vpack.c.bf16 %v115_v51, %v114_v50  ;;  %v142_v59 = vpack.c.bf16 %v117_v57, %v116_v56  ;;  %v170_v60 = vld [vmem:[%s8906_s30 + $0x71] sm:$0xff]  ;;  %v171_v61 = vld [vmem:[%s8906_s30 + $0x79] sm:$0xff]  ;;  %v172_v3 = vld [vmem:[%s8906_s30 + $0x81] sm:$0xff] }
  0x3f   :  { %1621 = vmatprep.subr.bf16.mxu0 %v5948_v45  ;;  %v118_v62 = vld [vmem:[%s8906_s30 + $0x70] sm:$0xff]  ;;  %v119_v63 = vld [vmem:[%s8906_s30 + $0x78] sm:$0xff]  ;;  %v195_v1 = vpack.c.bf16 %v171_v61, %v170_v60  ;;  %v120_v5 = vld [vmem:[%s8906_s30 + $0x80] sm:$0xff] }
  0x40   :  { %5302 = vmatmul.mubr.msk.bf16.gmra.mxu0 %vm229_vm0, %v189_v21  ;;  %1246 = vmatpush1.bf16.msra.mxu1 %v5943_v40  ;;  %v143_v2 = vpack.c.bf16 %v119_v63, %v118_v62  ;;  %v173_v4 = vld [vmem:[%s8906_s30 + $0x89] sm:$0xff]  ;;  %v174_v9 = vld [vmem:[%s8906_s30 + $0x91] sm:$0xff]  ;;  %v175_v10 = vld [vmem:[%s8906_s30 + $0x99] sm:$0xff] }
  0x41   :  { %5322 = vmatmul.mubr.msk.bf16.gmra.mxu1 %vm229_vm0, %v137_v22  ;;  %330 = vmatprep.mubr.bf16.mxu0 %v8894_v0  ;;  %v121_v6 = vld [vmem:[%s8906_s30 + $0x88] sm:$0xff]  ;;  %v196_v7 = vpack.c.bf16 %v173_v4, %v172_v3  ;;  %v122_v11 = vld [vmem:[%s8906_s30 + $0x90] sm:$0xff]  ;;  %v123_v12 = vld [vmem:[%s8906_s30 + $0x98] sm:$0xff]  ;;  %v197_v13 = vpack.c.bf16 %v175_v10, %v174_v9 }
  0x42   :  { %591 = vmatprep.mubr.bf16.mxu1 %v8894_v0  ;;  %v144_v8 = vpack.c.bf16 %v121_v6, %v120_v5  ;;  %v145_v14 = vpack.c.bf16 %v123_v12, %v122_v11  ;;  %v176_v15 = vld [vmem:[%s8906_s30 + $0xa1] sm:$0xff]  ;;  %v177_v16 = vld [vmem:[%s8906_s30 + $0xa9] sm:$0xff]  ;;  %v178_v21 = vld [vmem:[%s8906_s30 + $0xb1] sm:$0xff] }
  0x43   :  { %v124_v17 = vld [vmem:[%s8906_s30 + $0xa0] sm:$0xff]  ;;  %v125_v18 = vld [vmem:[%s8906_s30 + $0xa8] sm:$0xff]  ;;  %v198_v19 = vpack.c.bf16 %v177_v16, %v176_v15  ;;  %v126_v23 = vld [vmem:[%s8906_s30 + $0xb0] sm:$0xff] }
  0x44   :  { %v146_v20 = vpack.c.bf16 %v125_v18, %v124_v17  ;;  %v179_v22 = vld [vmem:[%s8906_s30 + $0xb9] sm:$0xff]  ;;  %v129_v30 = vld [vmem:[%s8906_s30 + $0xc8] sm:$0xff]  ;;  %v182_v33 = vld [vmem:[%s8906_s30 + $0xd1] sm:$0xff] }
  0x45   :  { %v127_v24 = vld [vmem:[%s8906_s30 + $0xb8] sm:$0xff]  ;;  %v199_v25 = vpack.c.bf16 %v179_v22, %v178_v21  ;;  %v128_v29 = vld [vmem:[%s8906_s30 + $0xc0] sm:$0xff]  ;;  %v130_v35 = vld [vmem:[%s8906_s30 + $0xd0] sm:$0xff] }
  0x46   :  { %v147_v26 = vpack.c.bf16 %v127_v24, %v126_v23  ;;  %v148_v32 = vpack.c.bf16 %v129_v30, %v128_v29  ;;  %v183_v34 = vld [vmem:[%s8906_s30 + $0xd9] sm:$0xff]  ;;  %v184_v39 = vld [vmem:[%s8906_s30 + $0xe1] sm:$0xff]  ;;  %v185_v40 = vld [vmem:[%s8906_s30 + $0xe9] sm:$0xff] }
  0x47   :  { %v131_v36 = vld [vmem:[%s8906_s30 + $0xd8] sm:$0xff]  ;;  %v132_v41 = vld [vmem:[%s8906_s30 + $0xe0] sm:$0xff]  ;;  %v133_v42 = vld [vmem:[%s8906_s30 + $0xe8] sm:$0xff]  ;;  %v202_v43 = vpack.c.bf16 %v185_v40, %v184_v39 }
  0x48   :  { %5303 = vmatmul.mubr.msk.bf16.gmra.mxu0 %vm229_vm0, %v190_v27  ;;  %v180_v27 = vld [vmem:[%s8906_s30 + $0xc1] sm:$0xff]  ;;  %v150_v44 = vpack.c.bf16 %v133_v42, %v132_v41  ;;  %v186_v45 = vld [vmem:[%s8906_s30 + $0xf1] sm:$0xff] }
  0x49   :  { %5323 = vmatmul.mubr.msk.bf16.gmra.mxu1 %vm229_vm0, %v138_v28  ;;  %340 = vmatprep.mubr.bf16.mxu0 %v8894_v0  ;;  %v181_v28 = vld [vmem:[%s8906_s30 + $0xc9] sm:$0xff]  ;;  %v135_v48 = vld [vmem:[%s8906_s30 + $0xf8] sm:$0xf] }
  0x4a   :  { %601 = vmatprep.mubr.bf16.mxu1 %v8894_v0  ;;  %v200_v31 = vpack.c.bf16 %v181_v28, %v180_v27  ;;  %v732_v51 = vld [vmem:[%s8906_s30 + $0x2] sm:$0xff]  ;;  %v1111_v54 = vld [vmem:[%s8906_s30 + $0xb] sm:$0xff]  ;;  %v735_v60 = vld [vmem:[%s8906_s30 + $0x1a] sm:$0xff] }
  0x4b   :  { %v5946_v57 = vld [vmem:[%s8905_s20 + $0x90] ss:$8 sps:$4 sm:$0xff]   ;;  %v5949_v63 = vld [vmem:[%s8905_s20 + $0x80] ss:$8 sps:$4 sm:$0xff]  }
  0x4c   :  { %v1112_v61 = vld [vmem:[%s8906_s30 + $0x13] sm:$0xff]  ;;  %v1113_v62 = vld [vmem:[%s8906_s30 + $0x1b] sm:$0xff]  ;;  %v737_v4 = vld [vmem:[%s8906_s30 + $0x2a] sm:$0xff] }
  0x4d   :  { %v736_v3 = vld [vmem:[%s8906_s30 + $0x22] sm:$0xff]  ;;  %v1115_v6 = vld [vmem:[%s8906_s30 + $0x2b] sm:$0xff]  ;;  %v739_v10 = vld [vmem:[%s8906_s30 + $0x3a] sm:$0xff] }
  0x4e   :  { %v1114_v5 = vld [vmem:[%s8906_s30 + $0x23] sm:$0xff]  ;;  %v738_v9 = vld [vmem:[%s8906_s30 + $0x32] sm:$0xff]  ;;  %v1117_v12 = vld [vmem:[%s8906_s30 + $0x3b] sm:$0xff] }
  0x4f   :  { %v1116_v11 = vld [vmem:[%s8906_s30 + $0x33] sm:$0xff]  ;;  %v740_v15 = vld [vmem:[%s8906_s30 + $0x42] sm:$0xff]  ;;  %v741_v16 = vld [vmem:[%s8906_s30 + $0x4a] sm:$0xff] }
  0x50   :  { %5304 = vmatmul.mubr.msk.bf16.gmra.mxu0 %vm229_vm0, %v191_v37  ;;  %v201_v37 = vpack.c.bf16 %v183_v34, %v182_v33  ;;  %v1118_v17 = vld [vmem:[%s8906_s30 + $0x43] sm:$0xff]  ;;  %v1119_v18 = vld [vmem:[%s8906_s30 + $0x4b] sm:$0xff]  ;;  %v743_v22 = vld [vmem:[%s8906_s30 + $0x5a] sm:$0xff] }
  0x51   :  { %5324 = vmatmul.mubr.msk.bf16.gmra.mxu1 %vm229_vm0, %v139_v38  ;;  %350 = vmatprep.mubr.bf16.mxu0 %v8894_v0  ;;  %v149_v38 = vpack.c.bf16 %v131_v36, %v130_v35  ;;  %v742_v21 = vld [vmem:[%s8906_s30 + $0x52] sm:$0xff]  ;;  %v1121_v24 = vld [vmem:[%s8906_s30 + $0x5b] sm:$0xff]  ;;  %v745_v28 = vld [vmem:[%s8906_s30 + $0x6a] sm:$0xff] }
  0x52   :  { %611 = vmatprep.mubr.bf16.mxu1 %v8894_v0  ;;  %v1120_v23 = vld [vmem:[%s8906_s30 + $0x53] sm:$0xff]  ;;  %v744_v27 = vld [vmem:[%s8906_s30 + $0x62] sm:$0xff]  ;;  %v1123_v30 = vld [vmem:[%s8906_s30 + $0x6b] sm:$0xff] }
  0x53   :  { %v1122_v29 = vld [vmem:[%s8906_s30 + $0x63] sm:$0xff]  ;;  %v746_v33 = vld [vmem:[%s8906_s30 + $0x72] sm:$0xff]  ;;  %v747_v34 = vld [vmem:[%s8906_s30 + $0x7a] sm:$0xff] }
  0x54   :  { %v1124_v35 = vld [vmem:[%s8906_s30 + $0x73] sm:$0xff]  ;;  %v1125_v36 = vld [vmem:[%s8906_s30 + $0x7b] sm:$0xff]  ;;  %v749_v40 = vld [vmem:[%s8906_s30 + $0x8a] sm:$0xff] }
  0x55   :  { %v748_v39 = vld [vmem:[%s8906_s30 + $0x82] sm:$0xff]  ;;  %v1127_v42 = vld [vmem:[%s8906_s30 + $0x8b] sm:$0xff] }
  0x56   :  { %v1126_v41 = vld [vmem:[%s8906_s30 + $0x83] sm:$0xff] }
  0x58   :  { %5305 = vmatmul.mubr.msk.bf16.gmra.mxu0 %vm229_vm0, %v192_v46  ;;  %v187_v46 = vld [vmem:[%s8906_s30 + $0xf9] sm:$0xf] }
  0x59   :  { %5325 = vmatmul.mubr.msk.bf16.gmra.mxu1 %vm229_vm0, %v140_v47  ;;  %360 = vmatprep.mubr.bf16.mxu0 %v8894_v0  ;;  %v134_v47 = vld [vmem:[%s8906_s30 + $0xf0] sm:$0xff]  ;;  %v203_v49 = vpack.c.bf16 %v187_v46, %v186_v45 }
  0x5a   :  { %621 = vmatprep.mubr.bf16.mxu1 %v8894_v0  ;;  %v151_v50 = vpack.c.bf16 %v135_v48, %v134_v47  ;;  %v750_v47 = vld [vmem:[%s8906_s30 + $0x92] sm:$0xff] }
  0x60   :  { %5306 = vmatmul.mubr.msk.bf16.gmra.mxu0 %vm229_vm0, %v193_v52  ;;  %v733_v52 = vld [vmem:[%s8906_s30 + $0xa] sm:$0xff] }
  0x61   :  { %5326 = vmatmul.mubr.msk.bf16.gmra.mxu1 %vm229_vm0, %v141_v53  ;;  %370 = vmatprep.mubr.bf16.mxu0 %v8894_v0  ;;  %v1110_v53 = vld [vmem:[%s8906_s30 + $0x3] sm:$0xff]  ;;  %v764_v55 = vpack.c.bf16 %v733_v52, %v732_v51  ;;  %v1129_v51 = vld [vmem:[%s8906_s30 + $0x9b] sm:$0xff] }
  0x62   :  { %631 = vmatprep.mubr.bf16.mxu1 %v8894_v0  ;;  %v1142_v56 = vpack.c.bf16 %v1111_v54, %v1110_v53 }
  0x68   :  { %5307 = vmatmul.mubr.msk.bf16.gmra.mxu0 %vm229_vm0, %v194_v58  ;;  %v5951_v58 = vld [vmem:[%s8905_s20 + $0x84] ss:$8 sps:$4 sm:$0xff]  }
  0x69   :  { %5327 = vmatmul.mubr.msk.bf16.gmra.mxu1 %vm229_vm0, %v142_v59  ;;  %380 = vmatprep.mubr.bf16.mxu0 %v8894_v0  ;;  %v734_v59 = vld [vmem:[%s8906_s30 + $0x12] sm:$0xff] }
  0x6a   :  { %641 = vmatprep.mubr.bf16.mxu1 %v8894_v0 }
  0x70   :  { %5308 = vmatmul.mubr.msk.bf16.gmra.mxu0 %vm229_vm0, %v195_v1  ;;  %v765_v1 = vpack.c.bf16 %v735_v60, %v734_v59 }
  0x71   :  { %5328 = vmatmul.mubr.msk.bf16.gmra.mxu1 %vm229_vm0, %v143_v2  ;;  %390 = vmatprep.mubr.bf16.mxu0 %v8894_v0  ;;  %v1143_v2 = vpack.c.bf16 %v1113_v62, %v1112_v61 }
  0x72   :  { %651 = vmatprep.mubr.bf16.mxu1 %v8894_v0 }
  0x78   :  { %5309 = vmatmul.mubr.msk.bf16.gmra.mxu0 %vm229_vm0, %v196_v7  ;;  %v766_v7 = vpack.c.bf16 %v737_v4, %v736_v3  ;;  %v753_v4 = vld [vmem:[%s8906_s30 + $0xaa] sm:$0xff] }
  0x79   :  { %5329 = vmatmul.mubr.msk.bf16.gmra.mxu1 %vm229_vm0, %v144_v8  ;;  %400 = vmatprep.mubr.bf16.mxu0 %v8894_v0  ;;  %v1144_v8 = vpack.c.bf16 %v1115_v6, %v1114_v5  ;;  %v1130_v5 = vld [vmem:[%s8906_s30 + $0xa3] sm:$0xff]  ;;  %v1131_v6 = vld [vmem:[%s8906_s30 + $0xab] sm:$0xff] }
  0x7a   :  { %661 = vmatprep.mubr.bf16.mxu1 %v8894_v0 }
  0x80   :  { %5310 = vmatmul.mubr.msk.bf16.gmra.mxu0 %vm229_vm0, %v197_v13  ;;  %v767_v13 = vpack.c.bf16 %v739_v10, %v738_v9 }
  0x81   :  { %5330 = vmatmul.mubr.msk.bf16.gmra.mxu1 %vm229_vm0, %v145_v14  ;;  %410 = vmatprep.mubr.bf16.mxu0 %v8894_v0  ;;  %v1145_v14 = vpack.c.bf16 %v1117_v12, %v1116_v11 }
  0x82   :  { %671 = vmatprep.mubr.bf16.mxu1 %v8894_v0 }
  0x88   :  { %5311 = vmatmul.mubr.msk.bf16.gmra.mxu0 %vm229_vm0, %v198_v19  ;;  %v768_v19 = vpack.c.bf16 %v741_v16, %v740_v15 }
  0x89   :  { %5331 = vmatmul.mubr.msk.bf16.gmra.mxu1 %vm229_vm0, %v146_v20  ;;  %420 = vmatprep.mubr.bf16.mxu0 %v8894_v0  ;;  %v1146_v20 = vpack.c.bf16 %v1119_v18, %v1118_v17 }
  0x8a   :  { %681 = vmatprep.mubr.bf16.mxu1 %v8894_v0 }
  0x90   :  { %5312 = vmatmul.mubr.msk.bf16.gmra.mxu0 %vm229_vm0, %v199_v25  ;;  %v769_v25 = vpack.c.bf16 %v743_v22, %v742_v21  ;;  %v755_v22 = vld [vmem:[%s8906_s30 + $0xba] sm:$0xff] }
  0x91   :  { %5332 = vmatmul.mubr.msk.bf16.gmra.mxu1 %vm229_vm0, %v147_v26  ;;  %430 = vmatprep.mubr.bf16.mxu0 %v8894_v0  ;;  %v1147_v26 = vpack.c.bf16 %v1121_v24, %v1120_v23  ;;  %v1132_v23 = vld [vmem:[%s8906_s30 + $0xb3] sm:$0xff]  ;;  %v1133_v24 = vld [vmem:[%s8906_s30 + $0xbb] sm:$0xff] }
  0x92   :  { %691 = vmatprep.mubr.bf16.mxu1 %v8894_v0 }
  0x98   :  { %5313 = vmatmul.mubr.msk.bf16.gmra.mxu0 %vm229_vm0, %v200_v31  ;;  %v770_v31 = vpack.c.bf16 %v745_v28, %v744_v27 }
  0x99   :  { %5333 = vmatmul.mubr.msk.bf16.gmra.mxu1 %vm229_vm0, %v148_v32  ;;  %440 = vmatprep.mubr.bf16.mxu0 %v8894_v0  ;;  %v1148_v32 = vpack.c.bf16 %v1123_v30, %v1122_v29 }
  0x9a   :  { %701 = vmatprep.mubr.bf16.mxu1 %v8894_v0 }
  0xa0   :  { %5314 = vmatmul.mubr.msk.bf16.gmra.mxu0 %vm229_vm0, %v201_v37  ;;  %v771_v37 = vpack.c.bf16 %v747_v34, %v746_v33 }
  0xa1   :  { %5334 = vmatmul.mubr.msk.bf16.gmra.mxu1 %vm229_vm0, %v149_v38  ;;  %450 = vmatprep.mubr.bf16.mxu0 %v8894_v0  ;;  %v1149_v38 = vpack.c.bf16 %v1125_v36, %v1124_v35 }
  0xa2   :  { %711 = vmatprep.mubr.bf16.mxu1 %v8894_v0 }
  0xa8   :  { %5315 = vmatmul.mubr.msk.bf16.gmra.mxu0 %vm229_vm0, %v202_v43  ;;  %v772_v43 = vpack.c.bf16 %v749_v40, %v748_v39  ;;  %v757_v40 = vld [vmem:[%s8906_s30 + $0xca] sm:$0xff] }
  0xa9   :  { %5335 = vmatmul.mubr.msk.bf16.gmra.mxu1 %vm229_vm0, %v150_v44  ;;  %460 = vmatprep.mubr.bf16.mxu0 %v8894_v0  ;;  %v1150_v44 = vpack.c.bf16 %v1127_v42, %v1126_v41  ;;  %v1134_v41 = vld [vmem:[%s8906_s30 + $0xc3] sm:$0xff]  ;;  %v1135_v42 = vld [vmem:[%s8906_s30 + $0xcb] sm:$0xff] }
  0xaa   :  { %721 = vmatprep.mubr.bf16.mxu1 %v8894_v0 }
  0xb0   :  { %5316 = vmatmul.mubr.msk.bf16.gmra.mxu0 %vm229_vm0, %v203_v49  ;;  %v751_v49 = vld [vmem:[%s8906_s30 + $0x9a] sm:$0xff] }
  0xb1   :  { %5336 = vmatmul.mubr.msk.bf16.gmra.mxu1 %vm229_vm0, %v151_v50  ;;  %885 = vmatprep.mubr.bf16.mxu0 %v8894_v0  ;;  %v1128_v50 = vld [vmem:[%s8906_s30 + $0x93] sm:$0xff] }
  0xb2   :  { %1263 = vmatprep.mubr.bf16.mxu1 %v8894_v0 }
  0xb8   :  { %5345 = vmatmul.mubr.msk.bf16.vlgmr.msra.gmra.mxu0 %vm229_vm0, %v764_v55 }
  0xb9   :  { %5369 = vmatmul.mubr.msk.bf16.vlgmr.msra.gmra.mxu1 %vm229_vm0, %v1142_v56  ;;  %895 = vmatprep.mubr.bf16.mxu0 %v8894_v0 }
  0xba   :  { %1273 = vmatprep.mubr.bf16.mxu1 %v8894_v0  ;;  %1622 = vmatpush1.bf16.msra.mxu0 %v5946_v57  ;;  %v773_v57 = vpack.c.bf16 %v751_v49, %v750_v47 }
  0xbb   :  { %1623 = vmatprep.subr.bf16.mxu0 %v5951_v58  ;;  %v1151_v58 = vpack.c.bf16 %v1129_v51, %v1128_v50  ;;  %v1154_v50 = vpack.c.bf16 %v1135_v42, %v1134_v41  ;;  %v763_v42 = vld [vmem:[%s8906_s30 + $0xfa] sm:$0xf] }
  0xbe   :  { %1624 = vmatpush1.bf16.msra.mxu0 %v5949_v63 }
  0xbf   :  { %2776 = vmatprep.subr.bf16.mxu0 %v8894_v0 }
  0xc0   :  { %5346 = vmatmul.mubr.msk.bf16.gmra.mxu0 %vm229_vm0, %v765_v1 }
  0xc1   :  { %5370 = vmatmul.mubr.msk.bf16.gmra.mxu1 %vm229_vm0, %v1143_v2  ;;  %905 = vmatprep.mubr.bf16.mxu0 %v8894_v0  ;;  %v752_v2 = vld [vmem:[%s8906_s30 + $0xa2] sm:$0xff] }
  0xc2   :  { %1283 = vmatprep.mubr.bf16.mxu1 %v8894_v0  ;;  %v774_v12 = vpack.c.bf16 %v753_v4, %v752_v2 }
  0xc8   :  { %5347 = vmatmul.mubr.msk.bf16.gmra.mxu0 %vm229_vm0, %v766_v7 }
  0xc9   :  { %5371 = vmatmul.mubr.msk.bf16.gmra.mxu1 %vm229_vm0, %v1144_v8  ;;  %915 = vmatprep.mubr.bf16.mxu0 %v8894_v0 }
  0xca   :  { %1293 = vmatprep.mubr.bf16.mxu1 %v8894_v0 }
  0xd0   :  { %5348 = vmatmul.mubr.msk.bf16.gmra.mxu0 %vm229_vm0, %v767_v13  ;;  %v1152_v13 = vpack.c.bf16 %v1131_v6, %v1130_v5 }
  0xd1   :  { %5372 = vmatmul.mubr.msk.bf16.gmra.mxu1 %vm229_vm0, %v1145_v14  ;;  %925 = vmatprep.mubr.bf16.mxu0 %v8894_v0 }
  0xd2   :  { %1303 = vmatprep.mubr.bf16.mxu1 %v8894_v0 }
  0xd8   :  { %5349 = vmatmul.mubr.msk.bf16.gmra.mxu0 %vm229_vm0, %v768_v19 }
  0xd9   :  { %5373 = vmatmul.mubr.msk.bf16.gmra.mxu1 %vm229_vm0, %v1146_v20  ;;  %935 = vmatprep.mubr.bf16.mxu0 %v8894_v0  ;;  %v754_v20 = vld [vmem:[%s8906_s30 + $0xb2] sm:$0xff] }
  0xda   :  { %1313 = vmatprep.mubr.bf16.mxu1 %v8894_v0  ;;  %v775_v30 = vpack.c.bf16 %v755_v22, %v754_v20  ;;  %v761_v20 = vld [vmem:[%s8906_s30 + $0xea] sm:$0xff] }
  0xdb   :  { %v1138_v22 = vld [vmem:[%s8906_s30 + $0xe3] sm:$0xff] }
  0xe0   :  { %5350 = vmatmul.mubr.msk.bf16.gmra.mxu0 %vm229_vm0, %v769_v25 }
  0xe1   :  { %5374 = vmatmul.mubr.msk.bf16.gmra.mxu1 %vm229_vm0, %v1147_v26  ;;  %945 = vmatprep.mubr.bf16.mxu0 %v8894_v0 }
  0xe2   :  { %1323 = vmatprep.mubr.bf16.mxu1 %v8894_v0 }
  0xe8   :  { %5351 = vmatmul.mubr.msk.bf16.gmra.mxu0 %vm229_vm0, %v770_v31  ;;  %v1153_v31 = vpack.c.bf16 %v1133_v24, %v1132_v23  ;;  %v1139_v23 = vld [vmem:[%s8906_s30 + $0xeb] sm:$0xff] }
  0xe9   :  { %5375 = vmatmul.mubr.msk.bf16.gmra.mxu1 %vm229_vm0, %v1148_v32  ;;  %955 = vmatprep.mubr.bf16.mxu0 %v8894_v0 }
  0xea   :  { %1333 = vmatprep.mubr.bf16.mxu1 %v8894_v0 }
  0xf0   :  { %5352 = vmatmul.mubr.msk.bf16.gmra.mxu0 %vm229_vm0, %v771_v37 }
  0xf1   :  { %5376 = vmatmul.mubr.msk.bf16.gmra.mxu1 %vm229_vm0, %v1149_v38  ;;  %965 = vmatprep.mubr.bf16.mxu0 %v8894_v0  ;;  %v756_v38 = vld [vmem:[%s8906_s30 + $0xc2] sm:$0xff] }
  0xf2   :  { %1343 = vmatprep.mubr.bf16.mxu1 %v8894_v0  ;;  %v776_v49 = vpack.c.bf16 %v757_v40, %v756_v38  ;;  %v762_v40 = vld [vmem:[%s8906_s30 + $0xf2] sm:$0xff] }
  0xf8   :  { %v312_v45 = vpop.f32.mrf.mxu0  ;;  %5353 = vmatmul.mubr.msk.bf16.gmra.mxu0 %vm229_vm0, %v772_v43 }
  0xf9   :  { %v573_v46 = vpop.f32.mrf.mxu1  ;;  %5377 = vmatmul.mubr.msk.bf16.gmra.mxu1 %vm229_vm0, %v1150_v44  ;;  %975 = vmatprep.mubr.bf16.mxu0 %v8894_v0 }
  0xfa   :  { %v6811_v48 = vadd.f32 %v573_v46, %v312_v45  ;;  %1353 = vmatprep.mubr.bf16.mxu1 %v8894_v0  ;;  %v314_v52 = vpop.f32.mrf.mxu0 }
  0xfb   :  { %v575_v53 = vpop.f32.mrf.mxu1 }
  0xfc   :  { %v6824_v54 = vadd.f32 %v575_v53, %v314_v52  ;;  %v316_v55 = vpop.f32.mrf.mxu0 }
  0xfd   :  { %v577_v56 = vpop.f32.mrf.mxu1 }
  0xfe   :  { %v6826_v59 = vadd.f32 %v577_v56, %v316_v55  ;;  %v318_v60 = vpop.f32.mrf.mxu0 }
  0xff   :  { %v579_v61 = vpop.f32.mrf.mxu1 }
 0x100   :  { %v6828_v62 = vadd.f32 %v579_v61, %v318_v60  ;;  %v322_v63 = vpop.f32.mrf.mxu0  ;;  %5354 = vmatmul.mubr.msk.bf16.gmra.mxu0 %vm229_vm0, %v773_v57  ;;  %v759_v61 = vld [vmem:[%s8906_s30 + $0xda] sm:$0xff] }
 0x101   :  { %v583_v1 = vpop.f32.mrf.mxu1  ;;  %5378 = vmatmul.mubr.msk.bf16.gmra.mxu1 %vm229_vm0, %v1151_v58  ;;  %985 = vmatprep.mubr.bf16.mxu0 %v8894_v0  ;;  %v758_v58 = vld [vmem:[%s8906_s30 + $0xd2] sm:$0xff] }
 0x102   :  { %v6835_v3 = vadd.f32 %v583_v1, %v322_v63  ;;  %1363 = vmatprep.mubr.bf16.mxu1 %v8894_v0  ;;  %v324_v7 = vpop.f32.mrf.mxu0  ;;  %v1136_v63 = vld [vmem:[%s8906_s30 + $0xd3] sm:$0xff]  ;;  %v1137_v1 = vld [vmem:[%s8906_s30 + $0xdb] sm:$0xff] }
 0x103   :  { %v585_v8 = vpop.f32.mrf.mxu1 }
 0x104   :  { %v6848_v9 = vadd.f32 %v585_v8, %v324_v7  ;;  %v326_v10 = vpop.f32.mrf.mxu0  ;;  %v777_v8 = vpack.c.bf16 %v759_v61, %v758_v58 }
 0x105   :  { %v587_v11 = vpop.f32.mrf.mxu1 }
 0x106   :  { %v6850_v14 = vadd.f32 %v587_v11, %v326_v10  ;;  %v328_v15 = vpop.f32.mrf.mxu0  ;;  %v1155_v10 = vpack.c.bf16 %v1137_v1, %v1136_v63 }
 0x107   :  { %v589_v16 = vpop.f32.mrf.mxu1 }
 0x108   :  { %v6852_v17 = vadd.f32 %v589_v16, %v328_v15  ;;  %v332_v18 = vpop.f32.mrf.mxu0  ;;  %5355 = vmatmul.mubr.msk.bf16.gmra.mxu0 %vm229_vm0, %v774_v12 }
 0x109   :  { %v593_v19 = vpop.f32.mrf.mxu1  ;;  %5379 = vmatmul.mubr.msk.bf16.gmra.mxu1 %vm229_vm0, %v1152_v13  ;;  %995 = vmatprep.mubr.bf16.mxu0 %v8894_v0 }
 0x10a   :  { %v6859_v21 = vadd.f32 %v593_v19, %v332_v18  ;;  %1373 = vmatprep.mubr.bf16.mxu1 %v8894_v0  ;;  %v334_v25 = vpop.f32.mrf.mxu0  ;;  %v760_v18 = vld [vmem:[%s8906_s30 + $0xe2] sm:$0xff] }
 0x10b   :  { %v595_v26 = vpop.f32.mrf.mxu1 }
 0x10c   :  { %v6872_v27 = vadd.f32 %v595_v26, %v334_v25  ;;  %v336_v28 = vpop.f32.mrf.mxu0 }
 0x10d   :  { %v597_v29 = vpop.f32.mrf.mxu1 }
 0x10e   :  { %v6874_v32 = vadd.f32 %v597_v29, %v336_v28  ;;  %v338_v33 = vpop.f32.mrf.mxu0 }
 0x10f   :  { %v599_v34 = vpop.f32.mrf.mxu1 }
 0x110   :  { %v6876_v35 = vadd.f32 %v599_v34, %v338_v33  ;;  %v342_v36 = vpop.f32.mrf.mxu0  ;;  %5356 = vmatmul.mubr.msk.bf16.gmra.mxu0 %vm229_vm0, %v775_v30  ;;  %v778_v30 = vpack.c.bf16 %v761_v20, %v760_v18 }
 0x111   :  { %v603_v37 = vpop.f32.mrf.mxu1  ;;  %5380 = vmatmul.mubr.msk.bf16.gmra.mxu1 %vm229_vm0, %v1153_v31  ;;  %1005 = vmatprep.mubr.bf16.mxu0 %v8894_v0  ;;  %v1156_v31 = vpack.c.bf16 %v1139_v23, %v1138_v22 }
 0x112   :  { %v6883_v39 = vadd.f32 %v603_v37, %v342_v36  ;;  %1383 = vmatprep.mubr.bf16.mxu1 %v8894_v0  ;;  %v344_v43 = vpop.f32.mrf.mxu0 }
 0x113   :  { %v605_v44 = vpop.f32.mrf.mxu1 }
 0x114   :  { %v6896_v45 = vadd.f32 %v605_v44, %v344_v43  ;;  %v346_v46 = vpop.f32.mrf.mxu0  ;;  %v1140_v43 = vld [vmem:[%s8906_s30 + $0xf3] sm:$0xff]  ;;  %v1141_v44 = vld [vmem:[%s8906_s30 + $0xfb] sm:$0xf] }
 0x115   :  { %v607_v47 = vpop.f32.mrf.mxu1 }
 0x116   :  { %v6898_v51 = vadd.f32 %v607_v47, %v346_v46  ;;  %v348_v52 = vpop.f32.mrf.mxu0 }
 0x117   :  { %v609_v53 = vpop.f32.mrf.mxu1 }
 0x118   :  { %v6900_v55 = vadd.f32 %v609_v53, %v348_v52  ;;  %v352_v56 = vpop.f32.mrf.mxu0  ;;  %5357 = vmatmul.mubr.msk.bf16.gmra.mxu0 %vm229_vm0, %v776_v49  ;;  %v779_v53 = vpack.c.bf16 %v763_v42, %v762_v40 }
 0x119   :  { %v613_v57 = vpop.f32.mrf.mxu1  ;;  %5381 = vmatmul.mubr.msk.bf16.gmra.mxu1 %vm229_vm0, %v1154_v50  ;;  %1015 = vmatprep.mubr.bf16.mxu0 %v8894_v0 }
 0x11a   :  { %v6907_v60 = vadd.f32 %v613_v57, %v352_v56  ;;  %1393 = vmatprep.mubr.bf16.mxu1 %v8894_v0  ;;  %v354_v2 = vpop.f32.mrf.mxu0  ;;  %v1157_v56 = vpack.c.bf16 %v1141_v44, %v1140_v43 }
 0x11b   :  { %v615_v4 = vpop.f32.mrf.mxu1 }
 0x11c   :  { %v6920_v5 = vadd.f32 %v615_v4, %v354_v2  ;;  %v356_v6 = vpop.f32.mrf.mxu0  ;;  %v1488_v4 = vld [vmem:[%s8906_s30 + $0x4] sm:$0xff] }
 0x11d   :  { %v617_v7 = vpop.f32.mrf.mxu1 }
 0x11e   :  { %v6922_v11 = vadd.f32 %v617_v7, %v356_v6  ;;  %v6924_v12 = vpop.f32.mrf.mxu0  ;;  %v1489_v6 = vld [vmem:[%s8906_s30 + $0xc] sm:$0xff] }
 0x11f   :  { %8907 = vst [vmem:[#allocation10_spill] sm:$0xff] %v6924_v12  ;;  %v6926_v13 = vpop.f32.mrf.mxu1  ;;  %v1520_v18 = vpack.c.bf16 %v1489_v6, %v1488_v4 }
 0x120   :  { %8908 = vst [vmem:[#allocation11_spill] sm:$0xff] %v6926_v13  ;;  %v362_v15 = vpop.f32.mrf.mxu0  ;;  %5358 = vmatmul.mubr.msk.bf16.gmra.mxu0 %vm229_vm0, %v777_v8 }
 0x121   :  { %v623_v16 = vpop.f32.mrf.mxu1  ;;  %5382 = vmatmul.mubr.msk.bf16.gmra.mxu1 %vm229_vm0, %v1155_v10  ;;  %1025 = vmatprep.mubr.bf16.mxu0 %v8894_v0 }
 0x122   :  { %v6933_v19 = vadd.f32 %v623_v16, %v362_v15  ;;  %1403 = vmatprep.mubr.bf16.mxu1 %v8894_v0  ;;  %v364_v24 = vpop.f32.mrf.mxu0 }
 0x123   :  { %v625_v25 = vpop.f32.mrf.mxu1 }
 0x124   :  { %v6946_v26 = vadd.f32 %v625_v25, %v364_v24  ;;  %v366_v28 = vpop.f32.mrf.mxu0 }
 0x125   :  { %v627_v29 = vpop.f32.mrf.mxu1 }
 0x126   :  { %v6948_v33 = vadd.f32 %v627_v29, %v366_v28  ;;  %v6950_v34 = vpop.f32.mrf.mxu0  ;;  %v1490_v29 = vld [vmem:[%s8906_s30 + $0x14] sm:$0xff] }
 0x127   :  { %8909 = vst [vmem:[#allocation12_spill] sm:$0xff] %v6950_v34  ;;  %v6952_v36 = vpop.f32.mrf.mxu1 }
 0x128   :  { %8910 = vst [vmem:[#allocation13_spill] sm:$0xff] %v6952_v36  ;;  %v372_v37 = vpop.f32.mrf.mxu0  ;;  %5359 = vmatmul.mubr.msk.bf16.gmra.mxu0 %vm229_vm0, %v778_v30  ;;  %v1491_v30 = vld [vmem:[%s8906_s30 + $0x1c] sm:$0xff] }
 0x129   :  { %v633_v38 = vpop.f32.mrf.mxu1  ;;  %5383 = vmatmul.mubr.msk.bf16.gmra.mxu1 %vm229_vm0, %v1156_v31  ;;  %1035 = vmatprep.mubr.bf16.mxu0 %v8894_v0  ;;  %v1521_v43 = vpack.c.bf16 %v1491_v30, %v1490_v29 }
 0x12a   :  { %v6959_v41 = vadd.f32 %v633_v38, %v372_v37  ;;  %1413 = vmatprep.mubr.bf16.mxu1 %v8894_v0  ;;  %v374_v46 = vpop.f32.mrf.mxu0 }
 0x12b   :  { %v635_v47 = vpop.f32.mrf.mxu1 }
 0x12c   :  { %v6972_v49 = vadd.f32 %v635_v47, %v374_v46  ;;  %v376_v50 = vpop.f32.mrf.mxu0 }
 0x12d   :  { %v637_v52 = vpop.f32.mrf.mxu1 }
 0x12e   :  { %v6974_v57 = vadd.f32 %v637_v52, %v376_v50  ;;  %v6976_v58 = vpop.f32.mrf.mxu0 }
 0x12f   :  { %8911 = vst [vmem:[#allocation14_spill] sm:$0xff] %v6976_v58  ;;  %v6978_v61 = vpop.f32.mrf.mxu1 }
 0x130   :  { %8912 = vst [vmem:[#allocation15_spill] sm:$0xff] %v6978_v61  ;;  %v382_v63 = vpop.f32.mrf.mxu0  ;;  %5360 = vmatmul.mubr.msk.bf16.gmra.mxu0 %vm229_vm0, %v779_v53 }
 0x131   :  { %v643_v1 = vpop.f32.mrf.mxu1  ;;  %5384 = vmatmul.mubr.msk.bf16.gmra.mxu1 %vm229_vm0, %v1157_v56  ;;  %1641 = vmatprep.mubr.bf16.mxu0 %v8894_v0  ;;  %v1492_v56 = vld [vmem:[%s8906_s30 + $0x24] sm:$0xff] }
 0x132   :  { %v6982_v2 = vadd.f32 %v643_v1, %v382_v63  ;;  %v384_v7 = vpop.f32.mrf.mxu0  ;;  %v1493_v63 = vld [vmem:[%s8906_s30 + $0x2c] sm:$0xff] }
 0x133   :  { %v645_v8 = vpop.f32.mrf.mxu1 }
 0x134   :  { %v6991_v10 = vadd.f32 %v645_v8, %v384_v7  ;;  %v386_v15 = vpop.f32.mrf.mxu0 }
 0x135   :  { %v647_v16 = vpop.f32.mrf.mxu1 }
 0x136   :  { %v6993_v20 = vadd.f32 %v647_v16, %v386_v15  ;;  %v6995_v22 = vpop.f32.mrf.mxu0  ;;  %v1522_v15 = vpack.c.bf16 %v1493_v63, %v1492_v56 }
 0x137   :  { %8913 = vst [vmem:[#allocation16_spill] sm:$0xff] %v6995_v22  ;;  %v6997_v23 = vpop.f32.mrf.mxu1 }
 0x138   :  { %8914 = vst [vmem:[#allocation17_spill] sm:$0xff] %v6997_v23  ;;  %v392_v24 = vpop.f32.mrf.mxu0  ;;  %5393 = vmatmul.mubr.msk.bf16.vlgmr.msra.gmra.mxu0 %vm229_vm0, %v1520_v18 }
 0x139   :  { %v653_v25 = vpop.f32.mrf.mxu1  ;;  %1651 = vmatprep.mubr.bf16.mxu0 %v8894_v0 }
 0x13a   :  { %v7000_v28 = vadd.f32 %v653_v25, %v392_v24  ;;  %v394_v31 = vpop.f32.mrf.mxu0 }
 0x13b   :  { %v655_v37 = vpop.f32.mrf.mxu1 }
 0x13c   :  { %v7009_v38 = vadd.f32 %v655_v37, %v394_v31  ;;  %v396_v40 = vpop.f32.mrf.mxu0  ;;  %v1494_v31 = vld [vmem:[%s8906_s30 + $0x34] sm:$0xff]  ;;  %v1495_v37 = vld [vmem:[%s8906_s30 + $0x3c] sm:$0xff] }
 0x13d   :  { %v657_v42 = vpop.f32.mrf.mxu1  ;;  %v1523_v56 = vpack.c.bf16 %v1495_v37, %v1494_v31 }
 0x13e   :  { %v7011_v44 = vadd.f32 %v657_v42, %v396_v40  ;;  %v7013_v46 = vpop.f32.mrf.mxu0 }
 0x13f   :  { %8915 = vst [vmem:[#allocation18_spill] sm:$0xff] %v7013_v46  ;;  %v7015_v47 = vpop.f32.mrf.mxu1 }
 0x140   :  { %8916 = vst [vmem:[#allocation19_spill] sm:$0xff] %v7015_v47  ;;  %v402_v50 = vpop.f32.mrf.mxu0  ;;  %5394 = vmatmul.mubr.msk.bf16.gmra.mxu0 %vm229_vm0, %v1521_v43 }
 0x141   :  { %v663_v52 = vpop.f32.mrf.mxu1  ;;  %1661 = vmatprep.mubr.bf16.mxu0 %v8894_v0 }
 0x142   :  { %v7018_v53 = vadd.f32 %v663_v52, %v402_v50  ;;  %v404_v1 = vpop.f32.mrf.mxu0 }
 0x143   :  { %v665_v4 = vpop.f32.mrf.mxu1 }
 0x144   :  { %v7027_v6 = vadd.f32 %v665_v4, %v404_v1  ;;  %v406_v7 = vpop.f32.mrf.mxu0 }
 0x145   :  { %v667_v8 = vpop.f32.mrf.mxu1 }
 0x146   :  { %v7029_v16 = vadd.f32 %v667_v8, %v406_v7  ;;  %v7031_v18 = vpop.f32.mrf.mxu0 }
 0x147   :  { %8917 = vst [vmem:[#allocation20_spill] sm:$0xff] %v7031_v18  ;;  %v7033_v24 = vpop.f32.mrf.mxu1 }
 0x148   :  { %8918 = vst [vmem:[#allocation21_spill] sm:$0xff] %v7033_v24  ;;  %v412_v25 = vpop.f32.mrf.mxu0  ;;  %5395 = vmatmul.mubr.msk.bf16.gmra.mxu0 %vm229_vm0, %v1522_v15  ;;  %v8923_v24 = vmov 0  }
 0x149   :  { %v673_v29 = vpop.f32.mrf.mxu1  ;;  %1671 = vmatprep.mubr.bf16.mxu0 %v8894_v0 }
 0x14a   :  { %v7036_v30 = vadd.f32 %v673_v29, %v412_v25  ;;  %v414_v40 = vpop.f32.mrf.mxu0  ;;  %v1496_v25 = vld [vmem:[%s8906_s30 + $0x44] sm:$0xff]  ;;  %v1497_v29 = vld [vmem:[%s8906_s30 + $0x4c] sm:$0xff] }
 0x14b   :  { %v675_v42 = vpop.f32.mrf.mxu1 }
 0x14c   :  { %v7045_v43 = vadd.f32 %v675_v42, %v414_v40  ;;  %v416_v50 = vpop.f32.mrf.mxu0 }
 0x14d   :  { %v677_v52 = vpop.f32.mrf.mxu1 }
 0x14e   :  { %v7047_v63 = vadd.f32 %v677_v52, %v416_v50  ;;  %v7049_v1 = vpop.f32.mrf.mxu0  ;;  %v1524_v52 = vpack.c.bf16 %v1497_v29, %v1496_v25  ;;  %v1499_v25 = vld [vmem:[%s8906_s30 + $0x5c] sm:$0xff] }
 0x14f   :  { %8919 = vst [vmem:[#allocation22_spill] sm:$0xff] %v7049_v1  ;;  %v7051_v4 = vpop.f32.mrf.mxu1 }
 0x150   :  { %8920 = vst [vmem:[#allocation23_spill] sm:$0xff] %v7051_v4  ;;  %v422_v7 = vpop.f32.mrf.mxu0  ;;  %5396 = vmatmul.mubr.msk.bf16.gmra.mxu0 %vm229_vm0, %v1523_v56 }
 0x151   :  { %v683_v8 = vpop.f32.mrf.mxu1  ;;  %1681 = vmatprep.mubr.bf16.mxu0 %v8894_v0 }
 0x152   :  { %v7054_v15 = vadd.f32 %v683_v8, %v422_v7  ;;  %v424_v31 = vpop.f32.mrf.mxu0 }
 0x153   :  { %v685_v37 = vpop.f32.mrf.mxu1 }
 0x154   :  { %v7063_v40 = vadd.f32 %v685_v37, %v424_v31  ;;  %v426_v42 = vpop.f32.mrf.mxu0  ;;  %v1498_v31 = vld [vmem:[%s8906_s30 + $0x54] sm:$0xff] }
 0x155   :  { %v687_v50 = vpop.f32.mrf.mxu1 }
 0x156   :  { %v7065_v56 = vadd.f32 %v687_v50, %v426_v42  ;;  %v7067_v7 = vpop.f32.mrf.mxu0 }
 0x157   :  { %8921 = vst [vmem:[#allocation24_spill] sm:$0xff] %v7067_v7  ;;  %v7069_v8 = vpop.f32.mrf.mxu1  ;;  %v1525_v7 = vpack.c.bf16 %v1499_v25, %v1498_v31 }
 0x158   :  { %8922 = vst [vmem:[#allocation25_spill] sm:$0xff] %v7069_v8  ;;  %v432_v0 = vpop.f32.mrf.mxu0  ;;  %5397 = vmatmul.mubr.msk.bf16.gmra.mxu0 %vm229_vm0, %v1524_v52 }
 0x159   :  { %v693_v4 = vpop.f32.mrf.mxu1  ;;  %1691 = vmatprep.mubr.bf16.mxu0 %v8923_v24 }
 0x15a   :  { %v7072_v1 = vadd.f32 %v693_v4, %v432_v0  ;;  %v434_v29 = vpop.f32.mrf.mxu0 }
 0x15b   :  { %v695_v37 = vpop.f32.mrf.mxu1 }
 0x15c   :  { %v7081_v42 = vadd.f32 %v695_v37, %v434_v29  ;;  %v436_v50 = vpop.f32.mrf.mxu0  ;;  %v1500_v29 = vld [vmem:[%s8906_s30 + $0x64] sm:$0xff] }
 0x15d   :  { %v697_v8 = vpop.f32.mrf.mxu1 }
 0x15e   :  { %v7083_v52 = vadd.f32 %v697_v8, %v436_v50  ;;  %v7085_v0 = vpop.f32.mrf.mxu0  ;;  %v1501_v8 = vld [vmem:[%s8906_s30 + $0x6c] sm:$0xff] }
 0x15f   :  { %8924 = vst [vmem:[#allocation26_spill] sm:$0xff] %v7085_v0  ;;  %v7087_v4 = vpop.f32.mrf.mxu1  ;;  %v1526_v0 = vpack.c.bf16 %v1501_v8, %v1500_v29 }
 0x160   :  { %8925 = vst [vmem:[#allocation27_spill] sm:$0xff] %v7087_v4  ;;  %v442_v18 = vpop.f32.mrf.mxu0  ;;  %5398 = vmatmul.mubr.msk.bf16.gmra.mxu0 %vm229_vm0, %v1525_v7 }
 0x161   :  { %v703_v47 = vpop.f32.mrf.mxu1  ;;  %1701 = vmatprep.mubr.bf16.mxu0 %v8923_v24 }
 0x162   :  { %v7090_v46 = vadd.f32 %v703_v47, %v442_v18  ;;  %v444_v31 = vpop.f32.mrf.mxu0 }
 0x163   :  { %v705_v25 = vpop.f32.mrf.mxu1 }
 0x164   :  { %v7099_v37 = vadd.f32 %v705_v25, %v444_v31  ;;  %v446_v50 = vpop.f32.mrf.mxu0  ;;  %v1502_v31 = vld [vmem:[%s8906_s30 + $0x74] sm:$0xff] }
 0x165   :  { %v707_v4 = vpop.f32.mrf.mxu1 }
 0x166   :  { %v7101_v7 = vadd.f32 %v707_v4, %v446_v50  ;;  %v7103_v47 = vpop.f32.mrf.mxu0  ;;  %v1503_v4 = vld [vmem:[%s8906_s30 + $0x7c] sm:$0xff] }
 0x167   :  { %8926 = vst [vmem:[#allocation28_spill] sm:$0xff] %v7103_v47  ;;  %v7105_v18 = vpop.f32.mrf.mxu1  ;;  %v1527_v47 = vpack.c.bf16 %v1503_v4, %v1502_v31 }
 0x168   :  { %8927 = vst [vmem:[#allocation29_spill] sm:$0xff] %v7105_v18  ;;  %v452_v23 = vpop.f32.mrf.mxu0  ;;  %5399 = vmatmul.mubr.msk.bf16.gmra.mxu0 %vm229_vm0, %v1526_v0 }
 0x169   :  { %v713_v22 = vpop.f32.mrf.mxu1  ;;  %1711 = vmatprep.mubr.bf16.mxu0 %v8923_v24 }
 0x16a   :  { %v7108_v61 = vadd.f32 %v713_v22, %v452_v23  ;;  %v454_v29 = vpop.f32.mrf.mxu0 }
 0x16b   :  { %v715_v8 = vpop.f32.mrf.mxu1 }
 0x16c   :  { %8928 = vst [vmem:[#allocation30_spill] sm:$0xff] %v7108_v61  ;;  %v7117_v25 = vadd.f32 %v715_v8, %v454_v29  ;;  %v456_v50 = vpop.f32.mrf.mxu0  ;;  %v1504_v29 = vld [vmem:[%s8906_s30 + $0x84] sm:$0xff] }
 0x16d   :  { %v717_v18 = vpop.f32.mrf.mxu1 }
 0x16e   :  { %8929 = vst [vmem:[#allocation31_spill] sm:$0xff] %v7117_v25  ;;  %v7119_v0 = vadd.f32 %v717_v18, %v456_v50  ;;  %v7121_v22 = vpop.f32.mrf.mxu0  ;;  %v1505_v18 = vld [vmem:[%s8906_s30 + $0x8c] sm:$0xff] }
 0x16f   :  { %8931 = vst [vmem:[#allocation33_spill] sm:$0xff] %v7121_v22  ;;  %v7123_v23 = vpop.f32.mrf.mxu1  ;;  %v1528_v22 = vpack.c.bf16 %v1505_v18, %v1504_v29 }
 0x170   :  { %8930 = vst [vmem:[#allocation32_spill] sm:$0xff] %v7119_v0  ;;  %8932 = vst [vmem:[#allocation34_spill] sm:$0xff] %v7123_v23  ;;  %v462_v58 = vpop.f32.mrf.mxu0  ;;  %5400 = vmatmul.mubr.msk.bf16.gmra.mxu0 %vm229_vm0, %v1527_v47 }
 0x171   :  { %v723_v36 = vpop.f32.mrf.mxu1  ;;  %1721 = vmatprep.mubr.bf16.mxu0 %v8923_v24 }
 0x172   :  { %v7126_v34 = vadd.f32 %v723_v36, %v462_v58  ;;  %v464_v31 = vpop.f32.mrf.mxu0 }
 0x173   :  { %v725_v4 = vpop.f32.mrf.mxu1 }
 0x174   :  { %8933 = vst [vmem:[#allocation35_spill] sm:$0xff] %v7126_v34  ;;  %v7135_v8 = vadd.f32 %v725_v4, %v464_v31  ;;  %v466_v50 = vpop.f32.mrf.mxu0  ;;  %v1506_v31 = vld [vmem:[%s8906_s30 + $0x94] sm:$0xff] }
 0x175   :  { %v727_v23 = vpop.f32.mrf.mxu1 }
 0x176   :  { %8934 = vst [vmem:[#allocation36_spill] sm:$0xff] %v7135_v8  ;;  %v7137_v47 = vadd.f32 %v727_v23, %v466_v50  ;;  %v7139_v36 = vpop.f32.mrf.mxu0  ;;  %v1507_v23 = vld [vmem:[%s8906_s30 + $0x9c] sm:$0xff] }
 0x177   :  { %8936 = vst [vmem:[#allocation38_spill] sm:$0xff] %v7139_v36  ;;  %v7141_v58 = vpop.f32.mrf.mxu1  ;;  %v1529_v36 = vpack.c.bf16 %v1507_v23, %v1506_v31 }
 0x178   :  { %8935 = vst [vmem:[#allocation37_spill] sm:$0xff] %v7137_v47  ;;  %8937 = vst [vmem:[#allocation39_spill] sm:$0xff] %v7141_v58  ;;  %v887_v13 = vpop.f32.mrf.mxu0  ;;  %5401 = vmatmul.mubr.msk.bf16.gmra.mxu0 %vm229_vm0, %v1528_v22 }
 0x179   :  { %v1265_v12 = vpop.f32.mrf.mxu1  ;;  %v1046_v34 = vadd.f32 %v887_v13, %v6811_v48  ;;  %1731 = vmatprep.mubr.bf16.mxu0 %v8923_v24 }
 0x17a   :  { %v889_v29 = vpop.f32.mrf.mxu0 }
 0x17b   :  { %v1267_v18 = vpop.f32.mrf.mxu1  ;;  %v1047_v4 = vadd.f32 %v889_v29, %v6824_v54  ;;  %v7153_v50 = vadd.f32 %v1265_v12, %v1046_v34  ;;  %v1509_v34 = vld [vmem:[%s8906_s30 + $0xac] sm:$0xff] }
 0x17c   :  { %v891_v22 = vpop.f32.mrf.mxu0 }
 0x17d   :  { %v1269_v58 = vpop.f32.mrf.mxu1  ;;  %v1048_v48 = vadd.f32 %v891_v22, %v6826_v59  ;;  %v7156_v13 = vadd.f32 %v1267_v18, %v1047_v4  ;;  %v1508_v59 = vld [vmem:[%s8906_s30 + $0xa4] sm:$0xff] }
 0x17e   :  { %v893_v47 = vpop.f32.mrf.mxu0  ;;  %v1530_v29 = vpack.c.bf16 %v1509_v34, %v1508_v59 }
 0x17f   :  { %v7158_v8 = vpop.f32.mrf.mxu1  ;;  %v7161_v0 = vadd.f32 %v893_v47, %v6828_v62  ;;  %v7163_v25 = vadd.f32 %v1269_v58, %v1048_v48 }
 0x180   :  { %v897_v61 = vpop.f32.mrf.mxu0  ;;  %5402 = vmatmul.mubr.msk.bf16.gmra.mxu0 %vm229_vm0, %v1529_v36 }
 0x181   :  { %8938 = vst [vmem:[#allocation40_spill] sm:$0xff] %v7163_v25  ;;  %v1275_v54 = vpop.f32.mrf.mxu1  ;;  %v1050_v12 = vadd.f32 %v897_v61, %v6835_v3  ;;  %1741 = vmatprep.mubr.bf16.mxu0 %v8923_v24 }
 0x182   :  { %v899_v62 = vpop.f32.mrf.mxu0 }
 0x183   :  { %v1277_v47 = vpop.f32.mrf.mxu1  ;;  %v1051_v58 = vadd.f32 %v899_v62, %v6848_v9  ;;  %v7175_v31 = vadd.f32 %v1275_v54, %v1050_v12  ;;  %v1511_v12 = vld [vmem:[%s8906_s30 + $0xbc] sm:$0xff] }
 0x184   :  { %v901_v36 = vpop.f32.mrf.mxu0 }
 0x185   :  { %v1279_v23 = vpop.f32.mrf.mxu1  ;;  %v1052_v3 = vadd.f32 %v901_v36, %v6850_v14  ;;  %v7178_v61 = vadd.f32 %v1277_v47, %v1051_v58  ;;  %v1510_v14 = vld [vmem:[%s8906_s30 + $0xb4] sm:$0xff] }
 0x186   :  { %v903_v18 = vpop.f32.mrf.mxu0 }
 0x187   :  { %v7180_v4 = vpop.f32.mrf.mxu1  ;;  %v7183_v22 = vadd.f32 %v903_v18, %v6852_v17  ;;  %v7185_v48 = vadd.f32 %v1279_v23, %v1052_v3 }
 0x188   :  { %v907_v25 = vpop.f32.mrf.mxu0  ;;  %5403 = vmatmul.mubr.msk.bf16.gmra.mxu0 %vm229_vm0, %v1530_v29 }
 0x189   :  { %v1285_v9 = vpop.f32.mrf.mxu1  ;;  %v1054_v54 = vadd.f32 %v907_v25, %v6859_v21  ;;  %1751 = vmatprep.mubr.bf16.mxu0 %v8923_v24  ;;  %v1531_v25 = vpack.c.bf16 %v1511_v12, %v1510_v14 }
 0x18a   :  { %v909_v17 = vpop.f32.mrf.mxu0 }
 0x18b   :  { %v7196_v59 = vpop.f32.mrf.mxu1  ;;  %v7199_v34 = vadd.f32 %v909_v17, %v6872_v27  ;;  %v7201_v62 = vadd.f32 %v1285_v9, %v1054_v54  ;;  %v1513_v9 = vld [vmem:[%s8906_s30 + $0xcc] sm:$0xff] }
 0x18c   :  { %v911_v47 = vpop.f32.mrf.mxu0 }
 0x18d   :  { %v7203_v21 = vpop.f32.mrf.mxu1  ;;  %v7206_v58 = vadd.f32 %v911_v47, %v6874_v32  ;;  %v1512_v32 = vld [vmem:[%s8906_s30 + $0xc4] sm:$0xff] }
 0x18e   :  { %v913_v36 = vpop.f32.mrf.mxu0 }
 0x18f   :  { %v7208_v23 = vpop.f32.mrf.mxu1  ;;  %v7211_v29 = vadd.f32 %v913_v36, %v6876_v35 }
 0x190   :  { %v917_v3 = vpop.f32.mrf.mxu0  ;;  %5404 = vmatmul.mubr.msk.bf16.gmra.mxu0 %vm229_vm0, %v1531_v25 }
 0x191   :  { %v7214_v27 = vpop.f32.mrf.mxu1  ;;  %v7217_v18 = vadd.f32 %v917_v3, %v6883_v39  ;;  %1761 = vmatprep.mubr.bf16.mxu0 %v8923_v24  ;;  %v1532_v39 = vpack.c.bf16 %v1513_v9, %v1512_v32  ;;  %v1515_v32 = vld [vmem:[%s8906_s30 + $0xdc] sm:$0xff] }
 0x192   :  { %8939 = vst [vmem:[#allocation41_spill] sm:$0xff] %v7214_v27  ;;  %v919_v35 = vpop.f32.mrf.mxu0 }
 0x193   :  { %v7226_v54 = vpop.f32.mrf.mxu1  ;;  %v7229_v14 = vadd.f32 %v919_v35, %v6896_v45 }
 0x194   :  { %8940 = vst [vmem:[#allocation42_spill] sm:$0xff] %v7226_v54  ;;  %v921_v12 = vpop.f32.mrf.mxu0 }
 0x195   :  { %v7231_v17 = vpop.f32.mrf.mxu1  ;;  %v7234_v47 = vadd.f32 %v921_v12, %v6898_v51  ;;  %v1514_v51 = vld [vmem:[%s8906_s30 + $0xd4] sm:$0xff] }
 0x196   :  { %v923_v25 = vpop.f32.mrf.mxu0 }
 0x197   :  { %v7236_v36 = vpop.f32.mrf.mxu1  ;;  %v7239_v3 = vadd.f32 %v923_v25, %v6900_v55 }
 0x198   :  { %8941 = vst [vmem:[#allocation43_spill] sm:$0xff] %v7236_v36  ;;  %v927_v27 = vpop.f32.mrf.mxu0  ;;  %5405 = vmatmul.mubr.msk.bf16.gmra.mxu0 %vm229_vm0, %v1532_v39 }
 0x199   :  { %v7242_v54 = vpop.f32.mrf.mxu1  ;;  %v7245_v45 = vadd.f32 %v927_v27, %v6907_v60  ;;  %1771 = vmatprep.mubr.bf16.mxu0 %v8923_v24  ;;  %v1533_v60 = vpack.c.bf16 %v1515_v32, %v1514_v51 }
 0x19a   :  { %8942 = vst [vmem:[#allocation44_spill] sm:$0xff] %v7242_v54  ;;  %v929_v55 = vpop.f32.mrf.mxu0 }
 0x19b   :  { %8943 = vst [vmem:[#allocation45_spill] sm:$0xff] %v7245_v45  ;;  %v7254_v9 = vpop.f32.mrf.mxu1  ;;  %v7257_v35 = vadd.f32 %v929_v55, %v6920_v5  ;;  %v1516_v5 = vld [vmem:[%s8906_s30 + $0xe4] sm:$0xff] }
 0x19c   :  { %8944 = vst [vmem:[#allocation46_spill] sm:$0xff] %v7254_v9  ;;  %v931_v12 = vpop.f32.mrf.mxu0 }
 0x19d   :  { %v7259_v39 = vpop.f32.mrf.mxu1  ;;  %v7262_v27 = vadd.f32 %v931_v12, %v6922_v11  ;;  %v1517_v11 = vld [vmem:[%s8906_s30 + $0xec] sm:$0xff] }
 0x19e   :  { %8945 = vst [vmem:[#allocation47_spill] sm:$0xff] %v7259_v39  ;;  %v7264_v25 = vpop.f32.mrf.mxu0 }
 0x19f   :  { %v7266_v54 = vpop.f32.mrf.mxu1 }
 0x1a0   :  { %8946 = vst [vmem:[#allocation48_spill] sm:$0xff] %v7266_v54  ;;  %v937_v45 = vpop.f32.mrf.mxu0  ;;  %5406 = vmatmul.mubr.msk.bf16.gmra.mxu0 %vm229_vm0, %v1533_v60 }
 0x1a1   :  { %v7269_v36 = vpop.f32.mrf.mxu1  ;;  %v7272_v9 = vadd.f32 %v937_v45, %v6933_v19  ;;  %1781 = vmatprep.mubr.bf16.mxu0 %v8923_v24  ;;  %v1534_v19 = vpack.c.bf16 %v1517_v11, %v1516_v5 }
 0x1a2   :  { %8947 = vst [vmem:[#allocation49_spill] sm:$0xff] %v7269_v36  ;;  %v939_v51 = vpop.f32.mrf.mxu0 }
 0x1a3   :  { %8948 = vst [vmem:[#allocation50_spill] sm:$0xff] %v7272_v9  ;;  %v7281_v32 = vpop.f32.mrf.mxu1  ;;  %v7284_v55 = vadd.f32 %v939_v51, %v6946_v26  ;;  %v1518_v26 = vld [vmem:[%s8906_s30 + $0xf4] sm:$0xff] }
 0x1a4   :  { %8949 = vst [vmem:[#allocation51_spill] sm:$0xff] %v7281_v32  ;;  %v941_v12 = vpop.f32.mrf.mxu0 }
 0x1a5   :  { %v7286_v60 = vpop.f32.mrf.mxu1  ;;  %v7289_v45 = vadd.f32 %v941_v12, %v6948_v33  ;;  %v1519_v33 = vld [vmem:[%s8906_s30 + $0xfc] sm:$0xf] }
 0x1a6   :  { %v7291_v36 = vpop.f32.mrf.mxu0 }
 0x1a7   :  { %v7293_v9 = vpop.f32.mrf.mxu1 }
 0x1a8   :  { %8950 = vst [vmem:[#allocation52_spill] sm:$0xff] %v7293_v9  ;;  %v947_v54 = vpop.f32.mrf.mxu0  ;;  %5407 = vmatmul.mubr.msk.bf16.gmra.mxu0 %vm229_vm0, %v1534_v19 }
 0x1a9   :  { %v7296_v39 = vpop.f32.mrf.mxu1  ;;  %v7299_v32 = vadd.f32 %v947_v54, %v6959_v41  ;;  %1791 = vmatprep.mubr.bf16.mxu0 %v8923_v24  ;;  %v1535_v41 = vpack.c.bf16 %v1519_v33, %v1518_v26 }
 0x1aa   :  { %8951 = vst [vmem:[#allocation53_spill] sm:$0xff] %v7296_v39  ;;  %v949_v5 = vpop.f32.mrf.mxu0 }
 0x1ab   :  { %8952 = vst [vmem:[#allocation54_spill] sm:$0xff] %v7299_v32  ;;  %v7308_v11 = vpop.f32.mrf.mxu1  ;;  %v7311_v51 = vadd.f32 %v949_v5, %v6972_v49 }
 0x1ac   :  { %8953 = vst [vmem:[#allocation55_spill] sm:$0xff] %v7308_v11  ;;  %v951_v12 = vpop.f32.mrf.mxu0 }
 0x1ad   :  { %v7313_v19 = vpop.f32.mrf.mxu1  ;;  %v7316_v54 = vadd.f32 %v951_v12, %v6974_v57 }
 0x1ae   :  { %8954 = vst [vmem:[#allocation56_spill] sm:$0xff] %v7313_v19  ;;  %v7318_v24 = vpop.f32.mrf.mxu0 }
 0x1af   :  { %8955 = vst [vmem:[#allocation57_spill] sm:$0xff] %v7316_v54  ;;  %v7320_v39 = vpop.f32.mrf.mxu1 }
 0x1b0   :  { %8956 = vst [vmem:[#allocation58_spill] sm:$0xff] %v7320_v39  ;;  %v957_v32 = vpop.f32.mrf.mxu0  ;;  %5408 = vmatmul.mubr.msk.bf16.gmra.mxu0 %vm229_vm0, %v1535_v41 }
 0x1b1   :  { %v7323_v9 = vpop.f32.mrf.mxu1  ;;  %v7326_v11 = vadd.f32 %v957_v32, %v6982_v2 }
 0x1b2   :  { %8957 = vst [vmem:[#allocation59_spill] sm:$0xff] %v7323_v9  ;;  %v959_v49 = vpop.f32.mrf.mxu0 }
 0x1b3   :  { %8958 = vst [vmem:[#allocation60_spill] sm:$0xff] %v7326_v11  ;;  %v7328_v5 = vpop.f32.mrf.mxu1  ;;  %v7331_v26 = vadd.f32 %v959_v49, %v6991_v10 }
 0x1b4   :  { %8959 = vst [vmem:[#allocation61_spill] sm:$0xff] %v7328_v5  ;;  %v961_v57 = vpop.f32.mrf.mxu0 }
 0x1b5   :  { %8960 = vst [vmem:[#allocation62_spill] sm:$0xff] %v7331_v26  ;;  %v7333_v33 = vpop.f32.mrf.mxu1  ;;  %v7336_v12 = vadd.f32 %v961_v57, %v6993_v20 }
 0x1b6   :  { %8961 = vst [vmem:[#allocation63_spill] sm:$0xff] %v7333_v33  ;;  %v7338_v39 = vpop.f32.mrf.mxu0 }
 0x1b7   :  { %8962 = vst [vmem:[#allocation64_spill] sm:$0xff] %v7336_v12  ;;  %8963 = vst [vmem:[#allocation65_spill] sm:$0xff] %v7338_v39  ;;  %v7340_v41 = vpop.f32.mrf.mxu1 }
 0x1b8   :  { %8964 = vst [vmem:[#allocation66_spill] sm:$0xff] %v7340_v41  ;;  %v967_v9 = vpop.f32.mrf.mxu0 }
 0x1b9   :  { %v1345_v19 = vpop.f32.mrf.mxu1  ;;  %v1078_v2 = vadd.f32 %v967_v9, %v7000_v28 }
 0x1ba   :  { %v969_v32 = vpop.f32.mrf.mxu0 }
 0x1bb   :  { %v1347_v11 = vpop.f32.mrf.mxu1  ;;  %v1079_v5 = vadd.f32 %v969_v32, %v7009_v38  ;;  %v7344_v10 = vadd.f32 %v1345_v19, %v1078_v2 }
 0x1bc   :  { %v971_v49 = vpop.f32.mrf.mxu0 }
 0x1bd   :  { %v1349_v26 = vpop.f32.mrf.mxu1  ;;  %v1080_v33 = vadd.f32 %v971_v49, %v7011_v44  ;;  %v7347_v20 = vadd.f32 %v1347_v11, %v1079_v5 }
 0x1be   :  { %v7349_v57 = vpop.f32.mrf.mxu0 }
 0x1bf   :  { %v7351_v12 = vpop.f32.mrf.mxu1  ;;  %v7353_v41 = vadd.f32 %v1349_v26, %v1080_v33 }
 0x1c0   :  { %8965 = vst [vmem:[#allocation67_spill] sm:$0xff] %v7351_v12  ;;  %v977_v39 = vpop.f32.mrf.mxu0 }
 0x1c1   :  { %8966 = vst [vmem:[#allocation68_spill] sm:$0xff] %v7353_v41  ;;  %v1355_v28 = vpop.f32.mrf.mxu1  ;;  %v1082_v9 = vadd.f32 %v977_v39, %v7018_v53 }
 0x1c2   :  { %v979_v54 = vpop.f32.mrf.mxu0 }
 0x1c3   :  { %v1357_v38 = vpop.f32.mrf.mxu1  ;;  %v1083_v19 = vadd.f32 %v979_v54, %v7027_v6  ;;  %v7357_v2 = vadd.f32 %v1355_v28, %v1082_v9 }
 0x1c4   :  { %v981_v32 = vpop.f32.mrf.mxu0 }
 0x1c5   :  { %v1359_v44 = vpop.f32.mrf.mxu1  ;;  %v1084_v11 = vadd.f32 %v981_v32, %v7029_v16  ;;  %v7360_v5 = vadd.f32 %v1357_v38, %v1083_v19 }
 0x1c6   :  { %v7362_v49 = vpop.f32.mrf.mxu0 }
 0x1c7   :  { %v7364_v26 = vpop.f32.mrf.mxu1  ;;  %v7366_v33 = vadd.f32 %v1359_v44, %v1084_v11 }
 0x1c8   :  { %v987_v41 = vpop.f32.mrf.mxu0 }
 0x1c9   :  { %v1365_v53 = vpop.f32.mrf.mxu1  ;;  %v1086_v39 = vadd.f32 %v987_v41, %v7036_v30 }
 0x1ca   :  { %v989_v12 = vpop.f32.mrf.mxu0 }
 0x1cb   :  { %v7370_v6 = vadd.f32 %v989_v12, %v7045_v43  ;;  %v7372_v54 = vadd.f32 %v1365_v53, %v1086_v39 }
 0x1cc   :  { %v991_v28 = vpop.f32.mrf.mxu0 }
 0x1cd   :  { %v7375_v16 = vadd.f32 %v991_v28, %v7047_v63 }
 0x1ce   :  { %v7377_v9 = vpop.f32.mrf.mxu0 }
 0x1d0   :  { %v997_v38 = vpop.f32.mrf.mxu0 }
 0x1d1   :  { %v7380_v19 = vadd.f32 %v997_v38, %v7054_v15 }
 0x1d2   :  { %v999_v32 = vpop.f32.mrf.mxu0 }
 0x1d3   :  { %v7383_v44 = vadd.f32 %v999_v32, %v7063_v40 }
 0x1d4   :  { %v1001_v30 = vpop.f32.mrf.mxu0 }
 0x1d5   :  { %v7386_v43 = vadd.f32 %v1001_v30, %v7065_v56 }
 0x1d6   :  { %v7388_v12 = vpop.f32.mrf.mxu0 }
 0x1d8   :  { %v1007_v41 = vpop.f32.mrf.mxu0 }
 0x1d9   :  { %v7391_v63 = vadd.f32 %v1007_v41, %v7072_v1 }
 0x1da   :  { %v1009_v11 = vpop.f32.mrf.mxu0 }
 0x1db   :  { %8967 = vst [vmem:[#allocation69_spill] sm:$0xff] %v7391_v63  ;;  %v7394_v53 = vadd.f32 %v1009_v11, %v7081_v42  ;;  %v8975_v11 = vld [vmem:[#allocation30_spill] sm:$0xff] }
 0x1dc   :  { %v1011_v15 = vpop.f32.mrf.mxu0 }
 0x1dd   :  { %8968 = vst [vmem:[#allocation70_spill] sm:$0xff] %v7394_v53  ;;  %v7397_v39 = vadd.f32 %v1011_v15, %v7083_v52 }
 0x1de   :  { %v7399_v40 = vpop.f32.mrf.mxu0 }
 0x1df   :  { %8969 = vst [vmem:[#allocation71_spill] sm:$0xff] %v7397_v39  ;;  %8970 = vst [vmem:[#allocation72_spill] sm:$0xff] %v7399_v40  ;;  %v8977_v39 = vld [vmem:[#allocation31_spill] sm:$0xff] }
 0x1e0   :  { %v1017_v28 = vpop.f32.mrf.mxu0 }
 0x1e1   :  { %v7402_v56 = vadd.f32 %v1017_v28, %v7090_v46  ;;  %v8979_v28 = vld [vmem:[#allocation32_spill] sm:$0xff] }
 0x1e2   :  { %v1019_v38 = vpop.f32.mrf.mxu0 }
 0x1e3   :  { %8971 = vst [vmem:[#allocation73_spill] sm:$0xff] %v7402_v56  ;;  %v7405_v32 = vadd.f32 %v1019_v38, %v7099_v37  ;;  %v1868_v37 = vlaneseq }
 0x1e4   :  { %v1021_v1 = vpop.f32.mrf.mxu0 }
 0x1e5   :  { %8972 = vst [vmem:[#allocation74_spill] sm:$0xff] %v7405_v32  ;;  %v7408_v30 = vadd.f32 %v1021_v1, %v7101_v7  ;;  %v8982_v7 = vld [vmem:[#allocation35_spill] sm:$0xff] }
 0x1e6   :  { %v7410_v42 = vpop.f32.mrf.mxu0 }
 0x1e7   :  { %8973 = vst [vmem:[#allocation75_spill] sm:$0xff] %v7408_v30  ;;  %8974 = vst [vmem:[#allocation76_spill] sm:$0xff] %v7410_v42  ;;  %v7426_v30 = vshrl.u32 %v1868_v37, 7 }
 0x1e8   :  { %v1027_v41 = vpop.f32.mrf.mxu0 }
 0x1e9   :  { %v7413_v52 = vadd.f32 %v1027_v41, %v8975_v11  ;;  %8984 = vst [vmem:[#allocation78_spill] sm:$0xff] %v7426_v30  ;;  %v8985_v41 = vld [vmem:[#allocation36_spill] sm:$0xff] }
 0x1ea   :  { %v1029_v15 = vpop.f32.mrf.mxu0 }
 0x1eb   :  { %8976 = vst [vmem:[#allocation30_spill] sm:$0xff] %v7413_v52  ;;  %v7416_v40 = vadd.f32 %v1029_v15, %v8977_v39  ;;  %v8987_v39 = vld [vmem:[#allocation37_spill] sm:$0xff] }
 0x1ec   :  { %v1031_v46 = vpop.f32.mrf.mxu0 }
 0x1ed   :  { %8978 = vst [vmem:[#allocation31_spill] sm:$0xff] %v7416_v40  ;;  %v7419_v56 = vadd.f32 %v1031_v46, %v8979_v28  ;;  %v8897_v46 = vsub.s32 0, %v7426_v30 }
 0x1ee   :  { %v7421_v38 = vpop.f32.mrf.mxu0 }
 0x1ef   :  { %8980 = vst [vmem:[#allocation32_spill] sm:$0xff] %v7419_v56  ;;  %8981 = vst [vmem:[#allocation77_spill] sm:$0xff] %v7421_v38  ;;  %v1866_v56 = vld [vmem:[%s8990_s29] sm:$0x3] }
 0x1f0   :  { %v1037_v32 = vpop.f32.mrf.mxu0 }
 0x1f1   :  { %v7424_v1 = vadd.f32 %v1037_v32, %v8982_v7  ;;  %v8898_v32 = vsub.s32 1, %v7426_v30 }
 0x1f2   :  { %v1039_v42 = vpop.f32.mrf.mxu0 }
 0x1f3   :  { %8983 = vst [vmem:[#allocation35_spill] sm:$0xff] %v7424_v1  ;;  %v7429_v11 = vadd.f32 %v1039_v42, %v8985_v41  ;;  %v7444_v42 = vrot.slane %v1866_v56, %v8897_v46  ;;  %v8991_v1 = vld [vmem:[#allocation40_spill] sm:$0xff] }
 0x1f4   :  { %v1041_v52 = vpop.f32.mrf.mxu0 }
 0x1f5   :  { %8986 = vst [vmem:[#allocation36_spill] sm:$0xff] %v7429_v11  ;;  %v7432_v15 = vadd.f32 %v1041_v52, %v8987_v39  ;;  %v7449_v39 = vrot.slane %v1866_v56, %v8898_v32 }
 0x1f6   :  { %v7435_v28 = vpop.f32.mrf.mxu0 }
 0x1f7   :  { %8988 = vst [vmem:[#allocation37_spill] sm:$0xff] %v7432_v15  ;;  %8989 = vst [vmem:[#allocation79_spill] sm:$0xff] %v7435_v28  ;;  %v1427_v28 = vadd.f32 %v7158_v8, %v7161_v0 }
 0x1f8   :  { %v1643_v37 = vpop.f32.mrf.mxu0 }
 0x1f9   :  { %v1802_v7 = vadd.f32 %v1643_v37, %v7153_v50 }
 0x1fa   :  { %v1645_v41 = vpop.f32.mrf.mxu0 }
 0x1fb   :  { %v1803_v52 = vadd.f32 %v1645_v41, %v7156_v13  ;;  %v1878_v11 = vadd.f32 %v7444_v42, %v1802_v7  ;;  %v1431_v7 = vadd.f32 %v7180_v4, %v7183_v22 }
 0x1fc   :  { %v1647_v15 = vpop.f32.mrf.mxu0 }
 0x1fd   :  { %v1804_v38 = vadd.f32 %v1647_v15, %v8991_v1  ;;  %v1879_v37 = vadd.f32 %v7449_v39, %v1803_v52  ;;  %v1942_v13 = vmax.f32 %v1878_v11, 0.0  ;;  %v1433_v52 = vadd.f32 %v7196_v59, %v7199_v34 }
 0x1fe   :  { %v1649_v50 = vpop.f32.mrf.mxu0  ;;  %v1435_v59 = vadd.f32 %v7208_v23, %v7211_v29 }
 0x1ff   :  { %v1880_v46 = vadd.f32 %v7444_v42, %v1804_v38  ;;  %v1805_v40 = vadd.f32 %v1649_v50, %v1427_v28  ;;  %v1943_v63 = vmax.f32 %v1879_v37, 0.0 }
 0x200   :  { %v1653_v53 = vpop.f32.mrf.mxu0 }
 0x201   :  { %v1944_v41 = vmax.f32 %v1880_v46, 0.0  ;;  %v1881_v56 = vadd.f32 %v7449_v39, %v1805_v40  ;;  %v1806_v32 = vadd.f32 %v1653_v53, %v7175_v31 }
 0x202   :  { %v1655_v30 = vpop.f32.mrf.mxu0 }
 0x203   :  { %v7459_v0 = vpack.c.bf16 %v1944_v41, %v1942_v13  ;;  %v1945_v8 = vmax.f32 %v1881_v56, 0.0  ;;  %v1807_v1 = vadd.f32 %v1655_v30, %v7178_v61  ;;  %v1882_v38 = vadd.f32 %v7444_v42, %v1806_v32 }
 0x204   :  { %v1657_v15 = vpop.f32.mrf.mxu0 }
 0x205   :  { %v1808_v11 = vadd.f32 %v1657_v15, %v7185_v48  ;;  %v7466_v46 = vpack.c.bf16 %v1945_v8, %v1943_v63  ;;  %v1883_v31 = vadd.f32 %v7449_v39, %v1807_v1  ;;  %v1946_v30 = vmax.f32 %v1882_v38, 0.0 }
 0x206   :  { %v1659_v40 = vpop.f32.mrf.mxu0  ;;  %v1434_v48 = vadd.f32 %v7203_v21, %v7206_v58 }
 0x207   :  { %v1884_v53 = vadd.f32 %v7444_v42, %v1808_v11  ;;  %v1809_v28 = vadd.f32 %v1659_v40, %v1431_v7  ;;  %v1947_v32 = vmax.f32 %v1883_v31, 0.0  ;;  %v8993_v11 = vld [vmem:[#allocation42_spill] sm:$0xff] }
 0x208   :  { %v1663_v61 = vpop.f32.mrf.mxu0  ;;  %v1437_v40 = vadd.f32 %v8993_v11, %v7229_v14 }
 0x209   :  { %v1948_v50 = vmax.f32 %v1884_v53, 0.0  ;;  %v1885_v4 = vadd.f32 %v7449_v39, %v1809_v28  ;;  %v1810_v22 = vadd.f32 %v1663_v61, %v7201_v62  ;;  %v8992_v62 = vld [vmem:[#allocation41_spill] sm:$0xff] }
 0x20a   :  { %v1665_v63 = vpop.f32.mrf.mxu0  ;;  %v1436_v7 = vadd.f32 %v8992_v62, %v7217_v18 }
 0x20b   :  { %v7476_v37 = vpack.c.bf16 %v1948_v50, %v1946_v30  ;;  %v1949_v13 = vmax.f32 %v1885_v4, 0.0  ;;  %v1811_v41 = vadd.f32 %v1665_v63, %v1433_v52  ;;  %v1886_v34 = vadd.f32 %v7444_v42, %v1810_v22 }
 0x20c   :  { %v1667_v56 = vpop.f32.mrf.mxu0  ;;  %v1438_v52 = vadd.f32 %v7231_v17, %v7234_v47  ;;  %v8997_v17 = vld [vmem:[#allocation45_spill] sm:$0xff]  ;;  %v8998_v47 = vld [vmem:[#allocation44_spill] sm:$0xff] }
 0x20d   :  { %v1812_v8 = vadd.f32 %v1667_v56, %v1434_v48  ;;  %v7481_v1 = vpack.c.bf16 %v1949_v13, %v1947_v32  ;;  %v1887_v21 = vadd.f32 %v7449_v39, %v1811_v41  ;;  %v1950_v53 = vmax.f32 %v1886_v34, 0.0  ;;  %v8994_v48 = vld [vmem:[#allocation43_spill] sm:$0xff]  ;;  %v8995_v41 = vld [vmem:[#allocation10_spill] sm:$0xff] }
 0x20e   :  { %v1669_v15 = vpop.f32.mrf.mxu0  ;;  %v1439_v63 = vadd.f32 %v8994_v48, %v7239_v3  ;;  %v8996_v56 = vld [vmem:[#allocation11_spill] sm:$0xff] }
 0x20f   :  { %v1888_v58 = vadd.f32 %v7444_v42, %v1812_v8  ;;  %v1813_v38 = vadd.f32 %v1669_v15, %v1435_v59  ;;  %v1951_v30 = vmax.f32 %v1887_v21, 0.0  ;;  %v620_v59 = vadd.f32 %v8996_v56, %v8995_v41  ;;  %v8999_v21 = vld [vmem:[#allocation46_spill] sm:$0xff]  ;;  %v9004_v41 = vld [vmem:[#allocation13_spill] sm:$0xff] }
 0x210   :  { %v1673_v31 = vpop.f32.mrf.mxu0  ;;  %v1440_v8 = vadd.f32 %v8998_v47, %v8997_v17  ;;  %v1441_v3 = vadd.f32 %v8999_v21, %v7257_v35  ;;  %v9005_v17 = vld [vmem:[#allocation50_spill] sm:$0xff]  ;;  %v9006_v47 = vld [vmem:[#allocation49_spill] sm:$0xff]  ;;  %v9007_v21 = vld [vmem:[#allocation51_spill] sm:$0xff] }
 0x211   :  { %v1952_v23 = vmax.f32 %v1888_v58, 0.0  ;;  %v1889_v29 = vadd.f32 %v7449_v39, %v1813_v38  ;;  %v1814_v28 = vadd.f32 %v1673_v31, %v1436_v7  ;;  %v1065_v58 = vadd.f32 %v7264_v25, %v620_v59  ;;  %v5954_v25 = vld [vmem:[%s9001_s9 + $0x4] ss:$8 sps:$4 sm:$0xff]  }
 0x212   :  { %v1675_v61 = vpop.f32.mrf.mxu0  ;;  %5424 = vmatprep.mubr.msk.bf16.mxu1 %vm2115_vm1, %v5954_v25  ;;  %v9008_v25 = vld [vmem:[#allocation52_spill] sm:$0xff] }
 0x213   :  { %v7492_v18 = vpack.c.bf16 %v1952_v23, %v1950_v53  ;;  %v1953_v50 = vmax.f32 %v1889_v29, 0.0  ;;  %v1815_v4 = vadd.f32 %v1675_v61, %v1437_v40  ;;  %v1890_v14 = vadd.f32 %v7444_v42, %v1814_v28  ;;  %v9000_v23 = vld [vmem:[#allocation47_spill] sm:$0xff]  ;;  %v7511_v28 = vpop.f32.mrf.mxu1 }
 0x214   :  { %v1677_v22 = vpop.f32.mrf.mxu0  ;;  %v1442_v29 = vadd.f32 %v9000_v23, %v7262_v27  ;;  %v9003_v27 = vld [vmem:[#allocation12_spill] sm:$0xff]  ;;  %v1446_v23 = vadd.f32 %v7286_v60, %v7289_v45 }
 0x215   :  { %v1816_v32 = vadd.f32 %v1677_v22, %v1438_v52  ;;  %v7497_v13 = vpack.c.bf16 %v1953_v50, %v1951_v30  ;;  %v1891_v15 = vadd.f32 %v7449_v39, %v1815_v4  ;;  %v1954_v11 = vmax.f32 %v1890_v14, 0.0  ;;  %v9002_v22 = vld [vmem:[#allocation48_spill] sm:$0xff]  ;;  %v7524_v59 = vpop.f32.mrf.mxu1 }
 0x216   :  { %v1679_v34 = vpop.f32.mrf.mxu0  ;;  %v1443_v48 = vadd.f32 %v9002_v22, %v1065_v58  ;;  %v630_v56 = vadd.f32 %v9004_v41, %v9003_v27  ;;  %v9010_v27 = vld [vmem:[#allocation15_spill] sm:$0xff] }
 0x217   :  { %v1892_v62 = vadd.f32 %v7444_v42, %v1816_v32  ;;  %v1817_v7 = vadd.f32 %v1679_v34, %v1439_v63  ;;  %v1955_v61 = vmax.f32 %v1891_v15, 0.0 }
 0x218   :  { %v1683_v38 = vpop.f32.mrf.mxu0  ;;  %v1069_v58 = vadd.f32 %v7291_v36, %v630_v56  ;;  %v9011_v56 = vld [vmem:[#allocation54_spill] sm:$0xff] }
 0x219   :  { %v1956_v40 = vmax.f32 %v1892_v62, 0.0  ;;  %v1893_v31 = vadd.f32 %v7449_v39, %v1817_v7  ;;  %v1818_v53 = vadd.f32 %v1683_v38, %v1440_v8  ;;  %v1444_v8 = vadd.f32 %v9006_v47, %v9005_v17 }
 0x21a   :  { %v1685_v52 = vpop.f32.mrf.mxu0  ;;  %v1447_v36 = vadd.f32 %v9008_v25, %v1069_v58 }
 0x21b   :  { %v7513_v30 = vpack.c.bf16 %v1956_v40, %v1954_v11  ;;  %v1957_v50 = vmax.f32 %v1893_v31, 0.0  ;;  %v1819_v4 = vadd.f32 %v1685_v52, %v1441_v3  ;;  %v1894_v63 = vadd.f32 %v7444_v42, %v1818_v53 }
 0x21c   :  { %v1687_v35 = vpop.f32.mrf.mxu0  ;;  %v1445_v3 = vadd.f32 %v9007_v21, %v7284_v55 }
 0x21d   :  { %v1820_v14 = vadd.f32 %v1687_v35, %v1442_v29  ;;  %v7520_v32 = vpack.c.bf16 %v1957_v50, %v1955_v61  ;;  %v1895_v15 = vadd.f32 %v7449_v39, %v1819_v4  ;;  %v1958_v11 = vmax.f32 %v1894_v63, 0.0  ;;  %v7537_v29 = vpop.f32.mrf.mxu1 }
 0x21e   :  { %v1689_v34 = vpop.f32.mrf.mxu0 }
 0x21f   :  { %v1896_v62 = vadd.f32 %v7444_v42, %v1820_v14  ;;  %v1821_v7 = vadd.f32 %v1689_v34, %v1443_v48  ;;  %v1959_v61 = vmax.f32 %v1895_v15, 0.0  ;;  %v9009_v14 = vld [vmem:[#allocation14_spill] sm:$0xff]  ;;  %v7547_v60 = vpop.f32.mrf.mxu1  ;;  %v9012_v34 = vld [vmem:[#allocation53_spill] sm:$0xff] }
 0x220   :  { %v1693_v38 = vpop.f32.mrf.mxu0  ;;  %v640_v41 = vadd.f32 %v9010_v27, %v9009_v14  ;;  %v1448_v17 = vadd.f32 %v9012_v34, %v9011_v56  ;;  %v9017_v27 = vld [vmem:[#allocation16_spill] sm:$0xff] }
 0x221   :  { %v1960_v40 = vmax.f32 %v1896_v62, 0.0  ;;  %v1897_v31 = vadd.f32 %v7449_v39, %v1821_v7  ;;  %v1822_v53 = vadd.f32 %v1693_v38, %v1444_v8  ;;  %v9013_v62 = vld [vmem:[#allocation55_spill] sm:$0xff] }
 0x222   :  { %v1695_v52 = vpop.f32.mrf.mxu0  ;;  %v1449_v7 = vadd.f32 %v9013_v62, %v7311_v51  ;;  %v1073_v21 = vadd.f32 %v7318_v24, %v640_v41  ;;  %v9018_v41 = vld [vmem:[#allocation17_spill] sm:$0xff] }
 0x223   :  { %v7539_v50 = vpack.c.bf16 %v1960_v40, %v1958_v11  ;;  %v1961_v4 = vmax.f32 %v1897_v31, 0.0  ;;  %v1823_v35 = vadd.f32 %v1695_v52, %v1445_v3  ;;  %v1898_v22 = vadd.f32 %v7444_v42, %v1822_v53  ;;  %v9014_v31 = vld [vmem:[#allocation57_spill] sm:$0xff]  ;;  %v9015_v53 = vld [vmem:[#allocation56_spill] sm:$0xff]  ;;  %v7559_v52 = vpop.f32.mrf.mxu1 }
 0x224   :  { %v1697_v55 = vpop.f32.mrf.mxu0 }
 0x225   :  { %v1824_v48 = vadd.f32 %v1697_v55, %v1446_v23  ;;  %v7543_v63 = vpack.c.bf16 %v1961_v4, %v1959_v61  ;;  %v1899_v47 = vadd.f32 %v7449_v39, %v1823_v35  ;;  %v1962_v58 = vmax.f32 %v1898_v22, 0.0  ;;  %v7569_v56 = vpop.f32.mrf.mxu1 }
 0x226   :  { %v1699_v45 = vpop.f32.mrf.mxu0  ;;  %v1450_v23 = vadd.f32 %v9015_v53, %v9014_v31 }
 0x227   :  { %v1900_v8 = vadd.f32 %v7444_v42, %v1824_v48  ;;  %v1825_v15 = vadd.f32 %v1699_v45, %v1447_v36  ;;  %v1963_v4 = vmax.f32 %v1899_v47, 0.0  ;;  %v9016_v36 = vld [vmem:[#allocation58_spill] sm:$0xff]  ;;  %v650_v45 = vadd.f32 %v9018_v41, %v9017_v27  ;;  %v9020_v47 = vld [vmem:[#allocation59_spill] sm:$0xff] }
 0x228   :  { %v1703_v3 = vpop.f32.mrf.mxu0  ;;  %v1451_v24 = vadd.f32 %v9016_v36, %v1073_v21  ;;  %v9021_v21 = vld [vmem:[#allocation62_spill] sm:$0xff]  ;;  %v7581_v36 = vpop.f32.mrf.mxu1 }
 0x229   :  { %v1964_v38 = vmax.f32 %v1900_v8, 0.0  ;;  %v1901_v11 = vadd.f32 %v7449_v39, %v1825_v15  ;;  %v1826_v40 = vadd.f32 %v1703_v3, %v1448_v17  ;;  %v9019_v17 = vld [vmem:[#allocation60_spill] sm:$0xff]  ;;  %v9022_v3 = vld [vmem:[#allocation61_spill] sm:$0xff] }
 0x22a   :  { %v1705_v61 = vpop.f32.mrf.mxu0  ;;  %v1452_v8 = vadd.f32 %v9020_v47, %v9019_v17  ;;  %v9026_v17 = vld [vmem:[#allocation66_spill] sm:$0xff] }
 0x22b   :  { %v7561_v35 = vpack.c.bf16 %v1964_v38, %v1962_v58  ;;  %v1965_v55 = vmax.f32 %v1901_v11, 0.0  ;;  %v1827_v25 = vadd.f32 %v1705_v61, %v1449_v7  ;;  %v1902_v22 = vadd.f32 %v7444_v42, %v1826_v40  ;;  %v9023_v38 = vld [vmem:[#allocation65_spill] sm:$0xff] }
 0x22c   :  { %v1707_v51 = vpop.f32.mrf.mxu0  ;;  %v1453_v58 = vadd.f32 %v9022_v3, %v9021_v21  ;;  %v1077_v11 = vadd.f32 %v9023_v38, %v650_v45  ;;  %v7591_v3 = vpop.f32.mrf.mxu1 }
 0x22d   :  { %v1828_v48 = vadd.f32 %v1707_v51, %v1450_v23  ;;  %v7565_v14 = vpack.c.bf16 %v1965_v55, %v1963_v4  ;;  %v1903_v15 = vadd.f32 %v7449_v39, %v1827_v25  ;;  %v1966_v31 = vmax.f32 %v1902_v22, 0.0  ;;  %v9024_v4 = vld [vmem:[#allocation64_spill] sm:$0xff]  ;;  %v9025_v55 = vld [vmem:[#allocation63_spill] sm:$0xff] }
 0x22e   :  { %v1709_v34 = vpop.f32.mrf.mxu0  ;;  %v1454_v51 = vadd.f32 %v9025_v55, %v9024_v4  ;;  %v1455_v45 = vadd.f32 %v9026_v17, %v1077_v11  ;;  %v7598_v55 = vpop.f32.mrf.mxu1  ;;  %v9029_v17 = vld [vmem:[#allocation67_spill] sm:$0xff] }
 0x22f   :  { %v1904_v62 = vadd.f32 %v7444_v42, %v1828_v48  ;;  %v1829_v7 = vadd.f32 %v1709_v34, %v1451_v24  ;;  %v1967_v27 = vmax.f32 %v1903_v15, 0.0 }
 0x230   :  { %v1713_v40 = vpop.f32.mrf.mxu0 }
 0x231   :  { %v1968_v53 = vmax.f32 %v1904_v62, 0.0  ;;  %v1905_v23 = vadd.f32 %v7449_v39, %v1829_v7  ;;  %v1830_v61 = vadd.f32 %v1713_v40, %v1452_v8  ;;  %v9027_v8 = vld [vmem:[#allocation18_spill] sm:$0xff]  ;;  %v9028_v7 = vld [vmem:[#allocation19_spill] sm:$0xff] }
 0x232   :  { %v1715_v25 = vpop.f32.mrf.mxu0  ;;  %v660_v21 = vadd.f32 %v9028_v7, %v9027_v8  ;;  %v9031_v7 = vld [vmem:[#allocation20_spill] sm:$0xff] }
 0x233   :  { %v7583_v48 = vpack.c.bf16 %v1968_v53, %v1966_v31  ;;  %v1969_v24 = vmax.f32 %v1905_v23, 0.0  ;;  %v1831_v41 = vadd.f32 %v1715_v25, %v1453_v58  ;;  %v1906_v22 = vadd.f32 %v7444_v42, %v1830_v61 }
 0x234   :  { %v1717_v34 = vpop.f32.mrf.mxu0  ;;  %v1081_v58 = vadd.f32 %v7349_v57, %v660_v21 }
 0x235   :  { %v1832_v47 = vadd.f32 %v1717_v34, %v1454_v51  ;;  %v7587_v62 = vpack.c.bf16 %v1969_v24, %v1967_v27  ;;  %v1907_v15 = vadd.f32 %v7449_v39, %v1831_v41  ;;  %v1970_v11 = vmax.f32 %v1906_v22, 0.0  ;;  %v9030_v22 = vld [vmem:[#allocation68_spill] sm:$0xff] }
 0x236   :  { %v1719_v38 = vpop.f32.mrf.mxu0 }
 0x237   :  { %v1908_v40 = vadd.f32 %v7444_v42, %v1832_v47  ;;  %v1833_v31 = vadd.f32 %v1719_v38, %v1455_v45  ;;  %v1971_v25 = vmax.f32 %v1907_v15, 0.0  ;;  %v1459_v45 = vadd.f32 %v9029_v17, %v1081_v58  ;;  %v7610_v38 = vpop.f32.mrf.mxu1 }
 0x238   :  { %v1723_v53 = vpop.f32.mrf.mxu0 }
 0x239   :  { %v1972_v23 = vmax.f32 %v1908_v40, 0.0  ;;  %v1909_v61 = vadd.f32 %v7449_v39, %v1833_v31  ;;  %v1834_v4 = vadd.f32 %v1723_v53, %v7344_v10  ;;  %v9032_v10 = vld [vmem:[#allocation21_spill] sm:$0xff] }
 0x23a   :  { %v1725_v51 = vpop.f32.mrf.mxu0  ;;  %v670_v21 = vadd.f32 %v9032_v10, %v9031_v7  ;;  %v9034_v7 = vld [vmem:[#allocation23_spill] sm:$0xff] }
 0x23b   :  { %v7600_v27 = vpack.c.bf16 %v1972_v23, %v1970_v11  ;;  %v1973_v24 = vmax.f32 %v1909_v61, 0.0  ;;  %v1835_v41 = vadd.f32 %v1725_v51, %v7347_v20  ;;  %v1910_v57 = vadd.f32 %v7444_v42, %v1834_v4  ;;  %v7620_v51 = vpop.f32.mrf.mxu1 }
 0x23c   :  { %v1727_v34 = vpop.f32.mrf.mxu0  ;;  %v1085_v58 = vadd.f32 %v7362_v49, %v670_v21 }
 0x23d   :  { %v1836_v47 = vadd.f32 %v1727_v34, %v9030_v22  ;;  %v7606_v8 = vpack.c.bf16 %v1973_v24, %v1971_v25  ;;  %v1911_v40 = vadd.f32 %v7449_v39, %v1835_v41  ;;  %v1974_v11 = vmax.f32 %v1910_v57, 0.0  ;;  %v7634_v21 = vpop.f32.mrf.mxu1 }
 0x23e   :  { %v1729_v15 = vpop.f32.mrf.mxu0 }
 0x23f   :  { %v1912_v31 = vadd.f32 %v7444_v42, %v1836_v47  ;;  %v1837_v20 = vadd.f32 %v1729_v15, %v1459_v45  ;;  %2144 = vmatprep.subr.bf16.mxu1 %v7606_v8  ;;  %v1975_v24 = vmax.f32 %v1911_v40, 0.0  ;;  %v1463_v45 = vadd.f32 %v7364_v26, %v1085_v58  ;;  %v9033_v47 = vld [vmem:[#allocation22_spill] sm:$0xff] }
 0x240   :  { %v1733_v53 = vpop.f32.mrf.mxu0  ;;  %2145 = vmatpush1.bf16.msra.mxu1 %v7600_v27  ;;  %v680_v10 = vadd.f32 %v9034_v7, %v9033_v47  ;;  %v1465_v26 = vadd.f32 %v7511_v28, %v7370_v6  ;;  %v1468_v7 = vadd.f32 %v7547_v60, %v7380_v19  ;;  %v1470_v19 = vadd.f32 %v7569_v56, %v7386_v43  ;;  %v9037_v43 = vld [vmem:[#allocation26_spill] sm:$0xff]  ;;  %v9038_v56 = vld [vmem:[#allocation27_spill] sm:$0xff] }
 0x241   :  { %v1976_v23 = vmax.f32 %v1912_v31, 0.0  ;;  %v1913_v61 = vadd.f32 %v7449_v39, %v1837_v20  ;;  %v1838_v4 = vadd.f32 %v1733_v53, %v7357_v2  ;;  %2146 = vmatprep.subr.bf16.mxu1 %v7587_v62 }
 0x242   :  { %v1735_v25 = vpop.f32.mrf.mxu0 }
 0x243   :  { %v7622_v41 = vpack.c.bf16 %v1976_v23, %v1974_v11  ;;  %v1977_v34 = vmax.f32 %v1913_v61, 0.0  ;;  %v1839_v49 = vadd.f32 %v1735_v25, %v7360_v5  ;;  %v1914_v57 = vadd.f32 %v7444_v42, %v1838_v4  ;;  %v7647_v4 = vpop.f32.mrf.mxu1 }
 0x244   :  { %v1737_v17 = vpop.f32.mrf.mxu0  ;;  %2147 = vmatpush1.bf16.msra.mxu1 %v7583_v48  ;;  %v1466_v61 = vadd.f32 %v7524_v59, %v7375_v16  ;;  %v9035_v16 = vld [vmem:[#allocation24_spill] sm:$0xff]  ;;  %v9036_v59 = vld [vmem:[#allocation25_spill] sm:$0xff] }
 0x245   :  { %v1840_v2 = vadd.f32 %v1737_v17, %v7366_v33  ;;  %2148 = vmatprep.subr.bf16.mxu1 %v7565_v14  ;;  %v7630_v22 = vpack.c.bf16 %v1977_v34, %v1975_v24  ;;  %v1915_v5 = vadd.f32 %v7449_v39, %v1839_v49  ;;  %v1089_v33 = vadd.f32 %v7377_v9, %v680_v10 }
 0x246   :  { %v1739_v15 = vpop.f32.mrf.mxu0  ;;  %v1978_v58 = vmax.f32 %v1914_v57, 0.0  ;;  %v690_v57 = vadd.f32 %v9036_v59, %v9035_v16 }
 0x247   :  { %v1916_v40 = vadd.f32 %v7444_v42, %v1840_v2  ;;  %v1841_v31 = vadd.f32 %v1739_v15, %v1463_v45  ;;  %v1979_v6 = vmax.f32 %v1915_v5, 0.0  ;;  %v1467_v49 = vadd.f32 %v7537_v29, %v1089_v33  ;;  %v7659_v2 = vpop.f32.mrf.mxu1 }
 0x248   :  { %v1743_v20 = vpop.f32.mrf.mxu0  ;;  %2149 = vmatpush1.bf16.msra.mxu1 %v7561_v35  ;;  %v1469_v5 = vadd.f32 %v7559_v52, %v7383_v44 }
 0x249   :  { %v1980_v53 = vmax.f32 %v1916_v40, 0.0  ;;  %v1917_v11 = vadd.f32 %v7449_v39, %v1841_v31  ;;  %v1842_v23 = vadd.f32 %v1743_v20, %v7372_v54  ;;  %2150 = vmatprep.subr.bf16.mxu1 %v7543_v63  ;;  %v1093_v40 = vadd.f32 %v7388_v12, %v690_v57  ;;  %v7673_v60 = vpop.f32.mrf.mxu1  ;;  %v9040_v57 = vld [vmem:[#allocation70_spill] sm:$0xff] }
 0x24a   :  { %v1745_v25 = vpop.f32.mrf.mxu0 }
 0x24b   :  { %v7649_v28 = vpack.c.bf16 %v1980_v53, %v1978_v58  ;;  %v1981_v9 = vmax.f32 %v1917_v11, 0.0  ;;  %v1843_v24 = vadd.f32 %v1745_v25, %v1465_v26  ;;  %v1918_v54 = vadd.f32 %v7444_v42, %v1842_v23 }
 0x24c   :  { %v1747_v34 = vpop.f32.mrf.mxu0  ;;  %2151 = vmatpush1.bf16.msra.mxu1 %v7539_v50 }
 0x24d   :  { %v1844_v17 = vadd.f32 %v1747_v34, %v1466_v61  ;;  %2152 = vmatprep.subr.bf16.mxu1 %v7520_v32  ;;  %v7655_v45 = vpack.c.bf16 %v1981_v9, %v1979_v6  ;;  %v1919_v10 = vadd.f32 %v7449_v39, %v1843_v24  ;;  %v1982_v26 = vmax.f32 %v1918_v54, 0.0  ;;  %v1405_v34 = vpop.f32.mrf.mxu1  ;;  %v9039_v54 = vld [vmem:[#allocation69_spill] sm:$0xff] }
 0x24e   :  { %v1749_v47 = vpop.f32.mrf.mxu0  ;;  %v1471_v61 = vadd.f32 %v7581_v36, %v1093_v40  ;;  %v700_v24 = vadd.f32 %v9038_v56, %v9037_v43 }
 0x24f   :  { %v1920_v29 = vadd.f32 %v7444_v42, %v1844_v17  ;;  %v1845_v15 = vadd.f32 %v1749_v47, %v1467_v49  ;;  %v1983_v11 = vmax.f32 %v1919_v10, 0.0  ;;  %v1472_v17 = vadd.f32 %v7591_v3, %v9039_v54  ;;  %v9042_v3 = vld [vmem:[#allocation71_spill] sm:$0xff] }
 0x250   :  { %v1753_v31 = vpop.f32.mrf.mxu0  ;;  %2153 = vmatpush1.bf16.msra.mxu1 %v7513_v30  ;;  %v1473_v47 = vadd.f32 %v7598_v55, %v9040_v57 }
 0x251   :  { %v1984_v33 = vmax.f32 %v1920_v29, 0.0  ;;  %v1921_v20 = vadd.f32 %v7449_v39, %v1845_v15  ;;  %v1846_v58 = vadd.f32 %v1753_v31, %v1468_v7  ;;  %2154 = vmatprep.subr.bf16.mxu1 %v7497_v13  ;;  %v9041_v7 = vld [vmem:[#allocation72_spill] sm:$0xff] }
 0x252   :  { %v1755_v53 = vpop.f32.mrf.mxu0  ;;  %v1097_v10 = vadd.f32 %v9041_v7, %v700_v24  ;;  %v9045_v24 = vld [vmem:[#allocation73_spill] sm:$0xff] }
 0x253   :  { %v7675_v44 = vpack.c.bf16 %v1984_v33, %v1982_v26  ;;  %v1985_v12 = vmax.f32 %v1921_v20, 0.0  ;;  %v1847_v52 = vadd.f32 %v1755_v53, %v1469_v5  ;;  %v1922_v25 = vadd.f32 %v7444_v42, %v1846_v58  ;;  %v1407_v33 = vpop.f32.mrf.mxu1 }
 0x254   :  { %v1757_v23 = vpop.f32.mrf.mxu0  ;;  %2155 = vmatpush1.bf16.msra.mxu1 %v7492_v18  ;;  %v1474_v26 = vadd.f32 %v7610_v38, %v9042_v3 }
 0x255   :  { %v1848_v6 = vadd.f32 %v1757_v23, %v1470_v19  ;;  %2156 = vmatprep.subr.bf16.mxu1 %v7481_v1  ;;  %v7681_v9 = vpack.c.bf16 %v1985_v12, %v1983_v11  ;;  %v1923_v16 = vadd.f32 %v7449_v39, %v1847_v52  ;;  %v1986_v15 = vmax.f32 %v1922_v25, 0.0  ;;  %v9043_v25 = vld [vmem:[#allocation28_spill] sm:$0xff]  ;;  %v1409_v43 = vpop.f32.mrf.mxu1 }
 0x256   :  { %v1759_v49 = vpop.f32.mrf.mxu0  ;;  %v1475_v12 = vadd.f32 %v7620_v51, %v1097_v10 }
 0x257   :  { %v1924_v59 = vadd.f32 %v7444_v42, %v1848_v6  ;;  %v1849_v36 = vadd.f32 %v1759_v49, %v1471_v61  ;;  %v1987_v58 = vmax.f32 %v1923_v16, 0.0  ;;  %v9044_v6 = vld [vmem:[#allocation29_spill] sm:$0xff]  ;;  %v1476_v49 = vadd.f32 %v7634_v21, %v9045_v24  ;;  %v1411_v21 = vpop.f32.mrf.mxu1 }
 0x258   :  { %v1763_v29 = vpop.f32.mrf.mxu0  ;;  %2157 = vmatpush1.bf16.msra.mxu1 %v7476_v37  ;;  %v710_v38 = vadd.f32 %v9044_v6, %v9043_v25 }
 0x259   :  { %v1988_v5 = vmax.f32 %v1924_v59, 0.0  ;;  %v1925_v40 = vadd.f32 %v7449_v39, %v1849_v36  ;;  %v1850_v31 = vadd.f32 %v1763_v29, %v1472_v17  ;;  %2158 = vmatprep.subr.bf16.mxu1 %v7466_v46  ;;  %v9046_v59 = vld [vmem:[#allocation74_spill] sm:$0xff]  ;;  %v9047_v36 = vld [vmem:[#allocation76_spill] sm:$0xff]  ;;  %v1415_v6 = vpop.f32.mrf.mxu1 }
 0x25a   :  { %v1765_v20 = vpop.f32.mrf.mxu0  ;;  %v1477_v51 = vadd.f32 %v7647_v4, %v9046_v59  ;;  %v1101_v57 = vadd.f32 %v9047_v36, %v710_v38  ;;  %v9051_v38 = vld [vmem:[#allocation30_spill] sm:$0xff] }
 0x25b   :  { %v7697_v19 = vpack.c.bf16 %v1988_v5, %v1986_v15  ;;  %v1989_v55 = vmax.f32 %v1925_v40, 0.0  ;;  %v1851_v53 = vadd.f32 %v1765_v20, %v1473_v47  ;;  %v1926_v52 = vadd.f32 %v7444_v42, %v1850_v31  ;;  %v9048_v5 = vld [vmem:[#allocation75_spill] sm:$0xff] }
 0x25c   :  { %v1767_v11 = vpop.f32.mrf.mxu0  ;;  %2159 = vmatpush1.bf16.msra.mxu1 %v7459_v0  ;;  %v1478_v40 = vadd.f32 %v7659_v2, %v9048_v5  ;;  %v1479_v4 = vadd.f32 %v7673_v60, %v1101_v57  ;;  %v9053_v60 = vld [vmem:[#allocation77_spill] sm:$0xff] }
 0x25d   :  { %v1852_v23 = vadd.f32 %v1767_v11, %v1474_v26  ;;  %v7702_v61 = vpack.c.bf16 %v1989_v55, %v1987_v58  ;;  %v1927_v54 = vadd.f32 %v7449_v39, %v1851_v53  ;;  %v1990_v7 = vmax.f32 %v1926_v52, 0.0  ;;  %v9049_v52 = vld [vmem:[#allocation33_spill] sm:$0xff] }
 0x25e   :  { %v1769_v56 = vpop.f32.mrf.mxu0 }
 0x25f   :  { %v1928_v17 = vadd.f32 %v7444_v42, %v1852_v23  ;;  %v1853_v16 = vadd.f32 %v1769_v56, %v1475_v12  ;;  %v1991_v3 = vmax.f32 %v1927_v54, 0.0  ;;  %v9050_v23 = vld [vmem:[#allocation34_spill] sm:$0xff]  ;;  %v1480_v56 = vadd.f32 %v1405_v34, %v9051_v38 }
 0x260   :  { %v1773_v47 = vpop.f32.mrf.mxu0  ;;  %v720_v25 = vadd.f32 %v9050_v23, %v9049_v52 }
 0x261   :  { %v1992_v10 = vmax.f32 %v1928_v17, 0.0  ;;  %v1929_v29 = vadd.f32 %v7449_v39, %v1853_v16  ;;  %v1854_v15 = vadd.f32 %v1773_v47, %v1476_v49  ;;  %v9052_v17 = vld [vmem:[#allocation31_spill] sm:$0xff] }
 0x262   :  { %v1775_v31 = vpop.f32.mrf.mxu0  ;;  %v1481_v16 = vadd.f32 %v1407_v33, %v9052_v17  ;;  %v1105_v59 = vadd.f32 %v9053_v60, %v720_v25 }
 0x263   :  { %v7716_v26 = vpack.c.bf16 %v1992_v10, %v1990_v7  ;;  %v1993_v20 = vmax.f32 %v1929_v29, 0.0  ;;  %v1855_v58 = vadd.f32 %v1775_v31, %v1477_v51  ;;  %v1930_v53 = vadd.f32 %v7444_v42, %v1854_v15  ;;  %v9054_v10 = vld [vmem:[#allocation32_spill] sm:$0xff]  ;;  %v1417_v15 = vpop.f32.mrf.mxu1 }
 0x264   :  { %v1777_v55 = vpop.f32.mrf.mxu0  ;;  %v1482_v29 = vadd.f32 %v1409_v43, %v9054_v10  ;;  %v9057_v43 = vld [vmem:[#allocation35_spill] sm:$0xff] }
 0x265   :  { %v1856_v11 = vadd.f32 %v1777_v55, %v1478_v40  ;;  %v7720_v12 = vpack.c.bf16 %v1993_v20, %v1991_v3  ;;  %v1931_v24 = vadd.f32 %v7449_v39, %v1855_v58  ;;  %v1994_v36 = vmax.f32 %v1930_v53, 0.0  ;;  %v9055_v53 = vld [vmem:[#allocation38_spill] sm:$0xff]  ;;  %v1419_v23 = vpop.f32.mrf.mxu1 }
 0x266   :  { %v1779_v2 = vpop.f32.mrf.mxu0  ;;  %v1483_v58 = vadd.f32 %v1411_v21, %v1105_v59  ;;  %v9059_v21 = vld [vmem:[#allocation79_spill] sm:$0xff] }
 0x267   :  { %v1932_v49 = vadd.f32 %v7444_v42, %v1856_v11  ;;  %v1857_v54 = vadd.f32 %v1779_v2, %v1479_v4  ;;  %v1995_v34 = vmax.f32 %v1931_v24, 0.0  ;;  %v9056_v11 = vld [vmem:[#allocation39_spill] sm:$0xff]  ;;  %v1484_v2 = vadd.f32 %v1415_v6, %v9057_v43 }
 0x268   :  { %v1783_v51 = vpop.f32.mrf.mxu0  ;;  %v730_v52 = vadd.f32 %v9056_v11, %v9055_v53 }
 0x269   :  { %v1996_v57 = vmax.f32 %v1932_v49, 0.0  ;;  %v1933_v47 = vadd.f32 %v7449_v39, %v1857_v54  ;;  %v1858_v7 = vadd.f32 %v1783_v51, %v1480_v56  ;;  %v9058_v49 = vld [vmem:[#allocation36_spill] sm:$0xff] }
 0x26a   :  { %v1785_v5 = vpop.f32.mrf.mxu0  ;;  %v1485_v54 = vadd.f32 %v1417_v15, %v9058_v49  ;;  %v1109_v17 = vadd.f32 %v9059_v21, %v730_v52  ;;  %v9061_v49 = vmov 0   ;;  %v5955_v21 = vld [vmem:[%s9001_s9 + $0x14] ss:$8 sps:$4 sm:$0xff]  }
 0x26b   :  { %v7731_v40 = vpack.c.bf16 %v1996_v57, %v1994_v36  ;;  %v1997_v31 = vmax.f32 %v1933_v47, 0.0  ;;  %v1859_v3 = vadd.f32 %v1785_v5, %v1481_v16  ;;  %v1934_v33 = vadd.f32 %v7444_v42, %v1858_v7  ;;  %v9060_v57 = vld [vmem:[#allocation37_spill] sm:$0xff]  ;;  %v1421_v7 = vpop.f32.mrf.mxu1 }
 0x26c   :  { %v1787_v20 = vpop.f32.mrf.mxu0  ;;  %v1486_v47 = vadd.f32 %v1419_v23, %v9060_v57  ;;  %v6005_v57 = vld [vmem:[%s8877_s6 + $0x8] sm:$0xff]  }
 0x26d   :  { %v1860_v55 = vadd.f32 %v1787_v20, %v1482_v29  ;;  %v7734_v4 = vpack.c.bf16 %v1997_v31, %v1995_v34  ;;  %v1935_v38 = vadd.f32 %v7449_v39, %v1859_v3  ;;  %v1998_v60 = vmax.f32 %v1934_v33, 0.0 }
 0x26e   :  { %v1789_v25 = vpop.f32.mrf.mxu0  ;;  %v1487_v3 = vadd.f32 %v1421_v7, %v1109_v17  ;;  %v5957_v17 = vld [vmem:[%s9001_s9 + $0x10] ss:$8 sps:$4 sm:$0xff]   ;;  %v6007_v7 = vld [vmem:[%s8876_s5 + $0x8] sm:$0xff]  }
 0x26f   :  { %v1936_v56 = vadd.f32 %v7444_v42, %v1860_v55  ;;  %v1861_v24 = vadd.f32 %v1789_v25, %v1483_v58  ;;  %v1999_v6 = vmax.f32 %v1935_v38, 0.0 }
 0x270   :  { %v1793_v16 = vpop.f32.mrf.mxu0 }
 0x271   :  { %v2000_v59 = vmax.f32 %v1936_v56, 0.0  ;;  %v1937_v51 = vadd.f32 %v7449_v39, %v1861_v24  ;;  %v1862_v36 = vadd.f32 %v1793_v16, %v1484_v2  ;;  %v5958_v16 = vld [vmem:[%s9001_s9 + $0x24] ss:$8 sps:$4 sm:$0xff]  }
 0x272   :  { %v1795_v10 = vpop.f32.mrf.mxu0 }
 0x273   :  { %v7745_v29 = vpack.c.bf16 %v2000_v59, %v1998_v60  ;;  %v2001_v5 = vmax.f32 %v1937_v51, 0.0  ;;  %v1863_v34 = vadd.f32 %v1795_v10, %v1485_v54  ;;  %v1938_v15 = vadd.f32 %v7444_v42, %v1862_v36  ;;  %v5952_v54 = vld [vmem:[%s9001_s9] ss:$8 sps:$4 sm:$0xff]   ;;  %v5991_v60 = vld [vmem:[%s8875_s4 + $0x64] ss:$8 sps:$4 sm:$0xff]   ;;  %v6004_v51 = vld [vmem:[%s8876_s5 + $0x18] sm:$0xff]  }
 0x274   :  { %v1797_v31 = vpop.f32.mrf.mxu0  ;;  %v6003_v59 = vld [vmem:[%s8876_s5 + $0x20] sm:$0xff]  }
 0x275   :  { %v1864_v20 = vadd.f32 %v1797_v31, %v1486_v47  ;;  %v7748_v58 = vpack.c.bf16 %v2001_v5, %v1999_v6  ;;  %v1939_v55 = vadd.f32 %v7449_v39, %v1863_v34  ;;  %v2002_v52 = vmax.f32 %v1938_v15, 0.0  ;;  %v5993_v36 = vld [vmem:[%s8875_s4 + $0x60] ss:$8 sps:$4 sm:$0xff]   ;;  %v6006_v47 = vld [vmem:[%s8876_s5 + $0x10] sm:$0xff]  }
 0x276   :  { %v1799_v33 = vpop.f32.mrf.mxu0  ;;  %v6008_v10 = vld [vmem:[%s8876_s5] sm:$0xff]   ;;  %v6011_v5 = vld [vmem:[%s8877_s6 + $0x50] ss:$0 sps:$4 sm:$0xff]   ;;  %v6013_v15 = vld [vmem:[%s8877_s6 + $0x48] sm:$0xff]  }
 0x277   :  { %v1940_v53 = vadd.f32 %v7444_v42, %v1864_v20  ;;  %v1865_v11 = vadd.f32 %v1799_v33, %v1487_v3  ;;  %v2003_v43 = vmax.f32 %v1939_v55, 0.0  ;;  %v5994_v42 = vld [vmem:[%s8877_s6 + $0x38] sm:$0xff]   ;;  %v6009_v6 = vld [vmem:[%s8877_s6] sm:$0xff]   ;;  %v2774_v31 = vsel %vm2596_vm3, %v6011_v5, 0  ;;  %v6012_v3 = vld [vmem:[%s8876_s5 + $0x48] sm:$0xff]  }
 0x278   :  { %2777 = vmatpush1.bf16.msra.mxu0 %v5994_v42  ;;  %v6014_v20 = vld [vmem:[%s8876_s5 + $0x40] sm:$0xff]   ;;  %v2925_v33 = vld [vmem:[%s8878_s7 + $0x50] sm:$0x33]  ;;  %v5499_v55 = vld [vmem:[%s8878_s7 + $0xa8] sm:$0x33] }
 0x279   :  { %v2004_v23 = vmax.f32 %v1940_v53, 0.0  ;;  %v1941_v25 = vadd.f32 %v7449_v39, %v1865_v11  ;;  %v5995_v39 = vld [vmem:[%s8877_s6 + $0x30] sm:$0xff]   ;;  %2778 = vmatprep.subr.bf16.mxu0 %v9061_v49  ;;  %v5531_v53 = vcombine.high %v2925_v33, %v2925_v33  ;;  %v5511_v11 = vcombine.high %v5499_v55, %v5499_v55 }
 0x27b   :  { %v2036_v2 = vpack.c.bf16 %v2004_v23, %v2002_v52  ;;  %v2005_v38 = vmax.f32 %v1941_v25, 0.0 }
 0x27c   :  { %2779 = vmatpush1.bf16.msra.mxu0 %v5995_v39 }
 0x27d   :  { %v2037_v56 = vpack.c.bf16 %v2005_v38, %v2003_v43  ;;  %v2139_v24 = vsel %vm2137_vm2, %v2036_v2, 0  ;;  %2780 = vmatprep.subr.bf16.mxu0 %v9061_v49 }
 0x27f   :  { %5423 = vmatprep.subr.msk.bf16.mxu1 %vm2137_vm2, %v2037_v56 }
 0x280   :  { %2161 = vmatpush2.bf16.msra.mxu1 %v2139_v24 }
 0x281   :  { %2162 = vmatprep.subr.bf16.mxu1 %v7748_v58 }
 0x284   :  { %2163 = vmatpush2.bf16.msra.mxu1 %v7745_v29 }
 0x285   :  { %2164 = vmatprep.subr.bf16.mxu1 %v7734_v4 }
 0x288   :  { %2165 = vmatpush2.bf16.msra.mxu1 %v7731_v40 }
 0x289   :  { %2166 = vmatprep.subr.bf16.mxu1 %v7720_v12 }
 0x28c   :  { %2167 = vmatpush2.bf16.msra.mxu1 %v7716_v26 }
 0x28d   :  { %2168 = vmatprep.subr.bf16.mxu1 %v7702_v61 }
 0x290   :  { %2169 = vmatpush2.bf16.msra.mxu1 %v7697_v19 }
 0x291   :  { %2170 = vmatprep.subr.bf16.mxu1 %v7681_v9 }
 0x294   :  { %2171 = vmatpush2.bf16.msra.mxu1 %v7675_v44 }
 0x295   :  { %2172 = vmatprep.subr.bf16.mxu1 %v7655_v45 }
 0x298   :  { %2173 = vmatpush2.bf16.msra.mxu1 %v7649_v28 }
 0x299   :  { %2174 = vmatprep.subr.bf16.mxu1 %v7630_v22 }
 0x29c   :  { %2175 = vmatpush2.bf16.msra.mxu1 %v7622_v41 }
 0x29d   :  { %2345 = vmatprep.subr.bf16.mxu1 %v7606_v8  ;;  %v5997_v8 = vld [vmem:[%s8877_s6 + $0x20] sm:$0xff]  }
 0x29f   :  { %2177 = vmatmul.mubr.bf16.vlgmr.msra.gmra.mxu1 %v5952_v54 }
 0x2a0   :  { %2346 = vmatpush1.bf16.msra.mxu1 %v7600_v27  ;;  %5425 = vmatprep.mubr.msk.bf16.mxu1 %vm2115_vm1, %v5955_v21  ;;  %v5979_v27 = vld [vmem:[%s8875_s4 + $0x24] ss:$8 sps:$4 sm:$0xff]  }
 0x2a1   :  { %2347 = vmatprep.subr.bf16.mxu1 %v7587_v62  ;;  %v5960_v62 = vld [vmem:[%s9001_s9 + $0x20] ss:$8 sps:$4 sm:$0xff]  }
 0x2a4   :  { %2348 = vmatpush1.bf16.msra.mxu1 %v7583_v48  ;;  %v5961_v48 = vld [vmem:[%s9001_s9 + $0x34] ss:$8 sps:$4 sm:$0xff]  }
 0x2a5   :  { %2349 = vmatprep.subr.bf16.mxu1 %v7565_v14  ;;  %v5996_v14 = vld [vmem:[%s8877_s6 + $0x28] sm:$0xff]  }
 0x2a6   :  { %2781 = vmatpush1.bf16.msra.mxu0 %v5996_v14 }
 0x2a7   :  { %2187 = vmatmul.mubr.bf16.gmra.mxu1 %v5957_v17  ;;  %2782 = vmatprep.subr.bf16.mxu0 %v9061_v49 }
 0x2a8   :  { %2350 = vmatpush1.bf16.msra.mxu1 %v7561_v35  ;;  %5426 = vmatprep.mubr.msk.bf16.mxu1 %vm2115_vm1, %v5958_v16  ;;  %v5978_v35 = vld [vmem:[%s8875_s4 + $0x10] ss:$8 sps:$4 sm:$0xff]  }
 0x2a9   :  { %2351 = vmatprep.subr.bf16.mxu1 %v7543_v63  ;;  %v5963_v63 = vld [vmem:[%s9001_s9 + $0x30] ss:$8 sps:$4 sm:$0xff]  }
 0x2aa   :  { %2783 = vmatpush1.bf16.msra.mxu0 %v5997_v8 }
 0x2ab   :  { %2784 = vmatprep.subr.bf16.mxu0 %v9061_v49 }
 0x2ac   :  { %2352 = vmatpush1.bf16.msra.mxu1 %v7539_v50  ;;  %v5964_v50 = vld [vmem:[%s9001_s9 + $0x44] ss:$8 sps:$4 sm:$0xff]  }
 0x2ad   :  { %2353 = vmatprep.subr.bf16.mxu1 %v7520_v32  ;;  %v5976_v32 = vld [vmem:[%s8875_s4 + $0x14] ss:$8 sps:$4 sm:$0xff]  }
 0x2af   :  { %2197 = vmatmul.mubr.bf16.gmra.mxu1 %v5960_v62 }
 0x2b0   :  { %2354 = vmatpush1.bf16.msra.mxu1 %v7513_v30  ;;  %5427 = vmatprep.mubr.msk.bf16.mxu1 %vm2115_vm1, %v5961_v48  ;;  %v5973_v30 = vld [vmem:[%s8875_s4] ss:$8 sps:$4 sm:$0xff]  }
 0x2b1   :  { %2355 = vmatprep.subr.bf16.mxu1 %v7497_v13  ;;  %v5966_v13 = vld [vmem:[%s9001_s9 + $0x40] ss:$8 sps:$4 sm:$0xff]  }
 0x2b4   :  { %2356 = vmatpush1.bf16.msra.mxu1 %v7492_v18  ;;  %v5967_v18 = vld [vmem:[%s9001_s9 + $0x54] ss:$8 sps:$4 sm:$0xff]  }
 0x2b5   :  { %2357 = vmatprep.subr.bf16.mxu1 %v7481_v1  ;;  %v5975_v1 = vld [vmem:[%s8875_s4 + $0x4] ss:$8 sps:$4 sm:$0xff]  }
 0x2b7   :  { %2207 = vmatmul.mubr.bf16.gmra.mxu1 %v5963_v63 }
 0x2b8   :  { %2358 = vmatpush1.bf16.msra.mxu1 %v7476_v37  ;;  %5428 = vmatprep.mubr.msk.bf16.mxu1 %vm2115_vm1, %v5964_v50  ;;  %v5972_v37 = vld [vmem:[%s9001_s9 + $0x60] ss:$8 sps:$4 sm:$0xff]  }
 0x2b9   :  { %2359 = vmatprep.subr.bf16.mxu1 %v7466_v46  ;;  %v5969_v46 = vld [vmem:[%s9001_s9 + $0x50] ss:$8 sps:$4 sm:$0xff]  }
 0x2bc   :  { %2360 = vmatpush1.bf16.msra.mxu1 %v7459_v0  ;;  %v5970_v0 = vld [vmem:[%s9001_s9 + $0x64] ss:$8 sps:$4 sm:$0xff]  }
 0x2bd   :  { %5445 = vmatprep.subr.msk.bf16.mxu1 %vm2137_vm2, %v2037_v56 }
 0x2bf   :  { %2217 = vmatmul.mubr.bf16.gmra.mxu1 %v5966_v13 }
 0x2c0   :  { %2362 = vmatpush2.bf16.msra.mxu1 %v2139_v24  ;;  %5429 = vmatprep.mubr.msk.bf16.mxu1 %vm2115_vm1, %v5967_v18 }
 0x2c1   :  { %2363 = vmatprep.subr.bf16.mxu1 %v7748_v58  ;;  %v6015_v58 = vld [vmem:[%s8877_s6 + $0x40] sm:$0xff]  }
 0x2c4   :  { %2364 = vmatpush2.bf16.msra.mxu1 %v7745_v29  ;;  %v6010_v29 = vld [vmem:[%s8876_s5 + $0x50] ss:$0 sps:$4 sm:$0xff]  }
 0x2c5   :  { %2365 = vmatprep.subr.bf16.mxu1 %v7734_v4  ;;  %v5990_v4 = vld [vmem:[%s8875_s4 + $0x50] ss:$8 sps:$4 sm:$0xff]   ;;  %v2598_v34 = vsel %vm2596_vm3, %v6010_v29, 0 }
 0x2c7   :  { %2227 = vmatmul.mubr.bf16.gmra.mxu1 %v5969_v46 }
 0x2c8   :  { %2366 = vmatpush2.bf16.msra.mxu1 %v7731_v40  ;;  %5430 = vmatprep.mubr.msk.bf16.mxu1 %vm2115_vm1, %v5970_v0  ;;  %v6002_v40 = vld [vmem:[%s8876_s5 + $0x28] sm:$0xff]  }
 0x2c9   :  { %2367 = vmatprep.subr.bf16.mxu1 %v7720_v12  ;;  %v6001_v12 = vld [vmem:[%s8877_s6 + $0x10] sm:$0xff]  }
 0x2cc   :  { %2368 = vmatpush2.bf16.msra.mxu1 %v7716_v26  ;;  %v6000_v26 = vld [vmem:[%s8876_s5 + $0x30] sm:$0xff]  }
 0x2cd   :  { %2369 = vmatprep.subr.bf16.mxu1 %v7702_v61  ;;  %v5988_v61 = vld [vmem:[%s8875_s4 + $0x54] ss:$8 sps:$4 sm:$0xff]  }
 0x2cf   :  { %2237 = vmatmul.mubr.bf16.gmra.mxu1 %v5972_v37 }
 0x2d0   :  { %2370 = vmatpush2.bf16.msra.mxu1 %v7697_v19  ;;  %5446 = vmatprep.mubr.msk.bf16.mxu1 %vm2115_vm1, %v5975_v1  ;;  %v5987_v19 = vld [vmem:[%s8875_s4 + $0x40] ss:$8 sps:$4 sm:$0xff]  }
 0x2d1   :  { %2371 = vmatprep.subr.bf16.mxu1 %v7681_v9  ;;  %v5999_v9 = vld [vmem:[%s8876_s5 + $0x38] sm:$0xff]  }
 0x2d4   :  { %2372 = vmatpush2.bf16.msra.mxu1 %v7675_v44  ;;  %v5985_v44 = vld [vmem:[%s8875_s4 + $0x44] ss:$8 sps:$4 sm:$0xff]  }
 0x2d5   :  { %2373 = vmatprep.subr.bf16.mxu1 %v7655_v45  ;;  %v5998_v45 = vld [vmem:[%s8877_s6 + $0x18] sm:$0xff]  }
 0x2d6   :  { %2785 = vmatpush1.bf16.msra.mxu0 %v5998_v45  ;;  %v5530_v45 = vcombine.low %v2925_v33, %v2925_v33 }
 0x2d7   :  { %2786 = vmatprep.subr.bf16.mxu0 %v9061_v49 }
 0x2d8   :  { %2374 = vmatpush2.bf16.msra.mxu1 %v7649_v28  ;;  %v5984_v28 = vld [vmem:[%s8875_s4 + $0x30] ss:$8 sps:$4 sm:$0xff]  }
 0x2d9   :  { %2375 = vmatprep.subr.bf16.mxu1 %v7630_v22  ;;  %v5982_v22 = vld [vmem:[%s8875_s4 + $0x34] ss:$8 sps:$4 sm:$0xff]  }
 0x2da   :  { %2787 = vmatpush1.bf16.msra.mxu0 %v6001_v12 }
 0x2db   :  { %2788 = vmatprep.subr.bf16.mxu0 %v9061_v49 }
 0x2dc   :  { %2376 = vmatpush2.bf16.msra.mxu1 %v7622_v41  ;;  %v5981_v41 = vld [vmem:[%s8875_s4 + $0x20] ss:$8 sps:$4 sm:$0xff]  }
 0x2dd   :  { %2600 = vmatprep.subr.bf16.mxu1 %v9061_v49 }
 0x2de   :  { %2789 = vmatpush1.bf16.msra.mxu0 %v6005_v57  ;;  %v6020_v57 = vld [vmem:[%s8878_s7 + $0x40] ss:$8 sps:$4 sm:$0xff]  }
 0x2df   :  { %2378 = vmatmul.mubr.bf16.vlgmr.msra.gmra.mxu1 %v5973_v30  ;;  %2790 = vmatprep.subr.bf16.mxu0 %v9061_v49 }
 0x2e0   :  { %5447 = vmatprep.mubr.msk.bf16.mxu1 %vm2115_vm1, %v5976_v32  ;;  %2601 = vmatpush1.bf16.msra.mxu1 %v5999_v9 }
 0x2e1   :  { %2602 = vmatprep.subr.bf16.mxu1 %v9061_v49 }
 0x2e2   :  { %2791 = vmatpush1.bf16.msra.mxu0 %v6009_v6 }
 0x2e3   :  { %2802 = vmatprep.subr.bf16.mxu0 %v9061_v49 }
 0x2e4   :  { %2603 = vmatpush1.bf16.msra.mxu1 %v6000_v26 }
 0x2e5   :  { %2604 = vmatprep.subr.bf16.mxu1 %v9061_v49 }
 0x2e6   :  { %2803 = vmatpush2.bf16.msra.mxu0 %v2774_v31 }
 0x2e7   :  { %2388 = vmatmul.mubr.bf16.gmra.mxu1 %v5978_v35  ;;  %2804 = vmatprep.subr.bf16.mxu0 %v9061_v49 }
 0x2e8   :  { %5448 = vmatprep.mubr.msk.bf16.mxu1 %vm2115_vm1, %v5979_v27  ;;  %2605 = vmatpush1.bf16.msra.mxu1 %v6002_v40 }
 0x2e9   :  { %2606 = vmatprep.subr.bf16.mxu1 %v9061_v49 }
 0x2ea   :  { %2805 = vmatpush2.bf16.msra.mxu0 %v6013_v15 }
 0x2eb   :  { %2806 = vmatprep.subr.bf16.mxu0 %v9061_v49 }
 0x2ec   :  { %2607 = vmatpush1.bf16.msra.mxu1 %v6003_v59 }
 0x2ed   :  { %2608 = vmatprep.subr.bf16.mxu1 %v9061_v49 }
 0x2ee   :  { %2807 = vmatpush2.bf16.msra.mxu0 %v6015_v58 }
 0x2ef   :  { %2398 = vmatmul.mubr.bf16.gmra.mxu1 %v5981_v41  ;;  %5532 = vmatprep.subr.msk.bf16.mxu0 %vm3035_vm4, %v5531_v53 }
 0x2f0   :  { %5449 = vmatprep.mubr.msk.bf16.mxu1 %vm2115_vm1, %v5982_v22  ;;  %2609 = vmatpush1.bf16.msra.mxu1 %v6004_v51  ;;  %v6022_v51 = vld [vmem:[%s8878_s7 + $0x44] ss:$8 sps:$4 sm:$0xff]  }
 0x2f1   :  { %2610 = vmatprep.subr.bf16.mxu1 %v9061_v49 }
 0x2f4   :  { %2611 = vmatpush1.bf16.msra.mxu1 %v6006_v47 }
 0x2f5   :  { %2612 = vmatprep.subr.bf16.mxu1 %v9061_v49 }
 0x2f7   :  { %2408 = vmatmul.mubr.bf16.gmra.mxu1 %v5984_v28 }
 0x2f8   :  { %5450 = vmatprep.mubr.msk.bf16.mxu1 %vm2115_vm1, %v5985_v44  ;;  %2613 = vmatpush1.bf16.msra.mxu1 %v6007_v7  ;;  %v5510_v44 = vcombine.low %v5499_v55, %v5499_v55 }
 0x2f9   :  { %2614 = vmatprep.subr.bf16.mxu1 %v9061_v49 }
 0x2fa   :  { %v3037_v59 = vsel %vm3035_vm4, %v5510_v44, 0 }
 0x2fc   :  { %2615 = vmatpush1.bf16.msra.mxu1 %v6008_v10 }
 0x2fd   :  { %2626 = vmatprep.subr.bf16.mxu1 %v9061_v49 }
 0x2ff   :  { %2418 = vmatmul.mubr.bf16.gmra.mxu1 %v5987_v19 }
 0x300   :  { %5451 = vmatprep.mubr.msk.bf16.mxu1 %vm2115_vm1, %v5988_v61  ;;  %2627 = vmatpush2.bf16.msra.mxu1 %v2598_v34 }
 0x301   :  { %2628 = vmatprep.subr.bf16.mxu1 %v9061_v49 }
 0x304   :  { %2629 = vmatpush2.bf16.msra.mxu1 %v6012_v3 }
 0x305   :  { %2630 = vmatprep.subr.bf16.mxu1 %v9061_v49 }
 0x307   :  { %2428 = vmatmul.mubr.bf16.gmra.mxu1 %v5990_v4 }
 0x308   :  { %5452 = vmatprep.mubr.msk.bf16.mxu1 %vm2115_vm1, %v5991_v60  ;;  %2631 = vmatpush2.bf16.msra.mxu1 %v6014_v20  ;;  %v3222_v60 = vsel %vm3035_vm4, %v5530_v45, 0 }
 0x309   :  { %5512 = vmatprep.subr.msk.bf16.mxu1 %vm3035_vm4, %v5511_v11 }
 0x30f   :  { %2438 = vmatmul.mubr.bf16.gmra.mxu1 %v5993_v36 }
 0x35f   :  { %v2178_v52 = vpop.f32.mrf.mxu1 }
 0x361   :  { %v2180_v23 = vpop.f32.mrf.mxu1 }
 0x363   :  { %v2182_v25 = vpop.f32.mrf.mxu1 }
 0x365   :  { %v2184_v43 = vpop.f32.mrf.mxu1 }
 0x367   :  { %v2188_v2 = vpop.f32.mrf.mxu1 }
 0x369   :  { %v2190_v38 = vpop.f32.mrf.mxu1 }
 0x36b   :  { %v2192_v56 = vpop.f32.mrf.mxu1 }
 0x36d   :  { %v2194_v24 = vpop.f32.mrf.mxu1 }
 0x36f   :  { %v7991_v42 = vpop.f32.mrf.mxu1 }
 0x371   :  { %v7993_v39 = vpop.f32.mrf.mxu1 }
 0x373   :  { %v7995_v54 = vpop.f32.mrf.mxu1 }
 0x375   :  { %v7997_v21 = vpop.f32.mrf.mxu1 }
 0x377   :  { %v7999_v17 = vpop.f32.mrf.mxu1 }
 0x379   :  { %v8001_v16 = vpop.f32.mrf.mxu1 }
 0x37b   :  { %v8003_v62 = vpop.f32.mrf.mxu1 }
 0x37d   :  { %v8005_v48 = vpop.f32.mrf.mxu1 }
 0x37f   :  { %v8007_v63 = vpop.f32.mrf.mxu1 }
 0x381   :  { %v8009_v50 = vpop.f32.mrf.mxu1 }
 0x383   :  { %v8011_v13 = vpop.f32.mrf.mxu1 }
 0x385   :  { %v8013_v18 = vpop.f32.mrf.mxu1 }
 0x387   :  { %v8015_v46 = vpop.f32.mrf.mxu1 }
 0x389   :  { %v8017_v0 = vpop.f32.mrf.mxu1 }
 0x38b   :  { %v8019_v37 = vpop.f32.mrf.mxu1 }
 0x38d   :  { %v8021_v1 = vpop.f32.mrf.mxu1 }
 0x38f   :  { %v8023_v30 = vpop.f32.mrf.mxu1 }
 0x391   :  { %v8025_v32 = vpop.f32.mrf.mxu1 }
 0x393   :  { %v8027_v35 = vpop.f32.mrf.mxu1 }
 0x395   :  { %v8029_v14 = vpop.f32.mrf.mxu1 }
 0x39f   :  { %v2379_v27 = vpop.f32.mrf.mxu1 }
 0x3a0   :  { %v2448_v61 = vmax.f32 %v2178_v52, %v2379_v27 }
 0x3a1   :  { %v2381_v8 = vpop.f32.mrf.mxu1 }
 0x3a2   :  { %v2449_v9 = vmax.f32 %v2180_v23, %v2381_v8 }
 0x3a3   :  { %v2383_v41 = vpop.f32.mrf.mxu1 }
 0x3a4   :  { %v2450_v22 = vmax.f32 %v2182_v25, %v2383_v41 }
 0x3a5   :  { %v2385_v28 = vpop.f32.mrf.mxu1 }
 0x3a6   :  { %v2451_v19 = vmax.f32 %v2184_v43, %v2385_v28  ;;  %v2476_v40 = vpack.c.bf16 %v2450_v22, %v2448_v61 }
 0x3a7   :  { %v2389_v26 = vpop.f32.mrf.mxu1 }
 0x3a8   :  { %v2477_v12 = vpack.c.bf16 %v2451_v19, %v2449_v9  ;;  %v2452_v29 = vmax.f32 %v2188_v2, %v2389_v26 }
 0x3a9   :  { %v2391_v4 = vpop.f32.mrf.mxu1 }
 0x3aa   :  { %5464 = vmatprep.mubr.msk.bf16.mxu1 %vm2574_vm5, %v2477_v12  ;;  %5482 = vmatprep.mubr.msk.bf16.mxu0 %vm2574_vm5, %v2477_v12  ;;  %v2453_v10 = vmax.f32 %v2190_v38, %v2391_v4 }
 0x3ab   :  { %v2393_v36 = vpop.f32.mrf.mxu1  ;;  %2633 = vmatmul.mubr.bf16.vlgmr.msra.gmra.mxu1 %v2476_v40  ;;  %2809 = vmatmul.mubr.bf16.vlgmr.msra.gmra.mxu0 %v2476_v40 }
 0x3ac   :  { %3232 = vmatpush1.bf16.msra.mxu0 %v3222_v60  ;;  %3047 = vmatpush1.bf16.msra.mxu1 %v3037_v59  ;;  %v2454_v47 = vmax.f32 %v2192_v56, %v2393_v36  ;;  %v6031_v36 = vld [vmem:[%s8878_s7 + $0x8c] ss:$8 sps:$4 sm:$0xff]  }
 0x3ad   :  { %v2395_v7 = vpop.f32.mrf.mxu1  ;;  %3233 = vmatprep.subr.bf16.mxu0 %v6022_v51 }
 0x3ae   :  { %v2455_v6 = vmax.f32 %v2194_v24, %v2395_v7  ;;  %v2478_v31 = vpack.c.bf16 %v2454_v47, %v2452_v29  ;;  %v6029_v47 = vld [vmem:[%s8878_s7 + $0x88] ss:$8 sps:$4 sm:$0xff]   ;;  %v6035_v29 = vld [vmem:[%s8878_s7 + $0x78] ss:$8 sps:$4 sm:$0xff]  }
 0x3af   :  { %v2399_v5 = vpop.f32.mrf.mxu1  ;;  %v6032_v7 = vld [vmem:[%s8878_s7 + $0x20] ss:$8 sps:$4 sm:$0xff]  }
 0x3b0   :  { %v2479_v34 = vpack.c.bf16 %v2455_v6, %v2453_v10  ;;  %3234 = vmatpush1.bf16.msra.mxu0 %v6020_v57  ;;  %v2456_v53 = vmax.f32 %v7991_v42, %v2399_v5  ;;  %v6034_v57 = vld [vmem:[%s8878_s7 + $0x24] ss:$8 sps:$4 sm:$0xff]   ;;  %v6040_v6 = vld [vmem:[%s8878_s7 + $0x14] ss:$8 sps:$4 sm:$0xff]   ;;  %v6038_v5 = vld [vmem:[%s8878_s7 + $0x10] ss:$8 sps:$4 sm:$0xff]  }
 0x3b1   :  { %v2401_v3 = vpop.f32.mrf.mxu1  ;;  %v6037_v10 = vld [vmem:[%s8878_s7 + $0x7c] ss:$8 sps:$4 sm:$0xff]  }
 0x3b2   :  { %5465 = vmatprep.mubr.msk.bf16.mxu1 %vm2574_vm5, %v2479_v34  ;;  %5483 = vmatprep.mubr.msk.bf16.mxu0 %vm2574_vm5, %v2479_v34  ;;  %v2457_v33 = vmax.f32 %v7993_v39, %v2401_v3  ;;  %v6043_v34 = vld [vmem:[%s8878_s7 + $0x6c] ss:$8 sps:$4 sm:$0xff]   ;;  %v6041_v3 = vld [vmem:[%s8878_s7 + $0x68] ss:$8 sps:$4 sm:$0xff]  }
 0x3b3   :  { %v2403_v15 = vpop.f32.mrf.mxu1  ;;  %2641 = vmatmul.mubr.bf16.gmra.mxu1 %v2478_v31  ;;  %2817 = vmatmul.mubr.bf16.gmra.mxu0 %v2478_v31  ;;  %v6046_v31 = vld [vmem:[%s8878_s7 + $0x4] ss:$8 sps:$4 sm:$0xff]  }
 0x3b4   :  { %v2458_v20 = vmax.f32 %v7995_v54, %v2403_v15  ;;  %v6044_v15 = vld [vmem:[%s8878_s7] ss:$8 sps:$4 sm:$0xff]  }
 0x3b5   :  { %v2405_v58 = vpop.f32.mrf.mxu1 }
 0x3b6   :  { %v2459_v55 = vmax.f32 %v7997_v21, %v2405_v58  ;;  %v2480_v23 = vpack.c.bf16 %v2458_v20, %v2456_v53  ;;  %v6049_v20 = vld [vmem:[%s8878_s7 + $0x5c] ss:$8 sps:$4 sm:$0xff]   ;;  %v6047_v58 = vld [vmem:[%s8878_s7 + $0x58] ss:$8 sps:$4 sm:$0xff]  }
 0x3b7   :  { %v2409_v11 = vpop.f32.mrf.mxu1  ;;  %v5550_v53 = vld [vmem:[%s8878_s7 + $0x100] sm:$0x33] }
 0x3b8   :  { %v2481_v52 = vpack.c.bf16 %v2459_v55, %v2457_v33  ;;  %v2460_v42 = vmax.f32 %v7999_v17, %v2409_v11  ;;  %v5581_v33 = vld [vmem:[%s8878_s7 + $0x158] sm:$0x33]  ;;  %v5562_v11 = vcombine.high %v5550_v53, %v5550_v53 }
 0x3b9   :  { %v2411_v25 = vpop.f32.mrf.mxu1  ;;  %v5593_v55 = vcombine.high %v5581_v33, %v5581_v33 }
 0x3ba   :  { %5466 = vmatprep.mubr.msk.bf16.mxu1 %vm2574_vm5, %v2481_v52  ;;  %5484 = vmatprep.mubr.msk.bf16.mxu0 %vm2574_vm5, %v2481_v52  ;;  %v2461_v56 = vmax.f32 %v8001_v16, %v2411_v25 }
 0x3bb   :  { %v2413_v43 = vpop.f32.mrf.mxu1  ;;  %2649 = vmatmul.mubr.bf16.gmra.mxu1 %v2480_v23  ;;  %2825 = vmatmul.mubr.bf16.gmra.mxu0 %v2480_v23 }
 0x3bc   :  { %v2462_v2 = vmax.f32 %v8003_v62, %v2413_v43 }
 0x3bd   :  { %v2415_v38 = vpop.f32.mrf.mxu1 }
 0x3be   :  { %v2463_v24 = vmax.f32 %v8005_v48, %v2415_v38  ;;  %v2482_v21 = vpack.c.bf16 %v2462_v2, %v2460_v42 }
 0x3bf   :  { %v2419_v39 = vpop.f32.mrf.mxu1 }
 0x3c0   :  { %v2483_v54 = vpack.c.bf16 %v2463_v24, %v2461_v56  ;;  %v2464_v17 = vmax.f32 %v8007_v63, %v2419_v39 }
 0x3c1   :  { %v2421_v27 = vpop.f32.mrf.mxu1 }
 0x3c2   :  { %5467 = vmatprep.mubr.msk.bf16.mxu1 %vm2574_vm5, %v2483_v54  ;;  %5485 = vmatprep.mubr.msk.bf16.mxu0 %vm2574_vm5, %v2483_v54  ;;  %v2465_v16 = vmax.f32 %v8009_v50, %v2421_v27 }
 0x3c3   :  { %v2423_v8 = vpop.f32.mrf.mxu1  ;;  %2657 = vmatmul.mubr.bf16.gmra.mxu1 %v2482_v21  ;;  %2833 = vmatmul.mubr.bf16.gmra.mxu0 %v2482_v21 }
 0x3c4   :  { %v2466_v62 = vmax.f32 %v8011_v13, %v2423_v8 }
 0x3c5   :  { %v2425_v41 = vpop.f32.mrf.mxu1 }
 0x3c6   :  { %v2467_v48 = vmax.f32 %v8013_v18, %v2425_v41  ;;  %v2484_v45 = vpack.c.bf16 %v2466_v62, %v2464_v17  ;;  %v5592_v41 = vcombine.low %v5581_v33, %v5581_v33 }
 0x3c7   :  { %v2429_v22 = vpop.f32.mrf.mxu1 }
 0x3c8   :  { %v2485_v28 = vpack.c.bf16 %v2467_v48, %v2465_v16  ;;  %v2468_v63 = vmax.f32 %v8015_v46, %v2429_v22 }
 0x3c9   :  { %v2431_v44 = vpop.f32.mrf.mxu1 }
 0x3ca   :  { %5468 = vmatprep.mubr.msk.bf16.mxu1 %vm2574_vm5, %v2485_v28  ;;  %5486 = vmatprep.mubr.msk.bf16.mxu0 %vm2574_vm5, %v2485_v28  ;;  %v2469_v50 = vmax.f32 %v8017_v0, %v2431_v44 }
 0x3cb   :  { %v2433_v9 = vpop.f32.mrf.mxu1  ;;  %2665 = vmatmul.mubr.bf16.gmra.mxu1 %v2484_v45  ;;  %2841 = vmatmul.mubr.bf16.gmra.mxu0 %v2484_v45 }
 0x3cc   :  { %v2470_v13 = vmax.f32 %v8019_v37, %v2433_v9 }
 0x3cd   :  { %v2435_v19 = vpop.f32.mrf.mxu1 }
 0x3ce   :  { %v2471_v18 = vmax.f32 %v8021_v1, %v2435_v19  ;;  %v2486_v12 = vpack.c.bf16 %v2470_v13, %v2468_v63  ;;  %v3686_v13 = vsel %vm3035_vm4, %v5592_v41, 0  ;;  %v5561_v19 = vcombine.low %v5550_v53, %v5550_v53  ;;  %v6071_v53 = vld [vmem:[%s8878_s7 + $0xd4] ss:$8 sps:$4 sm:$0xff]  }
 0x3cf   :  { %v2439_v61 = vpop.f32.mrf.mxu1 }
 0x3d0   :  { %v2487_v26 = vpack.c.bf16 %v2471_v18, %v2469_v50  ;;  %v2472_v46 = vmax.f32 %v8023_v30, %v2439_v61  ;;  %v6028_v30 = vld [vmem:[%s8878_s7 + $0x34] ss:$8 sps:$4 sm:$0xff]  }
 0x3d1   :  { %v2441_v40 = vpop.f32.mrf.mxu1  ;;  %3235 = vmatprep.subr.bf16.mxu0 %v6028_v30  ;;  %v6056_v50 = vld [vmem:[%s8878_s7 + $0x14c] ss:$8 sps:$4 sm:$0xff]  }
 0x3d2   :  { %5469 = vmatprep.mubr.msk.bf16.mxu1 %vm2574_vm5, %v2487_v26  ;;  %5487 = vmatprep.mubr.msk.bf16.mxu0 %vm2574_vm5, %v2487_v26  ;;  %v2473_v0 = vmax.f32 %v8025_v32, %v2441_v40  ;;  %v6025_v32 = vld [vmem:[%s8878_s7 + $0x9c] ss:$8 sps:$4 sm:$0xff]  }
 0x3d3   :  { %v2443_v4 = vpop.f32.mrf.mxu1  ;;  %2673 = vmatmul.mubr.bf16.gmra.mxu1 %v2486_v12  ;;  %2849 = vmatmul.mubr.bf16.gmra.mxu0 %v2486_v12 }
 0x3d4   :  { %v2474_v37 = vmax.f32 %v8027_v35, %v2443_v4  ;;  %v6023_v35 = vld [vmem:[%s8878_s7 + $0x98] ss:$8 sps:$4 sm:$0xff]   ;;  %3048 = vmatprep.subr.bf16.mxu1 %v6025_v32 }
 0x3d5   :  { %v2445_v60 = vpop.f32.mrf.mxu1  ;;  %3049 = vmatpush1.bf16.msra.mxu1 %v6023_v35 }
 0x3d6   :  { %v2475_v1 = vmax.f32 %v8029_v14, %v2445_v60  ;;  %v2488_v51 = vpack.c.bf16 %v2474_v37, %v2472_v46  ;;  %v6026_v14 = vld [vmem:[%s8878_s7 + $0x30] ss:$8 sps:$4 sm:$0xff]   ;;  %3050 = vmatprep.subr.bf16.mxu1 %v6031_v36  ;;  %v3440_v60 = vsel %vm3035_vm4, %v5561_v19, 0 }
 0x3d7   :  { %3236 = vmatpush1.bf16.msra.mxu0 %v6026_v14  ;;  %v8218_v19 = vld [vmem:[%s8878_s7 + $0x1b0] sm:$0x33] }
 0x3d8   :  { %v2489_v59 = vpack.c.bf16 %v2475_v1, %v2473_v0  ;;  %3237 = vmatprep.subr.bf16.mxu0 %v6034_v57  ;;  %v6054_v0 = vld [vmem:[%s8878_s7 + $0x148] ss:$8 sps:$4 sm:$0xff]   ;;  %v6059_v1 = vld [vmem:[%s8878_s7 + $0xf4] ss:$8 sps:$4 sm:$0xff]  }
 0x3d9   :  { %3051 = vmatpush1.bf16.msra.mxu1 %v6029_v47  ;;  %v6057_v57 = vld [vmem:[%s8878_s7 + $0xf0] ss:$8 sps:$4 sm:$0xff]  }
 0x3da   :  { %5470 = vmatprep.mubr.msk.bf16.mxu1 %vm2574_vm5, %v2489_v59  ;;  %5488 = vmatprep.mubr.msk.bf16.mxu0 %vm2574_vm5, %v2489_v59 }
 0x3db   :  { %2681 = vmatmul.mubr.bf16.gmra.mxu1 %v2488_v51  ;;  %2857 = vmatmul.mubr.bf16.gmra.mxu0 %v2488_v51  ;;  %v6062_v51 = vld [vmem:[%s8878_s7 + $0x13c] ss:$8 sps:$4 sm:$0xff]  }
 0x3dc   :  { %3259 = vmatprep.mubr.bf16.mxu0 %v9061_v49  ;;  %3074 = vmatprep.mubr.bf16.mxu1 %v9061_v49 }
 0x3dd   :  { %3238 = vmatpush1.bf16.msra.mxu0 %v6032_v7  ;;  %3052 = vmatprep.subr.bf16.mxu1 %v6037_v10  ;;  %v6060_v7 = vld [vmem:[%s8878_s7 + $0x138] ss:$8 sps:$4 sm:$0xff]   ;;  %v6065_v10 = vld [vmem:[%s8878_s7 + $0xe4] ss:$8 sps:$4 sm:$0xff]  }
 0x3de   :  { %3239 = vmatprep.subr.bf16.mxu0 %v6040_v6  ;;  %3053 = vmatpush1.bf16.msra.mxu1 %v6035_v29 }
 0x3df   :  { %3054 = vmatprep.subr.bf16.mxu1 %v6043_v34 }
 0x3e1   :  { %3240 = vmatpush1.bf16.msra.mxu0 %v6038_v5  ;;  %v6068_v5 = vld [vmem:[%s8878_s7 + $0x12c] ss:$8 sps:$4 sm:$0xff]  }
 0x3e2   :  { %3241 = vmatprep.subr.bf16.mxu0 %v6046_v31  ;;  %3055 = vmatpush1.bf16.msra.mxu1 %v6041_v3 }
 0x3e3   :  { %3056 = vmatprep.subr.bf16.mxu1 %v6049_v20 }
 0x3e5   :  { %3242 = vmatpush1.bf16.msra.mxu0 %v6044_v15 }
 0x3e6   :  { %3057 = vmatpush1.bf16.msra.mxu1 %v6047_v58  ;;  %5594 = vmatprep.subr.msk.bf16.mxu0 %vm3035_vm4, %v5593_v55  ;;  %v6063_v58 = vld [vmem:[%s8878_s7 + $0xe0] ss:$8 sps:$4 sm:$0xff]  }
 0x3e7   :  { %5563 = vmatprep.subr.msk.bf16.mxu1 %vm3035_vm4, %v5562_v11  ;;  %v6066_v55 = vld [vmem:[%s8878_s7 + $0x128] ss:$8 sps:$4 sm:$0xff]  }
 0x46b   :  { %v2634_v52 = vpop.f32.mrf.mxu1  ;;  %v2810_v23 = vpop.f32.mrf.mxu0 }
 0x46c   :  { %v2865_v25 = vmax.f32 %v2634_v52, %v2810_v23  ;;  %v6074_v23 = vld [vmem:[%s8878_s7 + $0x11c] ss:$8 sps:$4 sm:$0xff]  }
 0x46d   :  { %v2636_v43 = vpop.f32.mrf.mxu1  ;;  %v2812_v2 = vpop.f32.mrf.mxu0 }
 0x46e   :  { %2880 = vst.msk [vmem:[#allocation2] sm:$0xff] %vm2879_vm6, %v2865_v25 }
 0x46f   :  { %v2637_v38 = vpop.f32.mrf.mxu1  ;;  %v2813_v56 = vpop.f32.mrf.mxu0 }
 0x470   :  { %v2866_v24 = vmax.f32 %v2637_v38, %v2813_v56 }
 0x471   :  { %v2639_v42 = vpop.f32.mrf.mxu1  ;;  %v2815_v39 = vpop.f32.mrf.mxu0 }
 0x472   :  { %2881 = vst.msk [vmem:[#allocation2 + $0x8] sm:$0xff] %vm2879_vm6, %v2866_v24  ;;  %v6069_v24 = vld [vmem:[%s8878_s7 + $0xd0] ss:$8 sps:$4 sm:$0xff]  }
 0x473   :  { %v2642_v54 = vpop.f32.mrf.mxu1  ;;  %v2818_v21 = vpop.f32.mrf.mxu0  ;;  %v6072_v39 = vld [vmem:[%s8878_s7 + $0x118] ss:$8 sps:$4 sm:$0xff]  }
 0x474   :  { %v2867_v27 = vmax.f32 %v2642_v54, %v2818_v21  ;;  %v6077_v54 = vld [vmem:[%s8878_s7 + $0xc4] ss:$8 sps:$4 sm:$0xff]  }
 0x475   :  { %v2644_v8 = vpop.f32.mrf.mxu1  ;;  %v2820_v62 = vpop.f32.mrf.mxu0  ;;  %v2894_v45 = vld [vmem:[#allocation2] sm:$0xff] }
 0x476   :  { %2882 = vst.msk [vmem:[#allocation2 + $0x10] sm:$0xff] %vm2879_vm6, %v2867_v27  ;;  %v6080_v8 = vld [vmem:[%s8878_s7 + $0x10c] ss:$8 sps:$4 sm:$0xff]  }
 0x477   :  { %v2645_v16 = vpop.f32.mrf.mxu1  ;;  %v2821_v48 = vpop.f32.mrf.mxu0 }
 0x478   :  { %v2868_v17 = vmax.f32 %v2645_v16, %v2821_v48 }
 0x479   :  { %v2647_v22 = vpop.f32.mrf.mxu1  ;;  %v2823_v28 = vpop.f32.mrf.mxu0  ;;  %v2895_v44 = vld [vmem:[#allocation2 + $0x8] sm:$0xff] }
 0x47a   :  { %2883 = vst.msk [vmem:[#allocation2 + $0x18] sm:$0xff] %vm2879_vm6, %v2868_v17  ;;  %v2908_v9 = vpack.c.bf16 %v2895_v44, %v2894_v45  ;;  %v2926_v40 = vld [vmem:[#allocation2 + $0x1] sm:$0xff]  ;;  %v6083_v44 = vld [vmem:[%s8878_s7 + $0xb4] ss:$8 sps:$4 sm:$0xff]  }
 0x47b   :  { %v2650_v18 = vpop.f32.mrf.mxu1  ;;  %v2826_v63 = vpop.f32.mrf.mxu0  ;;  %v6075_v22 = vld [vmem:[%s8878_s7 + $0xc0] ss:$8 sps:$4 sm:$0xff]  }
 0x47c   :  { %v2869_v61 = vmax.f32 %v2650_v18, %v2826_v63  ;;  %5533 = vmatmul.mubr.msk.bf16.vlgmr.msra.gmra.mxu0 %vm2879_vm6, %v2908_v9  ;;  %v6078_v45 = vld [vmem:[%s8878_s7 + $0x108] ss:$8 sps:$4 sm:$0xff]  }
 0x47d   :  { %v2652_v26 = vpop.f32.mrf.mxu1  ;;  %v2828_v12 = vpop.f32.mrf.mxu0  ;;  %v2927_v4 = vld [vmem:[#allocation2 + $0x9] sm:$0xff]  ;;  %3269 = vmatprep.mubr.bf16.mxu0 %v9061_v49  ;;  %3696 = vmatpush1.bf16.msra.mxu0 %v3686_v13 }
 0x47e   :  { %2884 = vst.msk [vmem:[#allocation2 + $0x20] sm:$0xff] %vm2879_vm6, %v2869_v61  ;;  %v2940_v37 = vpack.c.bf16 %v2927_v4, %v2926_v40  ;;  %3697 = vmatprep.subr.bf16.mxu0 %v6056_v50  ;;  %v2896_v14 = vld [vmem:[#allocation2 + $0x10] sm:$0xff]  ;;  %v5624_v4 = vcombine.high %v8218_v19, %v8218_v19 }
 0x47f   :  { %v2653_v46 = vpop.f32.mrf.mxu1  ;;  %v2829_v59 = vpop.f32.mrf.mxu0  ;;  %v6081_v12 = vld [vmem:[%s8878_s7 + $0xb0] ss:$8 sps:$4 sm:$0xff]  }
 0x480   :  { %v2870_v32 = vmax.f32 %v2653_v46, %v2829_v59  ;;  %5513 = vmatmul.mubr.msk.bf16.vlgmr.msra.gmra.mxu1 %vm2879_vm6, %v2940_v37 }
 0x481   :  { %v2655_v30 = vpop.f32.mrf.mxu1  ;;  %v2831_v35 = vpop.f32.mrf.mxu0  ;;  %v2897_v36 = vld [vmem:[#allocation2 + $0x18] sm:$0xff]  ;;  %3084 = vmatprep.mubr.bf16.mxu1 %v9061_v49  ;;  %3450 = vmatpush1.bf16.msra.mxu1 %v3440_v60 }
 0x482   :  { %2885 = vst.msk [vmem:[#allocation2 + $0x28] sm:$0xff] %vm2879_vm6, %v2870_v32  ;;  %v2909_v47 = vpack.c.bf16 %v2897_v36, %v2896_v14  ;;  %3698 = vmatpush1.bf16.msra.mxu0 %v6054_v0  ;;  %3451 = vmatprep.subr.bf16.mxu1 %v6059_v1  ;;  %v2928_v15 = vld [vmem:[#allocation2 + $0x11] sm:$0xff] }
 0x483   :  { %v2658_v6 = vpop.f32.mrf.mxu1  ;;  %v2834_v29 = vpop.f32.mrf.mxu0  ;;  %3699 = vmatprep.subr.bf16.mxu0 %v6062_v51 }
 0x484   :  { %v2871_v34 = vmax.f32 %v2658_v6, %v2834_v29  ;;  %5534 = vmatmul.mubr.msk.bf16.gmra.mxu0 %vm2879_vm6, %v2909_v47 }
 0x485   :  { %v2660_v31 = vpop.f32.mrf.mxu1  ;;  %v2836_v3 = vpop.f32.mrf.mxu0  ;;  %v2929_v20 = vld [vmem:[#allocation2 + $0x19] sm:$0xff]  ;;  %3279 = vmatprep.mubr.bf16.mxu0 %v9061_v49  ;;  %3452 = vmatpush1.bf16.msra.mxu1 %v6057_v57 }
 0x486   :  { %2886 = vst.msk [vmem:[#allocation2 + $0x30] sm:$0xff] %vm2879_vm6, %v2871_v34  ;;  %v2941_v33 = vpack.c.bf16 %v2929_v20, %v2928_v15  ;;  %3700 = vmatpush1.bf16.msra.mxu0 %v6060_v7  ;;  %3453 = vmatprep.subr.bf16.mxu1 %v6065_v10  ;;  %v2898_v38 = vld [vmem:[#allocation2 + $0x20] sm:$0xff] }
 0x487   :  { %v2661_v11 = vpop.f32.mrf.mxu1  ;;  %v2837_v52 = vpop.f32.mrf.mxu0  ;;  %3701 = vmatprep.subr.bf16.mxu0 %v6068_v5 }
 0x488   :  { %v2872_v25 = vmax.f32 %v2661_v11, %v2837_v52  ;;  %5514 = vmatmul.mubr.msk.bf16.gmra.mxu1 %vm2879_vm6, %v2941_v33 }
 0x489   :  { %v2663_v43 = vpop.f32.mrf.mxu1  ;;  %v2839_v2 = vpop.f32.mrf.mxu0  ;;  %v2899_v56 = vld [vmem:[#allocation2 + $0x28] sm:$0xff]  ;;  %3094 = vmatprep.mubr.bf16.mxu1 %v9061_v49  ;;  %3454 = vmatpush1.bf16.msra.mxu1 %v6063_v58 }
 0x48a   :  { %2887 = vst.msk [vmem:[#allocation2 + $0x38] sm:$0xff] %vm2879_vm6, %v2872_v25  ;;  %v2910_v42 = vpack.c.bf16 %v2899_v56, %v2898_v38  ;;  %3702 = vmatpush1.bf16.msra.mxu0 %v6066_v55  ;;  %3455 = vmatprep.subr.bf16.mxu1 %v6071_v53  ;;  %v2930_v48 = vld [vmem:[#allocation2 + $0x21] sm:$0xff] }
 0x48b   :  { %v2666_v21 = vpop.f32.mrf.mxu1  ;;  %v2842_v27 = vpop.f32.mrf.mxu0  ;;  %3703 = vmatprep.subr.bf16.mxu0 %v6074_v23 }
 0x48c   :  { %v2873_v62 = vmax.f32 %v2666_v21, %v2842_v27  ;;  %5535 = vmatmul.mubr.msk.bf16.gmra.mxu0 %vm2879_vm6, %v2910_v42  ;;  %v3577_v27 = vld [vmem:[#allocation2 + $0xb] sm:$0xff] }
 0x48d   :  { %v2668_v41 = vpop.f32.mrf.mxu1  ;;  %v2844_v16 = vpop.f32.mrf.mxu0  ;;  %v2931_v17 = vld [vmem:[#allocation2 + $0x29] sm:$0xff]  ;;  %3289 = vmatprep.mubr.bf16.mxu0 %v9061_v49  ;;  %3456 = vmatpush1.bf16.msra.mxu1 %v6069_v24 }
 0x48e   :  { %2888 = vst.msk [vmem:[#allocation2 + $0x40] sm:$0xff] %vm2879_vm6, %v2873_v62  ;;  %v2942_v28 = vpack.c.bf16 %v2931_v17, %v2930_v48  ;;  %3704 = vmatpush1.bf16.msra.mxu0 %v6072_v39  ;;  %3457 = vmatprep.subr.bf16.mxu1 %v6077_v54  ;;  %v2900_v61 = vld [vmem:[#allocation2 + $0x30] sm:$0xff]  ;;  %v5623_v41 = vcombine.low %v8218_v19, %v8218_v19  ;;  %v3330_v48 = vld [vmem:[#allocation2 + $0x2] sm:$0xff] }
 0x48f   :  { %v2669_v9 = vpop.f32.mrf.mxu1  ;;  %v2845_v13 = vpop.f32.mrf.mxu0  ;;  %3705 = vmatprep.subr.bf16.mxu0 %v6080_v8  ;;  %v3576_v8 = vld [vmem:[#allocation2 + $0x3] sm:$0xff]  ;;  %v6091_v19 = vld [vmem:[%s8878_s7 + $0x194] ss:$8 sps:$4 sm:$0xff]  }
 0x490   :  { %v2874_v50 = vmax.f32 %v2669_v9, %v2845_v13  ;;  %5515 = vmatmul.mubr.msk.bf16.gmra.mxu1 %vm2879_vm6, %v2942_v28  ;;  %v3590_v62 = vpack.c.bf16 %v3577_v27, %v3576_v8  ;;  %v3331_v16 = vld [vmem:[#allocation2 + $0xa] sm:$0xff] }
 0x491   :  { %v2671_v18 = vpop.f32.mrf.mxu1  ;;  %v2847_v63 = vpop.f32.mrf.mxu0  ;;  %v2901_v26 = vld [vmem:[#allocation2 + $0x38] sm:$0xff]  ;;  %3104 = vmatprep.mubr.bf16.mxu1 %v9061_v49  ;;  %3458 = vmatpush1.bf16.msra.mxu1 %v6075_v22  ;;  %v3344_v17 = vpack.c.bf16 %v3331_v16, %v3330_v48  ;;  %v3932_v22 = vsel %vm3035_vm4, %v5623_v41, 0  ;;  %v6088_v28 = vld [vmem:[%s8878_s7 + $0x1a4] ss:$8 sps:$4 sm:$0xff]   ;;  %v6086_v9 = vld [vmem:[%s8878_s7 + $0x1a0] ss:$8 sps:$4 sm:$0xff]  }
 0x492   :  { %2889 = vst.msk [vmem:[#allocation2 + $0x48] sm:$0xff] %vm2879_vm6, %v2874_v50  ;;  %v2911_v40 = vpack.c.bf16 %v2901_v26, %v2900_v61  ;;  %3706 = vmatpush1.bf16.msra.mxu0 %v6078_v45  ;;  %3459 = vmatprep.subr.bf16.mxu1 %v6083_v44  ;;  %v2932_v59 = vld [vmem:[#allocation2 + $0x31] sm:$0xff]  ;;  %v3579_v45 = vld [vmem:[#allocation2 + $0x1b] sm:$0xff]  ;;  %v6094_v26 = vld [vmem:[%s8878_s7 + $0x184] ss:$8 sps:$4 sm:$0xff]  }
 0x493   :  { %v2674_v37 = vpop.f32.mrf.mxu1  ;;  %v2850_v60 = vpop.f32.mrf.mxu0  ;;  %v3578_v44 = vld [vmem:[#allocation2 + $0x13] sm:$0xff] }
 0x494   :  { %v2875_v0 = vmax.f32 %v2674_v37, %v2850_v60  ;;  %5536 = vmatmul.mubr.msk.bf16.gmra.mxu0 %vm2879_vm6, %v2911_v40  ;;  %v3591_v13 = vpack.c.bf16 %v3579_v45, %v3578_v44  ;;  %v3333_v50 = vld [vmem:[#allocation2 + $0x1a] sm:$0xff]  ;;  %v3332_v18 = vld [vmem:[#allocation2 + $0x12] sm:$0xff]  ;;  %v3580_v40 = vld [vmem:[#allocation2 + $0x23] sm:$0xff] }
 0x495   :  { %v2676_v1 = vpop.f32.mrf.mxu1  ;;  %v2852_v46 = vpop.f32.mrf.mxu0  ;;  %v2933_v51 = vld [vmem:[#allocation2 + $0x39] sm:$0xff]  ;;  %3299 = vmatprep.mubr.bf16.mxu0 %v9061_v49  ;;  %3460 = vmatpush1.bf16.msra.mxu1 %v6081_v12  ;;  %v3345_v61 = vpack.c.bf16 %v3333_v50, %v3332_v18  ;;  %v3581_v12 = vld [vmem:[#allocation2 + $0x2b] sm:$0xff] }
 0x496   :  { %2890 = vst.msk [vmem:[#allocation2 + $0x50] sm:$0xff] %vm2879_vm6, %v2875_v0  ;;  %v2943_v32 = vpack.c.bf16 %v2933_v51, %v2932_v59  ;;  %5625 = vmatprep.subr.msk.bf16.mxu1 %vm3035_vm4, %v5624_v4  ;;  %v2902_v47 = vld [vmem:[#allocation2 + $0x40] sm:$0xff]  ;;  %v6089_v63 = vld [vmem:[%s8878_s7 + $0x190] ss:$8 sps:$4 sm:$0xff]   ;;  %v3592_v37 = vpack.c.bf16 %v3581_v12, %v3580_v40  ;;  %v6097_v60 = vld [vmem:[%s8878_s7 + $0x174] ss:$8 sps:$4 sm:$0xff]  }
 0x497   :  { %v2677_v30 = vpop.f32.mrf.mxu1  ;;  %v2853_v35 = vpop.f32.mrf.mxu0  ;;  %v6092_v4 = vld [vmem:[%s8878_s7 + $0x180] ss:$8 sps:$4 sm:$0xff]   ;;  %v6095_v46 = vld [vmem:[%s8878_s7 + $0x170] ss:$8 sps:$4 sm:$0xff]   ;;  %v6100_v51 = vld [vmem:[%s8878_s7 + $0x164] ss:$8 sps:$4 sm:$0xff]  }
 0x498   :  { %v2876_v14 = vmax.f32 %v2677_v30, %v2853_v35  ;;  %5516 = vmatmul.mubr.msk.bf16.gmra.mxu1 %vm2879_vm6, %v2943_v32  ;;  %v3335_v0 = vld [vmem:[#allocation2 + $0x2a] sm:$0xff]  ;;  %v3334_v1 = vld [vmem:[#allocation2 + $0x22] sm:$0xff]  ;;  %v3582_v30 = vld [vmem:[#allocation2 + $0x33] sm:$0xff] }
 0x499   :  { %v2679_v36 = vpop.f32.mrf.mxu1  ;;  %v2855_v57 = vpop.f32.mrf.mxu0  ;;  %v2903_v7 = vld [vmem:[#allocation2 + $0x48] sm:$0xff]  ;;  %3114 = vmatprep.mubr.bf16.mxu1 %v9061_v49  ;;  %v3346_v59 = vpack.c.bf16 %v3335_v0, %v3334_v1  ;;  %v3583_v32 = vld [vmem:[#allocation2 + $0x3b] sm:$0xff] }
 0x49a   :  { %2891 = vst.msk [vmem:[#allocation2 + $0x58] sm:$0xff] %vm2879_vm6, %v2876_v14  ;;  %v2912_v10 = vpack.c.bf16 %v2903_v7, %v2902_v47  ;;  %v2934_v3 = vld [vmem:[#allocation2 + $0x41] sm:$0xff]  ;;  %v3593_v14 = vpack.c.bf16 %v3583_v32, %v3582_v30  ;;  %v3336_v57 = vld [vmem:[#allocation2 + $0x32] sm:$0xff] }
 0x49b   :  { %v2682_v6 = vpop.f32.mrf.mxu1  ;;  %v2858_v29 = vpop.f32.mrf.mxu0  ;;  %v6098_v35 = vld [vmem:[%s8878_s7 + $0x160] ss:$8 sps:$4 sm:$0xff]   ;;  %v3828_v8 = vld [vmem:[#allocation2 + $0x34] sm:$0xff] }
 0x49c   :  { %v2877_v5 = vmax.f32 %v2682_v6, %v2858_v29  ;;  %5537 = vmatmul.mubr.msk.bf16.gmra.mxu0 %vm2879_vm6, %v2912_v10  ;;  %v3337_v36 = vld [vmem:[#allocation2 + $0x3a] sm:$0xff]  ;;  %v3584_v10 = vld [vmem:[#allocation2 + $0x43] sm:$0xff] }
 0x49d   :  { %v2684_v34 = vpop.f32.mrf.mxu1  ;;  %v2860_v31 = vpop.f32.mrf.mxu0  ;;  %v2935_v15 = vld [vmem:[#allocation2 + $0x49] sm:$0xff]  ;;  %3309 = vmatprep.mubr.bf16.mxu0 %v9061_v49  ;;  %v3347_v47 = vpack.c.bf16 %v3337_v36, %v3336_v57  ;;  %v3829_v27 = vld [vmem:[#allocation2 + $0x3c] sm:$0xff] }
 0x49e   :  { %2892 = vst.msk [vmem:[#allocation2 + $0x60] sm:$0xff] %vm2879_vm6, %v2877_v5  ;;  %v2944_v20 = vpack.c.bf16 %v2935_v15, %v2934_v3  ;;  %v2904_v52 = vld [vmem:[#allocation2 + $0x50] sm:$0xff]  ;;  %v3338_v5 = vld [vmem:[#allocation2 + $0x42] sm:$0xff] }
 0x49f   :  { %v2685_v58 = vpop.f32.mrf.mxu1  ;;  %v2861_v33 = vpop.f32.mrf.mxu0  ;;  %v3585_v7 = vld [vmem:[#allocation2 + $0x4b] sm:$0xff] }
 0x4a0   :  { %v2878_v55 = vmax.f32 %v2685_v58, %v2861_v33  ;;  %5517 = vmatmul.mubr.msk.bf16.gmra.mxu1 %vm2879_vm6, %v2944_v20  ;;  %v3594_v6 = vpack.c.bf16 %v3585_v7, %v3584_v10  ;;  %v3339_v29 = vld [vmem:[#allocation2 + $0x4a] sm:$0xff] }
 0x4a1   :  { %v2687_v53 = vpop.f32.mrf.mxu1  ;;  %v2863_v11 = vpop.f32.mrf.mxu0  ;;  %v2905_v23 = vld [vmem:[#allocation2 + $0x58] sm:$0xff]  ;;  %3124 = vmatprep.mubr.bf16.mxu1 %v9061_v49  ;;  %v3348_v34 = vpack.c.bf16 %v3339_v29, %v3338_v5  ;;  %v3831_v41 = vld [vmem:[#allocation2 + $0x4c] sm:$0xff]  ;;  %v3830_v16 = vld [vmem:[#allocation2 + $0x44] sm:$0xff] }
 0x4a2   :  { %2893 = vst.msk [vmem:[#allocation2 + $0x68] sm:$0xff] %vm2879_vm6, %v2878_v55  ;;  %v2913_v25 = vpack.c.bf16 %v2905_v23, %v2904_v52  ;;  %v2936_v43 = vld [vmem:[#allocation2 + $0x51] sm:$0xff]  ;;  %v3840_v48 = vpack.c.bf16 %v3831_v41, %v3830_v16 }
 0x4a3   :  { %v3586_v3 = vld [vmem:[#allocation2 + $0x53] sm:$0xff] }
 0x4a4   :  { %5538 = vmatmul.mubr.msk.bf16.gmra.mxu0 %vm2879_vm6, %v2913_v25  ;;  %v3340_v58 = vld [vmem:[#allocation2 + $0x52] sm:$0xff] }
 0x4a5   :  { %v2937_v2 = vld [vmem:[#allocation2 + $0x59] sm:$0xff]  ;;  %3319 = vmatprep.mubr.bf16.mxu0 %v9061_v49 }
 0x4a6   :  { %v2945_v38 = vpack.c.bf16 %v2937_v2, %v2936_v43  ;;  %v2906_v56 = vld [vmem:[#allocation2 + $0x60] sm:$0xff]  ;;  %v3823_v43 = vld [vmem:[#allocation2 + $0xc] sm:$0xff] }
 0x4a7   :  { %v3587_v31 = vld [vmem:[#allocation2 + $0x5b] sm:$0xff]  ;;  %v3822_v2 = vld [vmem:[#allocation2 + $0x4] sm:$0xff] }
 0x4a8   :  { %5518 = vmatmul.mubr.msk.bf16.gmra.mxu1 %vm2879_vm6, %v2945_v38  ;;  %v3595_v15 = vpack.c.bf16 %v3587_v31, %v3586_v3  ;;  %v3341_v20 = vld [vmem:[#allocation2 + $0x5a] sm:$0xff]  ;;  %v3836_v38 = vpack.c.bf16 %v3823_v43, %v3822_v2 }
 0x4a9   :  { %v2907_v24 = vld [vmem:[#allocation2 + $0x68] sm:$0xf]  ;;  %3134 = vmatprep.mubr.bf16.mxu1 %v9061_v49  ;;  %v3349_v33 = vpack.c.bf16 %v3341_v20, %v3340_v58  ;;  %v3835_v44 = vld [vmem:[#allocation2 + $0x6c] sm:$0xf] }
 0x4aa   :  { %v2914_v42 = vpack.c.bf16 %v2907_v24, %v2906_v56  ;;  %v2938_v39 = vld [vmem:[#allocation2 + $0x61] sm:$0xff]  ;;  %v2939_v54 = vld [vmem:[#allocation2 + $0x69] sm:$0xf]  ;;  %v3824_v24 = vld [vmem:[#allocation2 + $0x14] sm:$0xff] }
 0x4ab   :  { %v2946_v21 = vpack.c.bf16 %v2939_v54, %v2938_v39  ;;  %v3588_v55 = vld [vmem:[#allocation2 + $0x63] sm:$0xff]  ;;  %v3589_v53 = vld [vmem:[#allocation2 + $0x6b] sm:$0xf] }
 0x4ac   :  { %5539 = vmatmul.mubr.msk.bf16.gmra.mxu0 %vm2879_vm6, %v2914_v42  ;;  %v3596_v11 = vpack.c.bf16 %v3589_v53, %v3588_v55  ;;  %v3342_v52 = vld [vmem:[#allocation2 + $0x62] sm:$0xff]  ;;  %v3343_v23 = vld [vmem:[#allocation2 + $0x6a] sm:$0xf] }
 0x4ad   :  { %3723 = vmatprep.mubr.bf16.mxu0 %v9061_v49  ;;  %v3350_v25 = vpack.c.bf16 %v3343_v23, %v3342_v52  ;;  %v3825_v56 = vld [vmem:[#allocation2 + $0x1c] sm:$0xff]  ;;  %v3827_v39 = vld [vmem:[#allocation2 + $0x2c] sm:$0xff]  ;;  %v3826_v54 = vld [vmem:[#allocation2 + $0x24] sm:$0xff] }
 0x4ae   :  { %v3837_v42 = vpack.c.bf16 %v3825_v56, %v3824_v24  ;;  %v3834_v45 = vld [vmem:[#allocation2 + $0x64] sm:$0xff] }
 0x4b0   :  { %5519 = vmatmul.mubr.msk.bf16.gmra.mxu1 %vm2879_vm6, %v2946_v21  ;;  %v3838_v21 = vpack.c.bf16 %v3827_v39, %v3826_v54 }
 0x4b1   :  { %3477 = vmatprep.mubr.bf16.mxu1 %v9061_v49 }
 0x4b4   :  { %5595 = vmatmul.mubr.msk.bf16.vlgmr.msra.gmra.mxu0 %vm2879_vm6, %v3590_v62  ;;  %v3839_v62 = vpack.c.bf16 %v3829_v27, %v3828_v8 }
 0x4b5   :  { %3733 = vmatprep.mubr.bf16.mxu0 %v9061_v49 }
 0x4b8   :  { %5564 = vmatmul.mubr.msk.bf16.vlgmr.msra.gmra.mxu1 %vm2879_vm6, %v3344_v17  ;;  %v3833_v17 = vld [vmem:[#allocation2 + $0x5c] sm:$0xff] }
 0x4b9   :  { %3487 = vmatprep.mubr.bf16.mxu1 %v9061_v49  ;;  %3942 = vmatpush1.bf16.msra.mxu1 %v3932_v22  ;;  %v3832_v22 = vld [vmem:[#allocation2 + $0x54] sm:$0xff] }
 0x4ba   :  { %3943 = vmatprep.subr.bf16.mxu1 %v6088_v28  ;;  %v3841_v28 = vpack.c.bf16 %v3833_v17, %v3832_v22 }
 0x4bc   :  { %5596 = vmatmul.mubr.msk.bf16.gmra.mxu0 %vm2879_vm6, %v3591_v13 }
 0x4bd   :  { %3743 = vmatprep.mubr.bf16.mxu0 %v9061_v49  ;;  %3944 = vmatpush1.bf16.msra.mxu1 %v6086_v9  ;;  %v3842_v9 = vpack.c.bf16 %v3835_v44, %v3834_v45 }
 0x4be   :  { %3945 = vmatprep.subr.bf16.mxu1 %v6091_v19 }
 0x4c0   :  { %5565 = vmatmul.mubr.msk.bf16.gmra.mxu1 %vm2879_vm6, %v3345_v61 }
 0x4c1   :  { %3497 = vmatprep.mubr.bf16.mxu1 %v9061_v49  ;;  %3946 = vmatpush1.bf16.msra.mxu1 %v6089_v63 }
 0x4c2   :  { %3947 = vmatprep.subr.bf16.mxu1 %v6094_v26 }
 0x4c4   :  { %5597 = vmatmul.mubr.msk.bf16.gmra.mxu0 %vm2879_vm6, %v3592_v37 }
 0x4c5   :  { %3753 = vmatprep.mubr.bf16.mxu0 %v9061_v49  ;;  %3948 = vmatpush1.bf16.msra.mxu1 %v6092_v4 }
 0x4c6   :  { %3949 = vmatprep.subr.bf16.mxu1 %v6097_v60 }
 0x4c8   :  { %5566 = vmatmul.mubr.msk.bf16.gmra.mxu1 %vm2879_vm6, %v3346_v59 }
 0x4c9   :  { %3507 = vmatprep.mubr.bf16.mxu1 %v9061_v49  ;;  %3950 = vmatpush1.bf16.msra.mxu1 %v6095_v46 }
 0x4ca   :  { %3951 = vmatprep.subr.bf16.mxu1 %v6100_v51 }
 0x4cc   :  { %5598 = vmatmul.mubr.msk.bf16.gmra.mxu0 %vm2879_vm6, %v3593_v14 }
 0x4cd   :  { %3763 = vmatprep.mubr.bf16.mxu0 %v9061_v49  ;;  %3952 = vmatpush1.bf16.msra.mxu1 %v6098_v35 }
 0x4ce   :  { %4438 = vmatprep.subr.bf16.mxu1 %v9061_v49 }
 0x4d0   :  { %5567 = vmatmul.mubr.msk.bf16.gmra.mxu1 %vm2879_vm6, %v3347_v47 }
 0x4d1   :  { %3517 = vmatprep.mubr.bf16.mxu1 %v9061_v49 }
 0x4d4   :  { %5599 = vmatmul.mubr.msk.bf16.gmra.mxu0 %vm2879_vm6, %v3594_v6 }
 0x4d5   :  { %3773 = vmatprep.mubr.bf16.mxu0 %v9061_v49 }
 0x4d8   :  { %5568 = vmatmul.mubr.msk.bf16.gmra.mxu1 %vm2879_vm6, %v3348_v34 }
 0x4d9   :  { %3527 = vmatprep.mubr.bf16.mxu1 %v9061_v49 }
 0x4dc   :  { %5600 = vmatmul.mubr.msk.bf16.gmra.mxu0 %vm2879_vm6, %v3595_v15 }
 0x4dd   :  { %3783 = vmatprep.mubr.bf16.mxu0 %v9061_v49 }
 0x4e0   :  { %5569 = vmatmul.mubr.msk.bf16.gmra.mxu1 %vm2879_vm6, %v3349_v33 }
 0x4e1   :  { %3537 = vmatprep.mubr.bf16.mxu1 %v9061_v49 }
 0x4e4   :  { %5601 = vmatmul.mubr.msk.bf16.gmra.mxu0 %vm2879_vm6, %v3596_v11 }
 0x4e5   :  { %4216 = vmatprep.mubr.bf16.mxu0 %v9061_v49 }
 0x4e8   :  { %5570 = vmatmul.mubr.msk.bf16.gmra.mxu1 %vm2879_vm6, %v3350_v25 }
 0x4e9   :  { %3969 = vmatprep.mubr.bf16.mxu1 %v9061_v49 }
 0x4f0   :  { %5626 = vmatmul.mubr.msk.bf16.vlgmr.msra.gmra.mxu1 %vm2879_vm6, %v3836_v38 }
 0x4f1   :  { %3979 = vmatprep.mubr.bf16.mxu1 %v9061_v49 }
 0x4f8   :  { %5627 = vmatmul.mubr.msk.bf16.gmra.mxu1 %vm2879_vm6, %v3837_v42 }
 0x4f9   :  { %3989 = vmatprep.mubr.bf16.mxu1 %v9061_v49 }
 0x500   :  { %5628 = vmatmul.mubr.msk.bf16.gmra.mxu1 %vm2879_vm6, %v3838_v21 }
 0x501   :  { %3999 = vmatprep.mubr.bf16.mxu1 %v9061_v49 }
 0x508   :  { %5629 = vmatmul.mubr.msk.bf16.gmra.mxu1 %vm2879_vm6, %v3839_v62 }
 0x509   :  { %4009 = vmatprep.mubr.bf16.mxu1 %v9061_v49 }
 0x510   :  { %5630 = vmatmul.mubr.msk.bf16.gmra.mxu1 %vm2879_vm6, %v3840_v48 }
 0x511   :  { %4019 = vmatprep.mubr.bf16.mxu1 %v9061_v49 }
 0x518   :  { %5631 = vmatmul.mubr.msk.bf16.gmra.mxu1 %vm2879_vm6, %v3841_v28 }
 0x519   :  { %4029 = vmatprep.mubr.bf16.mxu1 %v9061_v49 }
 0x520   :  { %5632 = vmatmul.mubr.msk.bf16.gmra.mxu1 %vm2879_vm6, %v3842_v9 }
 0x53c   :  { %v3261_v13 = vpop.f32.mrf.mxu0 }
 0x53e   :  { %v3263_v19 = vpop.f32.mrf.mxu0 }
 0x540   :  { %v3076_v50 = vpop.f32.mrf.mxu1  ;;  %v3265_v18 = vpop.f32.mrf.mxu0 }
 0x541   :  { %v8324_v63 = vadd.f32 %v3261_v13, %v3076_v50 }
 0x542   :  { %v3078_v61 = vpop.f32.mrf.mxu1  ;;  %v3267_v26 = vpop.f32.mrf.mxu0 }
 0x543   :  { %v8326_v12 = vadd.f32 %v3263_v19, %v3078_v61 }
 0x544   :  { %v3080_v40 = vpop.f32.mrf.mxu1  ;;  %v3271_v4 = vpop.f32.mrf.mxu0 }
 0x545   :  { %v8328_v37 = vadd.f32 %v3265_v18, %v3080_v40 }
 0x546   :  { %v3082_v60 = vpop.f32.mrf.mxu1  ;;  %v3273_v0 = vpop.f32.mrf.mxu0 }
 0x547   :  { %v8330_v1 = vadd.f32 %v3267_v26, %v3082_v60 }
 0x548   :  { %v3086_v46 = vpop.f32.mrf.mxu1  ;;  %v3275_v59 = vpop.f32.mrf.mxu0 }
 0x549   :  { %v8332_v51 = vadd.f32 %v3271_v4, %v3086_v46 }
 0x54a   :  { %v3088_v32 = vpop.f32.mrf.mxu1  ;;  %v3277_v30 = vpop.f32.mrf.mxu0 }
 0x54b   :  { %v8334_v35 = vadd.f32 %v3273_v0, %v3088_v32 }
 0x54c   :  { %v3090_v14 = vpop.f32.mrf.mxu1  ;;  %v3281_v36 = vpop.f32.mrf.mxu0 }
 0x54d   :  { %v8336_v57 = vadd.f32 %v3275_v59, %v3090_v14 }
 0x54e   :  { %v3092_v47 = vpop.f32.mrf.mxu1  ;;  %v3283_v7 = vpop.f32.mrf.mxu0 }
 0x54f   :  { %v8338_v10 = vadd.f32 %v3277_v30, %v3092_v47 }
 0x550   :  { %v3096_v6 = vpop.f32.mrf.mxu1  ;;  %v3285_v29 = vpop.f32.mrf.mxu0 }
 0x551   :  { %v8340_v5 = vadd.f32 %v3281_v36, %v3096_v6 }
 0x552   :  { %v3098_v34 = vpop.f32.mrf.mxu1  ;;  %v3287_v31 = vpop.f32.mrf.mxu0 }
 0x553   :  { %v8342_v3 = vadd.f32 %v3283_v7, %v3098_v34 }
 0x554   :  { %v3100_v15 = vpop.f32.mrf.mxu1  ;;  %v3291_v20 = vpop.f32.mrf.mxu0 }
 0x555   :  { %v8344_v58 = vadd.f32 %v3285_v29, %v3100_v15 }
 0x556   :  { %v3102_v33 = vpop.f32.mrf.mxu1  ;;  %v3293_v55 = vpop.f32.mrf.mxu0 }
 0x557   :  { %v8346_v53 = vadd.f32 %v3287_v31, %v3102_v33 }
 0x558   :  { %v3106_v11 = vpop.f32.mrf.mxu1  ;;  %v3295_v52 = vpop.f32.mrf.mxu0 }
 0x559   :  { %v8348_v23 = vadd.f32 %v3291_v20, %v3106_v11 }
 0x55a   :  { %v3108_v25 = vpop.f32.mrf.mxu1  ;;  %v3297_v43 = vpop.f32.mrf.mxu0 }
 0x55b   :  { %v8350_v2 = vadd.f32 %v3293_v55, %v3108_v25 }
 0x55c   :  { %v3110_v38 = vpop.f32.mrf.mxu1  ;;  %v3301_v56 = vpop.f32.mrf.mxu0 }
 0x55d   :  { %v8352_v24 = vadd.f32 %v3295_v52, %v3110_v38 }
 0x55e   :  { %v3112_v42 = vpop.f32.mrf.mxu1  ;;  %v3303_v39 = vpop.f32.mrf.mxu0 }
 0x55f   :  { %v8354_v54 = vadd.f32 %v3297_v43, %v3112_v42 }
 0x560   :  { %v3116_v21 = vpop.f32.mrf.mxu1  ;;  %v3305_v27 = vpop.f32.mrf.mxu0 }
 0x561   :  { %v8356_v8 = vadd.f32 %v3301_v56, %v3116_v21 }
 0x562   :  { %v3118_v62 = vpop.f32.mrf.mxu1  ;;  %v3307_v41 = vpop.f32.mrf.mxu0 }
 0x563   :  { %v8358_v16 = vadd.f32 %v3303_v39, %v3118_v62 }
 0x564   :  { %v3120_v48 = vpop.f32.mrf.mxu1  ;;  %v3311_v17 = vpop.f32.mrf.mxu0 }
 0x565   :  { %v8360_v22 = vadd.f32 %v3305_v27, %v3120_v48 }
 0x566   :  { %v3122_v28 = vpop.f32.mrf.mxu1  ;;  %v3313_v45 = vpop.f32.mrf.mxu0 }
 0x567   :  { %v8362_v44 = vadd.f32 %v3307_v41, %v3122_v28 }
 0x568   :  { %v3126_v9 = vpop.f32.mrf.mxu1  ;;  %v3315_v13 = vpop.f32.mrf.mxu0 }
 0x569   :  { %v8364_v19 = vadd.f32 %v3311_v17, %v3126_v9 }
 0x56a   :  { %v3128_v50 = vpop.f32.mrf.mxu1  ;;  %v8366_v18 = vpop.f32.mrf.mxu0 }
 0x56b   :  { %v8368_v61 = vadd.f32 %v3313_v45, %v3128_v50 }
 0x56c   :  { %v3130_v26 = vpop.f32.mrf.mxu1  ;;  %v8370_v40 = vpop.f32.mrf.mxu0 }
 0x56d   :  { %v8372_v4 = vadd.f32 %v3315_v13, %v3130_v26 }
 0x56e   :  { %v8374_v60 = vpop.f32.mrf.mxu1  ;;  %v8376_v0 = vpop.f32.mrf.mxu0 }
 0x570   :  { %v8378_v46 = vpop.f32.mrf.mxu1  ;;  %v8380_v59 = vpop.f32.mrf.mxu0 }
 0x572   :  { %v8382_v32 = vpop.f32.mrf.mxu1  ;;  %v8384_v30 = vpop.f32.mrf.mxu0 }
 0x573   :  { %9062 = vst [vmem:[#allocation40_spill] sm:$0xff] %v8384_v30 }
 0x574   :  { %v8386_v14 = vpop.f32.mrf.mxu1  ;;  %v3725_v36 = vpop.f32.mrf.mxu0 }
 0x576   :  { %v8388_v47 = vpop.f32.mrf.mxu1  ;;  %v3727_v7 = vpop.f32.mrf.mxu0 }
 0x577   :  { %9063 = vst [vmem:[#allocation41_spill] sm:$0xff] %v8388_v47 }
 0x578   :  { %v3479_v6 = vpop.f32.mrf.mxu1  ;;  %v3729_v34 = vpop.f32.mrf.mxu0 }
 0x579   :  { %v3548_v29 = vadd.f32 %v3479_v6, %v8324_v63 }
 0x57a   :  { %v3481_v31 = vpop.f32.mrf.mxu1  ;;  %v3731_v52 = vpop.f32.mrf.mxu0 }
 0x57b   :  { %v3549_v15 = vadd.f32 %v3481_v31, %v8326_v12  ;;  %v8392_v20 = vadd.f32 %v3725_v36, %v3548_v29 }
 0x57c   :  { %v3483_v33 = vpop.f32.mrf.mxu1  ;;  %v3735_v39 = vpop.f32.mrf.mxu0 }
 0x57d   :  { %v3550_v55 = vadd.f32 %v3483_v33, %v8328_v37  ;;  %v8395_v11 = vadd.f32 %v3727_v7, %v3549_v15 }
 0x57e   :  { %v3485_v25 = vpop.f32.mrf.mxu1 }
 0x57f   :  { %v3551_v43 = vadd.f32 %v3485_v25, %v8330_v1  ;;  %v8398_v38 = vadd.f32 %v3729_v34, %v3550_v55 }
 0x580   :  { %v3489_v56 = vpop.f32.mrf.mxu1 }
 0x581   :  { %v3552_v63 = vadd.f32 %v3489_v56, %v8332_v51  ;;  %v8401_v42 = vadd.f32 %v3731_v52, %v3551_v43 }
 0x582   :  { %v3491_v12 = vpop.f32.mrf.mxu1 }
 0x583   :  { %v8404_v21 = vadd.f32 %v3491_v12, %v8334_v35  ;;  %v8406_v27 = vadd.f32 %v3735_v39, %v3552_v63  ;;  %v3737_v35 = vpop.f32.mrf.mxu0 }
 0x584   :  { %v3493_v37 = vpop.f32.mrf.mxu1 }
 0x585   :  { %v8409_v62 = vadd.f32 %v3493_v37, %v8336_v57  ;;  %v3739_v50 = vpop.f32.mrf.mxu0 }
 0x586   :  { %v3495_v41 = vpop.f32.mrf.mxu1 }
 0x587   :  { %v8412_v1 = vadd.f32 %v3495_v41, %v8338_v10 }
 0x588   :  { %v3499_v48 = vpop.f32.mrf.mxu1 }
 0x589   :  { %v8415_v51 = vadd.f32 %v3499_v48, %v8340_v5  ;;  %v4068_v48 = vld [vmem:[%s8879_s8] sm:$0x3] }
 0x58a   :  { %v3501_v17 = vpop.f32.mrf.mxu1 }
 0x58b   :  { %v8418_v28 = vadd.f32 %v3501_v17, %v8342_v3  ;;  %v8432_v3 = vpop.f32.mrf.mxu0 }
 0x58c   :  { %v3503_v45 = vpop.f32.mrf.mxu1 }
 0x58d   :  { %v8421_v9 = vadd.f32 %v3503_v45, %v8344_v58 }
 0x58e   :  { %v3505_v13 = vpop.f32.mrf.mxu1 }
 0x58f   :  { %v8424_v57 = vadd.f32 %v3505_v13, %v8346_v53  ;;  %v8440_v53 = vpop.f32.mrf.mxu0  ;;  %v9066_v13 = vld [vmem:[#allocation78_spill] sm:$0xff] }
 0x590   :  { %v3509_v10 = vpop.f32.mrf.mxu1 }
 0x591   :  { %v8427_v26 = vadd.f32 %v3509_v10, %v8348_v23  ;;  %v8448_v15 = vpop.f32.mrf.mxu0  ;;  %v9067_v10 = vsub.s32 0, %v9066_v13 }
 0x592   :  { %v3511_v5 = vpop.f32.mrf.mxu1 }
 0x593   :  { %v8430_v36 = vadd.f32 %v3511_v5, %v8350_v2  ;;  %v8456_v52 = vpop.f32.mrf.mxu0  ;;  %v8491_v5 = vrot.slane %v4068_v48, %v9067_v10 }
 0x594   :  { %v3513_v7 = vpop.f32.mrf.mxu1 }
 0x595   :  { %v8435_v6 = vadd.f32 %v3513_v7, %v8352_v24  ;;  %v8464_v56 = vpop.f32.mrf.mxu0 }
 0x596   :  { %v3515_v58 = vpop.f32.mrf.mxu1 }
 0x597   :  { %v8438_v29 = vadd.f32 %v3515_v58, %v8354_v54 }
 0x598   :  { %v3519_v34 = vpop.f32.mrf.mxu1 }
 0x599   :  { %v8443_v23 = vadd.f32 %v3519_v34, %v8356_v8  ;;  %v9068_v34 = vsub.s32 1, %v9066_v13 }
 0x59a   :  { %v3521_v31 = vpop.f32.mrf.mxu1 }
 0x59b   :  { %v8446_v2 = vadd.f32 %v3521_v31, %v8358_v16  ;;  %v8496_v31 = vrot.slane %v4068_v48, %v9068_v34 }
 0x59c   :  { %v3523_v33 = vpop.f32.mrf.mxu1 }
 0x59d   :  { %v8451_v24 = vadd.f32 %v3523_v33, %v8360_v22 }
 0x59e   :  { %v3525_v55 = vpop.f32.mrf.mxu1 }
 0x59f   :  { %v8454_v54 = vadd.f32 %v3525_v55, %v8362_v44  ;;  %v8471_v44 = vpop.f32.mrf.mxu0 }
 0x5a0   :  { %v3529_v25 = vpop.f32.mrf.mxu1 }
 0x5a1   :  { %v8459_v8 = vadd.f32 %v3529_v25, %v8364_v19  ;;  %v8477_v19 = vpop.f32.mrf.mxu0 }
 0x5a2   :  { %v3531_v43 = vpop.f32.mrf.mxu1 }
 0x5a3   :  { %v8462_v16 = vadd.f32 %v3531_v43, %v8368_v61 }
 0x5a4   :  { %v3533_v63 = vpop.f32.mrf.mxu1 }
 0x5a5   :  { %v8467_v22 = vadd.f32 %v3533_v63, %v8372_v4  ;;  %v8486_v4 = vpop.f32.mrf.mxu0 }
 0x5a6   :  { %v8469_v39 = vpop.f32.mrf.mxu1 }
 0x5a7   :  { %v8498_v33 = vpop.f32.mrf.mxu0 }
 0x5a8   :  { %v8473_v12 = vpop.f32.mrf.mxu1 }
 0x5a9   :  { %v8508_v48 = vpop.f32.mrf.mxu0 }
 0x5aa   :  { %v8475_v37 = vpop.f32.mrf.mxu1 }
 0x5ab   :  { %v3767_v30 = vpop.f32.mrf.mxu0 }
 0x5ac   :  { %v8479_v41 = vpop.f32.mrf.mxu1 }
 0x5ad   :  { %9064 = vst [vmem:[#allocation42_spill] sm:$0xff] %v8479_v41 }
 0x5ae   :  { %v8481_v61 = vpop.f32.mrf.mxu1 }
 0x5af   :  { %9065 = vst [vmem:[#allocation43_spill] sm:$0xff] %v8481_v61 }
 0x5b0   :  { %v3971_v17 = vpop.f32.mrf.mxu1 }
 0x5b1   :  { %v4040_v45 = vadd.f32 %v3971_v17, %v8392_v20 }
 0x5b2   :  { %v3973_v7 = vpop.f32.mrf.mxu1 }
 0x5b3   :  { %v4041_v58 = vadd.f32 %v3973_v7, %v8395_v11  ;;  %v4080_v25 = vadd.f32 %v8491_v5, %v4040_v45  ;;  %v6107_v11 = vld [vmem:[%s8882_s11 + $0x38] sm:$0xff]   ;;  %v3799_v7 = vadd.f32 %v3737_v35, %v8404_v21 }
 0x5b4   :  { %v3975_v55 = vpop.f32.mrf.mxu1  ;;  %4439 = vmatpush1.bf16.msra.mxu1 %v6107_v11  ;;  %v3769_v11 = vpop.f32.mrf.mxu0 }
 0x5b5   :  { %v4042_v43 = vadd.f32 %v3975_v55, %v8398_v38  ;;  %v4081_v20 = vadd.f32 %v8496_v31, %v4041_v58  ;;  %v4108_v34 = vmax.f32 %v4080_v25, 0.0  ;;  %4440 = vmatprep.subr.bf16.mxu1 %v9061_v49  ;;  %v3801_v25 = vadd.f32 %v8432_v3, %v8412_v1 }
 0x5b6   :  { %v3977_v63 = vpop.f32.mrf.mxu1 }
 0x5b7   :  { %v4082_v17 = vadd.f32 %v8491_v5, %v4042_v43  ;;  %v4043_v10 = vadd.f32 %v3977_v63, %v8401_v42  ;;  %v3800_v43 = vadd.f32 %v3739_v50, %v8409_v62  ;;  %v4109_v42 = vmax.f32 %v4081_v20, 0.0 }
 0x5b8   :  { %v3981_v13 = vpop.f32.mrf.mxu1 }
 0x5b9   :  { %v4110_v45 = vmax.f32 %v4082_v17, 0.0  ;;  %v4083_v38 = vadd.f32 %v8496_v31, %v4043_v10  ;;  %v4044_v55 = vadd.f32 %v3981_v13, %v8406_v27  ;;  %v3802_v10 = vadd.f32 %v8440_v53, %v8415_v51  ;;  %v3771_v51 = vpop.f32.mrf.mxu0 }
 0x5ba   :  { %v3983_v58 = vpop.f32.mrf.mxu1 }
 0x5bb   :  { %v8515_v63 = vpack.c.bf16 %v4110_v45, %v4108_v34  ;;  %v4111_v61 = vmax.f32 %v4083_v38, 0.0  ;;  %v4045_v41 = vadd.f32 %v3983_v58, %v3799_v7  ;;  %v4084_v21 = vadd.f32 %v8491_v5, %v4044_v55 }
 0x5bc   :  { %v3985_v47 = vpop.f32.mrf.mxu1  ;;  %v3803_v7 = vadd.f32 %v8448_v15, %v8418_v28  ;;  %v3805_v28 = vadd.f32 %v8464_v56, %v8424_v57 }
 0x5bd   :  { %v4046_v35 = vadd.f32 %v3985_v47, %v3800_v43  ;;  %v8520_v27 = vpack.c.bf16 %v4111_v61, %v4109_v42  ;;  %v4085_v62 = vadd.f32 %v8496_v31, %v4045_v41  ;;  %v4112_v47 = vmax.f32 %v4084_v21, 0.0 }
 0x5be   :  { %v3987_v17 = vpop.f32.mrf.mxu1  ;;  %v3804_v41 = vadd.f32 %v8456_v52, %v8421_v9 }
 0x5bf   :  { %v4086_v50 = vadd.f32 %v8491_v5, %v4046_v35  ;;  %v4047_v20 = vadd.f32 %v3987_v17, %v3801_v25  ;;  %v4113_v45 = vmax.f32 %v4085_v62, 0.0  ;;  %v3806_v25 = vadd.f32 %v8471_v44, %v8427_v26  ;;  %v3775_v17 = vpop.f32.mrf.mxu0 }
 0x5c0   :  { %v3991_v13 = vpop.f32.mrf.mxu1 }
 0x5c1   :  { %v4114_v34 = vmax.f32 %v4086_v50, 0.0  ;;  %v4087_v1 = vadd.f32 %v8496_v31, %v4047_v20  ;;  %v4048_v3 = vadd.f32 %v3991_v13, %v3802_v10  ;;  %v3807_v50 = vadd.f32 %v8477_v19, %v8430_v36  ;;  %v3777_v26 = vpop.f32.mrf.mxu0 }
 0x5c2   :  { %v3993_v61 = vpop.f32.mrf.mxu1  ;;  %v3809_v36 = vadd.f32 %v8498_v33, %v8438_v29 }
 0x5c3   :  { %v8531_v38 = vpack.c.bf16 %v4114_v34, %v4112_v47  ;;  %v4115_v55 = vmax.f32 %v4087_v1, 0.0  ;;  %v4049_v58 = vadd.f32 %v3993_v61, %v3803_v7  ;;  %v4088_v43 = vadd.f32 %v8491_v5, %v4048_v3 }
 0x5c4   :  { %v3995_v53 = vpop.f32.mrf.mxu1  ;;  %v3808_v7 = vadd.f32 %v8486_v4, %v8435_v6 }
 0x5c5   :  { %v4050_v42 = vadd.f32 %v3995_v53, %v3804_v41  ;;  %v8536_v15 = vpack.c.bf16 %v4115_v55, %v4113_v45  ;;  %v4089_v35 = vadd.f32 %v8496_v31, %v4049_v58  ;;  %v4116_v20 = vmax.f32 %v4088_v43, 0.0  ;;  %v3779_v53 = vpop.f32.mrf.mxu0 }
 0x5c6   :  { %v3997_v21 = vpop.f32.mrf.mxu1  ;;  %v3810_v58 = vadd.f32 %v8508_v48, %v8443_v23 }
 0x5c7   :  { %v4090_v9 = vadd.f32 %v8491_v5, %v4050_v42  ;;  %v4051_v52 = vadd.f32 %v3997_v21, %v3805_v28  ;;  %v4117_v47 = vmax.f32 %v4089_v35, 0.0  ;;  %v3811_v42 = vadd.f32 %v3767_v30, %v8446_v2 }
 0x5c8   :  { %v4001_v62 = vpop.f32.mrf.mxu1  ;;  %v3813_v30 = vadd.f32 %v3771_v51, %v8454_v54  ;;  %v3815_v51 = vadd.f32 %v3777_v26, %v8462_v16  ;;  %v3326_v16 = vadd.f32 %v8380_v59, %v8386_v14 }
 0x5c9   :  { %v4118_v10 = vmax.f32 %v4090_v9, 0.0  ;;  %v4091_v57 = vadd.f32 %v8496_v31, %v4051_v52  ;;  %v4052_v56 = vadd.f32 %v4001_v62, %v3806_v25  ;;  %v3812_v9 = vadd.f32 %v3769_v11, %v8451_v24 }
 0x5ca   :  { %v4003_v13 = vpop.f32.mrf.mxu1 }
 0x5cb   :  { %v8547_v34 = vpack.c.bf16 %v4118_v10, %v4116_v20  ;;  %v4119_v1 = vmax.f32 %v4091_v57, 0.0  ;;  %v4053_v3 = vadd.f32 %v4003_v13, %v3807_v50  ;;  %v4092_v61 = vadd.f32 %v8491_v5, %v4052_v56  ;;  %v3781_v20 = vpop.f32.mrf.mxu0 }
 0x5cc   :  { %v4005_v44 = vpop.f32.mrf.mxu1  ;;  %v3318_v57 = vadd.f32 %v8366_v18, %v8374_v60 }
 0x5cd   :  { %v4054_v41 = vadd.f32 %v4005_v44, %v3808_v7  ;;  %v8552_v19 = vpack.c.bf16 %v4119_v1, %v4117_v47  ;;  %v4093_v55 = vadd.f32 %v8496_v31, %v4053_v3  ;;  %v4120_v28 = vmax.f32 %v4092_v61, 0.0  ;;  %v3785_v1 = vpop.f32.mrf.mxu0 }
 0x5ce   :  { %v4007_v45 = vpop.f32.mrf.mxu1  ;;  %v3814_v7 = vadd.f32 %v3775_v17, %v8459_v8  ;;  %v3322_v47 = vadd.f32 %v8370_v40, %v8378_v46  ;;  %v3571_v3 = vadd.f32 %v8469_v39, %v3318_v57  ;;  %v3816_v17 = vadd.f32 %v3779_v53, %v8467_v22  ;;  %v9071_v53 = vld [vmem:[#allocation42_spill] sm:$0xff] }
 0x5cf   :  { %v4094_v6 = vadd.f32 %v8491_v5, %v4054_v41  ;;  %v4055_v4 = vadd.f32 %v4007_v45, %v3809_v36  ;;  %v4121_v52 = vmax.f32 %v4093_v55, 0.0  ;;  %v3324_v41 = vadd.f32 %v8376_v0, %v8382_v32  ;;  %v3787_v26 = vpop.f32.mrf.mxu0 }
 0x5d0   :  { %v4011_v43 = vpop.f32.mrf.mxu1  ;;  %v3572_v36 = vadd.f32 %v8473_v12, %v3322_v47  ;;  %v3817_v32 = vadd.f32 %v3781_v20, %v3571_v3 }
 0x5d1   :  { %v4122_v21 = vmax.f32 %v4094_v6, 0.0  ;;  %v4095_v35 = vadd.f32 %v8496_v31, %v4055_v4  ;;  %v4056_v29 = vadd.f32 %v4011_v43, %v3810_v58  ;;  %v3573_v55 = vadd.f32 %v8475_v37, %v3324_v41  ;;  %v9069_v58 = vld [vmem:[#allocation41_spill] sm:$0xff]  ;;  %v9070_v43 = vld [vmem:[#allocation40_spill] sm:$0xff]  ;;  %v9072_v37 = vld [vmem:[#allocation43_spill] sm:$0xff] }
 0x5d2   :  { %v4013_v33 = vpop.f32.mrf.mxu1  ;;  %v3328_v22 = vadd.f32 %v9070_v43, %v9069_v58  ;;  %v3818_v14 = vadd.f32 %v3785_v1, %v3572_v36  ;;  %v6122_v58 = vld [vmem:[#allocation7] sm:$0xff]   ;;  %v6123_v43 = vld [vmem:[%s8882_s11 + $0x48] sm:$0xff]  }
 0x5d3   :  { %v8561_v25 = vpack.c.bf16 %v4122_v21, %v4120_v28  ;;  %v4123_v62 = vmax.f32 %v4095_v35, 0.0  ;;  %v4057_v50 = vadd.f32 %v4013_v33, %v3811_v42  ;;  %v4096_v23 = vadd.f32 %v8491_v5, %v4056_v29  ;;  %v3789_v29 = vpop.f32.mrf.mxu0 }
 0x5d4   :  { %v4015_v10 = vpop.f32.mrf.mxu1  ;;  %v3574_v42 = vadd.f32 %v9071_v53, %v3326_v16  ;;  %v3575_v33 = vadd.f32 %v9072_v37, %v3328_v22  ;;  %v6114_v16 = vld [vmem:[#allocation7 + $0x20] sm:$0xff]   ;;  %v6124_v22 = vld [vmem:[#allocation7 + $0x48] sm:$0xff]  }
 0x5d5   :  { %v4058_v48 = vadd.f32 %v4015_v10, %v3812_v9  ;;  %v8565_v2 = vpack.c.bf16 %v4123_v62, %v4121_v52  ;;  %v4097_v24 = vadd.f32 %v8496_v31, %v4057_v50  ;;  %v4124_v44 = vmax.f32 %v4096_v23, 0.0  ;;  %v6125_v53 = vld [vmem:[%s8882_s11 + $0x40] sm:$0xff]  }
 0x5d6   :  { %v4017_v56 = vpop.f32.mrf.mxu1  ;;  %v3819_v52 = vadd.f32 %v3787_v26, %v3573_v55  ;;  %v6115_v26 = vld [vmem:[%s8882_s11 + $0x18] sm:$0xff]   ;;  %v6116_v55 = vld [vmem:[#allocation7 + $0x18] sm:$0xff]  }
 0x5d7   :  { %v4098_v11 = vadd.f32 %v8491_v5, %v4058_v48  ;;  %v4059_v13 = vadd.f32 %v4017_v56, %v3813_v30  ;;  %v4125_v40 = vmax.f32 %v4097_v24, 0.0  ;;  %v3820_v48 = vadd.f32 %v3789_v29, %v3574_v42  ;;  %v6126_v42 = vld [vmem:[#allocation7 + $0x40] sm:$0xff]  }
 0x5d8   :  { %v4021_v54 = vpop.f32.mrf.mxu1 }
 0x5d9   :  { %v4126_v61 = vmax.f32 %v4098_v11, 0.0  ;;  %v4099_v18 = vadd.f32 %v8496_v31, %v4059_v13  ;;  %v4060_v60 = vadd.f32 %v4021_v54, %v3814_v7  ;;  %v3791_v11 = vpop.f32.mrf.mxu0 }
 0x5da   :  { %v4023_v8 = vpop.f32.mrf.mxu1  ;;  %v3821_v1 = vadd.f32 %v3791_v11, %v3575_v33 }
 0x5db   :  { %v8581_v46 = vpack.c.bf16 %v4126_v61, %v4124_v44  ;;  %v4127_v39 = vmax.f32 %v4099_v18, 0.0  ;;  %v4061_v45 = vadd.f32 %v4023_v8, %v3815_v51  ;;  %v4100_v4 = vadd.f32 %v8491_v5, %v4060_v60 }
 0x5dc   :  { %v4025_v6 = vpop.f32.mrf.mxu1 }
 0x5dd   :  { %v4062_v0 = vadd.f32 %v4025_v6, %v3816_v17  ;;  %v4145_v12 = vpack.c.bf16 %v4127_v39, %v4125_v40  ;;  %v4101_v21 = vadd.f32 %v8496_v31, %v4061_v45  ;;  %v4128_v62 = vmax.f32 %v4100_v4, 0.0  ;;  %v6103_v45 = vld [vmem:[#allocation3 + $0x10] ss:$0 sps:$4 sm:$0xff]   ;;  %v6117_v6 = vld [vmem:[%s8882_s11 + $0x10] sm:$0xff]   ;;  %v6118_v4 = vld [vmem:[#allocation7 + $0x10] sm:$0xff]  }
 0x5de   :  { %v4027_v28 = vpop.f32.mrf.mxu1 }
 0x5df   :  { %v4102_v35 = vadd.f32 %v8491_v5, %v4062_v0  ;;  %v4063_v59 = vadd.f32 %v4027_v28, %v3817_v32  ;;  %v4129_v30 = vmax.f32 %v4101_v21, 0.0  ;;  %v6119_v0 = vld [vmem:[%s8882_s11 + $0x8] sm:$0xff]   ;;  %v6120_v32 = vld [vmem:[#allocation7 + $0x8] sm:$0xff]   ;;  %v6236_v28 = vmov 0.0  }
 0x5e0   :  { %v4031_v9 = vpop.f32.mrf.mxu1 }
 0x5e1   :  { %v4130_v50 = vmax.f32 %v4102_v35, 0.0  ;;  %v4103_v20 = vadd.f32 %v8496_v31, %v4063_v59  ;;  %v4064_v10 = vadd.f32 %v4031_v9, %v3818_v14 }
 0x5e2   :  { %v4033_v23 = vpop.f32.mrf.mxu1 }
 0x5e3   :  { %v4146_v57 = vpack.c.bf16 %v4130_v50, %v4128_v62  ;;  %v4131_v56 = vmax.f32 %v4103_v20, 0.0  ;;  %v4065_v24 = vadd.f32 %v4033_v23, %v3819_v52  ;;  %v4104_v7 = vadd.f32 %v8491_v5, %v4064_v10 }
 0x5e4   :  { %v4035_v13 = vpop.f32.mrf.mxu1 }
 0x5e5   :  { %v4066_v47 = vadd.f32 %v4035_v13, %v3820_v48  ;;  %v4147_v3 = vpack.c.bf16 %v4131_v56, %v4129_v30  ;;  %v4105_v51 = vadd.f32 %v8496_v31, %v4065_v24  ;;  %v4132_v18 = vmax.f32 %v4104_v7, 0.0  ;;  %v6127_v7 = vld [vmem:[%s8884_s13 + $0x20] sm:$0xff]  }
 0x5e6   :  { %v4037_v54 = vpop.f32.mrf.mxu1 }
 0x5e7   :  { %v4106_v44 = vadd.f32 %v8491_v5, %v4066_v47  ;;  %v4067_v61 = vadd.f32 %v4037_v54, %v3821_v1  ;;  %v4133_v36 = vmax.f32 %v4105_v51, 0.0  ;;  %v6101_v5 = vld [vmem:[#allocation3] sm:$0xff]   ;;  %v6128_v47 = vld [vmem:[%s8884_s13 + $0x48] sm:$0xff]   ;;  %v6129_v51 = vld [vmem:[%s8884_s13 + $0x18] sm:$0xff]  }
 0x5e9   :  { %v4134_v60 = vmax.f32 %v4106_v44, 0.0  ;;  %v4107_v41 = vadd.f32 %v8496_v31, %v4067_v61  ;;  %v6102_v31 = vld [vmem:[#allocation3 + $0x8] sm:$0xff]   ;;  %v6130_v44 = vld [vmem:[%s8884_s13 + $0x40] sm:$0xff]  }
 0x5eb   :  { %v4148_v8 = vpack.c.bf16 %v4134_v60, %v4132_v18  ;;  %v4135_v17 = vmax.f32 %v4107_v41, 0.0 }
 0x5ed   :  { %v4149_v40 = vpack.c.bf16 %v4135_v17, %v4133_v36  ;;  %v4179_v39 = vsel %vm2137_vm2, %v4148_v8, 0 }
 0x5ef   :  { %5636 = vmatprep.subr.msk.bf16.mxu0 %vm2137_vm2, %v4149_v40 }
 0x5f0   :  { %4187 = vmatpush1.bf16.msra.mxu0 %v4179_v39 }
 0x5f1   :  { %4188 = vmatprep.subr.bf16.mxu0 %v4147_v3 }
 0x5f4   :  { %4189 = vmatpush1.bf16.msra.mxu0 %v4146_v57 }
 0x5f5   :  { %4190 = vmatprep.subr.bf16.mxu0 %v4145_v12 }
 0x5f8   :  { %4191 = vmatpush1.bf16.msra.mxu0 %v8581_v46 }
 0x5f9   :  { %4192 = vmatprep.subr.bf16.mxu0 %v8565_v2 }
 0x5fc   :  { %4193 = vmatpush1.bf16.msra.mxu0 %v8561_v25 }
 0x5fd   :  { %4194 = vmatprep.subr.bf16.mxu0 %v8552_v19 }
 0x600   :  { %4195 = vmatpush1.bf16.msra.mxu0 %v8547_v34 }
 0x601   :  { %4196 = vmatprep.subr.bf16.mxu0 %v8536_v15 }
 0x604   :  { %4197 = vmatpush1.bf16.msra.mxu0 %v8531_v38 }
 0x605   :  { %4198 = vmatprep.subr.bf16.mxu0 %v8520_v27 }
 0x608   :  { %4199 = vmatpush1.bf16.msra.mxu0 %v8515_v63 }
 0x609   :  { %5643 = vmatprep.subr.msk.bf16.mxu0 %vm2137_vm2, %v4149_v40  ;;  %v6131_v40 = vld [vmem:[%s8884_s13 + $0x10] sm:$0xff]  }
 0x60b   :  { %5637 = vmatmul.mubr.msk.bf16.vlgmr.msra.gmra.mxu0 %vm4168_vm7, %v6101_v5 }
 0x60c   :  { %4275 = vmatpush1.bf16.msra.mxu0 %v4179_v39  ;;  %4226 = vmatprep.mubr.bf16.mxu0 %v9061_v49  ;;  %v6132_v39 = vld [vmem:[%s8884_s13 + $0x38] sm:$0xff]  }
 0x60d   :  { %4276 = vmatprep.subr.bf16.mxu0 %v4147_v3 }
 0x610   :  { %4277 = vmatpush1.bf16.msra.mxu0 %v4146_v57 }
 0x611   :  { %4278 = vmatprep.subr.bf16.mxu0 %v4145_v12  ;;  %v6121_v12 = vld [vmem:[%s8882_s11] sm:$0xff]  }
 0x613   :  { %5638 = vmatmul.mubr.msk.bf16.gmra.mxu0 %vm4168_vm7, %v6102_v31 }
 0x614   :  { %4279 = vmatpush1.bf16.msra.mxu0 %v8581_v46  ;;  %4236 = vmatprep.mubr.bf16.mxu0 %v9061_v49  ;;  %v6104_v46 = vld [vmem:[#allocation5] sm:$0xff]  }
 0x615   :  { %4280 = vmatprep.subr.bf16.mxu0 %v8565_v2  ;;  %v6108_v2 = vld [vmem:[#allocation7 + $0x38] sm:$0xff]  }
 0x618   :  { %4281 = vmatpush1.bf16.msra.mxu0 %v8561_v25  ;;  %v6113_v25 = vld [vmem:[%s8882_s11 + $0x20] sm:$0xff]  }
 0x619   :  { %4282 = vmatprep.subr.bf16.mxu0 %v8552_v19  ;;  %v6112_v19 = vld [vmem:[#allocation7 + $0x28] sm:$0xff]  }
 0x61b   :  { %5639 = vmatmul.mubr.msk.bf16.gmra.mxu0 %vm4168_vm7, %v6103_v45 }
 0x61c   :  { %4283 = vmatpush1.bf16.msra.mxu0 %v8547_v34  ;;  %4304 = vmatprep.mubr.bf16.mxu0 %v9061_v49  ;;  %v6105_v34 = vld [vmem:[#allocation5 + $0x8] sm:$0xff]  }
 0x61d   :  { %4284 = vmatprep.subr.bf16.mxu0 %v8536_v15  ;;  %v6111_v15 = vld [vmem:[%s8882_s11 + $0x28] sm:$0xff]  }
 0x620   :  { %4285 = vmatpush1.bf16.msra.mxu0 %v8531_v38  ;;  %v6106_v38 = vld [vmem:[#allocation5 + $0x10] ss:$0 sps:$4 sm:$0xff]  }
 0x621   :  { %4286 = vmatprep.subr.bf16.mxu0 %v8520_v27  ;;  %v6110_v27 = vld [vmem:[#allocation7 + $0x30] sm:$0xff]  }
 0x624   :  { %4287 = vmatpush1.bf16.msra.mxu0 %v8515_v63  ;;  %v6109_v63 = vld [vmem:[%s8882_s11 + $0x30] sm:$0xff]  }
 0x625   :  { %4574 = vmatprep.subr.bf16.mxu0 %v9061_v49  ;;  %4441 = vmatpush1.bf16.msra.mxu1 %v6109_v63 }
 0x626   :  { %4442 = vmatprep.subr.bf16.mxu1 %v9061_v49 }
 0x627   :  { %5644 = vmatmul.mubr.msk.bf16.vlgmr.msra.gmra.mxu0 %vm4168_vm7, %v6104_v46 }
 0x628   :  { %4314 = vmatprep.mubr.bf16.mxu0 %v9061_v49  ;;  %4575 = vmatpush1.bf16.msra.mxu0 %v6108_v2 }
 0x629   :  { %4576 = vmatprep.subr.bf16.mxu0 %v9061_v49  ;;  %4443 = vmatpush1.bf16.msra.mxu1 %v6111_v15  ;;  %v6134_v15 = vld [vmem:[%s8884_s13 + $0x30] sm:$0xff]  }
 0x62a   :  { %4444 = vmatprep.subr.bf16.mxu1 %v9061_v49 }
 0x62c   :  { %4577 = vmatpush1.bf16.msra.mxu0 %v6110_v27 }
 0x62d   :  { %4578 = vmatprep.subr.bf16.mxu0 %v9061_v49  ;;  %4445 = vmatpush1.bf16.msra.mxu1 %v6113_v25  ;;  %v6136_v25 = vld [vmem:[%s8884_s13 + $0x28] sm:$0xff]  }
 0x62e   :  { %4446 = vmatprep.subr.bf16.mxu1 %v9061_v49 }
 0x62f   :  { %5645 = vmatmul.mubr.msk.bf16.gmra.mxu0 %vm4168_vm7, %v6105_v34  ;;  %v6133_v34 = vld [vmem:[%s8884_s13 + $0x8] sm:$0xff]  }
 0x630   :  { %4324 = vmatprep.mubr.bf16.mxu0 %v9061_v49  ;;  %4579 = vmatpush1.bf16.msra.mxu0 %v6112_v19  ;;  %v6135_v19 = vld [vmem:[%s8884_s13] sm:$0xff]  }
 0x631   :  { %4580 = vmatprep.subr.bf16.mxu0 %v9061_v49  ;;  %4447 = vmatpush1.bf16.msra.mxu1 %v6115_v26 }
 0x632   :  { %4448 = vmatprep.subr.bf16.mxu1 %v9061_v49 }
 0x634   :  { %4581 = vmatpush1.bf16.msra.mxu0 %v6114_v16 }
 0x635   :  { %4582 = vmatprep.subr.bf16.mxu0 %v9061_v49  ;;  %4449 = vmatpush1.bf16.msra.mxu1 %v6117_v6 }
 0x636   :  { %4450 = vmatprep.subr.bf16.mxu1 %v9061_v49 }
 0x637   :  { %5646 = vmatmul.mubr.msk.bf16.gmra.mxu0 %vm4168_vm7, %v6106_v38 }
 0x638   :  { %4583 = vmatpush1.bf16.msra.mxu0 %v6116_v55 }
 0x639   :  { %4584 = vmatprep.subr.bf16.mxu0 %v9061_v49  ;;  %4451 = vmatpush1.bf16.msra.mxu1 %v6119_v0  ;;  %v6137_v0 = vld [vmem:[%s8884_s13 + $0x98] sm:$0xff]  }
 0x63a   :  { %4452 = vmatprep.subr.bf16.mxu1 %v9061_v49 }
 0x63c   :  { %4585 = vmatpush1.bf16.msra.mxu0 %v6118_v4 }
 0x63d   :  { %4586 = vmatprep.subr.bf16.mxu0 %v9061_v49  ;;  %4453 = vmatpush1.bf16.msra.mxu1 %v6121_v12 }
 0x63e   :  { %4466 = vmatprep.subr.bf16.mxu1 %v9061_v49 }
 0x640   :  { %4587 = vmatpush1.bf16.msra.mxu0 %v6120_v32 }
 0x641   :  { %4588 = vmatprep.subr.bf16.mxu0 %v9061_v49  ;;  %4467 = vmatpush2.bf16.msra.mxu1 %v6123_v43 }
 0x642   :  { %4468 = vmatprep.subr.bf16.mxu1 %v9061_v49 }
 0x644   :  { %4589 = vmatpush1.bf16.msra.mxu0 %v6122_v58 }
 0x645   :  { %4602 = vmatprep.subr.bf16.mxu0 %v9061_v49  ;;  %4469 = vmatpush2.bf16.msra.mxu1 %v6125_v53 }
 0x646   :  { %5808 = vmatprep.subr.bf16.mxu1 %v6236_v28 }
 0x648   :  { %4603 = vmatpush2.bf16.msra.mxu0 %v6124_v22 }
 0x649   :  { %4604 = vmatprep.subr.bf16.mxu0 %v9061_v49 }
 0x64c   :  { %4605 = vmatpush2.bf16.msra.mxu0 %v6126_v42  ;;  %v6138_v42 = vld [vmem:[%s8884_s13 + $0x70] sm:$0xff]  }
 0x64d   :  { %5822 = vmatprep.subr.bf16.mxu0 %v6236_v28 }
 0x6cb   :  { %v4218_v21 = vpop.f32.mrf.mxu0 }
 0x6cd   :  { %v4220_v35 = vpop.f32.mrf.mxu0 }
 0x6cf   :  { %v4222_v59 = vpop.f32.mrf.mxu0 }
 0x6d1   :  { %v4224_v14 = vpop.f32.mrf.mxu0 }
 0x6d3   :  { %v4228_v29 = vpop.f32.mrf.mxu0 }
 0x6d5   :  { %v4230_v37 = vpop.f32.mrf.mxu0 }
 0x6d7   :  { %v4232_v33 = vpop.f32.mrf.mxu0 }
 0x6d9   :  { %v4234_v49 = vpop.f32.mrf.mxu0 }
 0x6db   :  { %v4238_v9 = vpop.f32.mrf.mxu0 }
 0x6dd   :  { %v4240_v52 = vpop.f32.mrf.mxu0 }
 0x6df   :  { %v4242_v62 = vpop.f32.mrf.mxu0 }
 0x6e1   :  { %v4243_v50 = vpop.f32.mrf.mxu0 }
 0x6e7   :  { %v4306_v20 = vpop.f32.mrf.mxu0 }
 0x6e8   :  { %v4333_v24 = vmax.f32 %v4218_v21, %v4306_v20  ;;  %v6139_v21 = vld [vmem:[%s8884_s13 + $0x90] sm:$0xff]   ;;  %v6142_v20 = vld [vmem:[%s8884_s13 + $0x60] sm:$0xff]  }
 0x6e9   :  { %v4308_v10 = vpop.f32.mrf.mxu0 }
 0x6ea   :  { %v4334_v57 = vmax.f32 %v4220_v35, %v4308_v10  ;;  %v6143_v10 = vld [vmem:[%s8884_s13 + $0x80] sm:$0xff]  }
 0x6eb   :  { %v4310_v23 = vpop.f32.mrf.mxu0 }
 0x6ec   :  { %v4335_v48 = vmax.f32 %v4222_v59, %v4310_v23 }
 0x6ed   :  { %v4312_v30 = vpop.f32.mrf.mxu0 }
 0x6ee   :  { %v4336_v56 = vmax.f32 %v4224_v14, %v4312_v30  ;;  %v4343_v1 = vpack.c.bf16 %v4335_v48, %v4333_v24  ;;  %v6145_v24 = vld [vmem:[%s8884_s13 + $0x78] sm:$0xff]  }
 0x6ef   :  { %v4316_v11 = vpop.f32.mrf.mxu0 }
 0x6f0   :  { %v4344_v13 = vpack.c.bf16 %v4336_v56, %v4334_v57  ;;  %v4337_v36 = vmax.f32 %v4228_v29, %v4316_v11  ;;  %v6144_v56 = vld [vmem:[%s8884_s13 + $0x58] sm:$0xff]  }
 0x6f1   :  { %v4318_v3 = vpop.f32.mrf.mxu0 }
 0x6f2   :  { %5657 = vmatprep.mubr.msk.bf16.mxu1 %vm229_vm0, %v4344_v13  ;;  %5670 = vmatprep.mubr.msk.bf16.mxu0 %vm229_vm0, %v4344_v13  ;;  %v4338_v60 = vmax.f32 %v4230_v37, %v4318_v3  ;;  %v6146_v3 = vld [vmem:[%s8884_s13 + $0x50] sm:$0xff]  }
 0x6f3   :  { %v4320_v54 = vpop.f32.mrf.mxu0  ;;  %4471 = vmatmul.mubr.bf16.vlgmr.msra.gmra.mxu1 %v4343_v1  ;;  %4607 = vmatmul.mubr.bf16.vlgmr.msra.gmra.mxu0 %v4343_v1 }
 0x6f4   :  { %5823 = vmatpush3.bf16.msra.mxu0 %v6127_v7  ;;  %5809 = vmatpush3.bf16.msra.mxu1 %v6128_v47  ;;  %v4339_v61 = vmax.f32 %v4232_v33, %v4320_v54  ;;  %v6140_v33 = vld [vmem:[%s8884_s13 + $0x68] sm:$0xff]  }
 0x6f5   :  { %v4322_v18 = vpop.f32.mrf.mxu0  ;;  %5824 = vmatprep.subr.bf16.mxu0 %v6236_v28  ;;  %5810 = vmatprep.subr.bf16.mxu1 %v6236_v28 }
 0x6f6   :  { %v4340_v41 = vmax.f32 %v4234_v49, %v4322_v18  ;;  %v4345_v5 = vpack.c.bf16 %v4339_v61, %v4337_v36  ;;  %v6141_v49 = vld [vmem:[%s8884_s13 + $0x88] sm:$0xff]   ;;  %v6148_v18 = vld [vmem:[%s8884_s13 + $0xb8] sm:$0xff]   ;;  %v6151_v36 = vld [vmem:[%s8884_s13 + $0xa0] sm:$0xff]  }
 0x6f7   :  { %v4326_v8 = vpop.f32.mrf.mxu0 }
 0x6f8   :  { %v4346_v17 = vpack.c.bf16 %v4340_v41, %v4338_v60  ;;  %5825 = vmatpush3.bf16.msra.mxu0 %v6129_v51  ;;  %5811 = vmatpush3.bf16.msra.mxu1 %v6130_v44  ;;  %v4341_v38 = vmax.f32 %v4238_v9, %v4326_v8  ;;  %v6147_v44 = vld [vmem:[%s8884_s13 + $0xc0] sm:$0xff]   ;;  %v6149_v60 = vld [vmem:[%s8884_s13 + $0xb0] sm:$0xff]   ;;  %v6150_v41 = vld [vmem:[%s8884_s13 + $0xa8] sm:$0xff]  }
 0x6f9   :  { %v4328_v31 = vpop.f32.mrf.mxu0  ;;  %5826 = vmatprep.subr.bf16.mxu0 %v6236_v28  ;;  %5812 = vmatprep.subr.bf16.mxu1 %v6236_v28 }
 0x6fa   :  { %5658 = vmatprep.mubr.msk.bf16.mxu1 %vm229_vm0, %v4346_v17  ;;  %5671 = vmatprep.mubr.msk.bf16.mxu0 %vm229_vm0, %v4346_v17  ;;  %v4342_v45 = vmax.f32 %v4240_v52, %v4328_v31  ;;  %v4347_v27 = vpack.c.bf16 %v4341_v38, %v4341_v38  ;;  %v6154_v31 = vld [vmem:[%s8886_s15 + $0x28] sm:$0xff]   ;;  %v6159_v38 = vld [vmem:[%s8886_s15] sm:$0xff]  }
 0x6fb   :  { %4479 = vmatmul.mubr.bf16.gmra.mxu1 %v4345_v5  ;;  %4615 = vmatmul.mubr.bf16.gmra.mxu0 %v4345_v5  ;;  %v4330_v46 = vpop.f32.mrf.mxu0  ;;  %v6153_v5 = vld [vmem:[%s8886_s15 + $0x30] sm:$0xff]  }
 0x6fc   :  { %v4348_v2 = vpack.c.bf16 %v4342_v45, %v4342_v45  ;;  %5827 = vmatpush3.bf16.msra.mxu0 %v6131_v40  ;;  %5813 = vmatpush3.bf16.msra.mxu1 %v6132_v39  ;;  %v6152_v40 = vld [vmem:[%s8886_s15 + $0x38] ss:$0 sps:$4 sm:$0xff]   ;;  %v6155_v45 = vld [vmem:[%s8886_s15 + $0x20] sm:$0xff]  }
 0x6fd   :  { %v4331_v63 = vpop.f32.mrf.mxu0  ;;  %5828 = vmatprep.subr.bf16.mxu0 %v6236_v28  ;;  %5814 = vmatprep.subr.bf16.mxu1 %v6236_v28  ;;  %v5145_v39 = vsel %vm2596_vm3, %v6152_v40, 0  ;;  %v6156_v46 = vld [vmem:[%s8886_s15 + $0x18] sm:$0xff]  }
 0x6fe   :  { %5659 = vmatprep.mubr.msk.bf16.mxu1 %vm229_vm0, %v4348_v2  ;;  %5672 = vmatprep.mubr.msk.bf16.mxu0 %vm229_vm0, %v4348_v2  ;;  %v6157_v2 = vld [vmem:[%s8886_s15 + $0x10] sm:$0xff]   ;;  %v6160_v63 = vld [vmem:[%s8888_s17 + $0x28] ss:$0 sps:$4 sm:$0x33]  }
 0x700   :  { %5829 = vmatpush3.bf16.msra.mxu0 %v6133_v34  ;;  %5815 = vmatpush3.bf16.msra.mxu1 %v6134_v15  ;;  %v6158_v34 = vld [vmem:[%s8886_s15 + $0x8] sm:$0xff]   ;;  %v6161_v15 = vld [vmem:[%s8888_s17 + $0x20] sm:$0xff]  }
 0x701   :  { %5830 = vmatprep.subr.bf16.mxu0 %v6236_v28  ;;  %5816 = vmatprep.subr.bf16.mxu1 %v6236_v28 }
 0x703   :  { %4487 = vmatmul.mubr.bf16.gmra.mxu1 %v4347_v27  ;;  %4623 = vmatmul.mubr.bf16.gmra.mxu0 %v4347_v27  ;;  %v5244_v27 = vsel %vm3035_vm4, %v6160_v63, 0 }
 0x704   :  { %5831 = vmatpush3.bf16.msra.mxu0 %v6135_v19  ;;  %5832 = vmatprep.mubr.msk.bf16.mxu0 %vm6237_vm8, %v6236_v28  ;;  %v6162_v19 = vld [vmem:[%s8888_s17 + $0x18] sm:$0xff]  }
 0x705   :  { %5850 = vmatprep.subr.bf16.mxu0 %v6236_v28  ;;  %5818 = vmatprep.mubr.msk.bf16.mxu1 %vm6237_vm8, %v6236_v28 }
 0x706   :  { %5817 = vmatpush3.bf16.msra.mxu1 %v6136_v25  ;;  %v6163_v25 = vld [vmem:[%s8888_s17 + $0x10] sm:$0xff]  }
 0x707   :  { %5836 = vmatprep.subr.bf16.mxu1 %v6236_v28 }
 0x7b3   :  { %v4472_v16 = vpop.f32.mrf.mxu1  ;;  %v4608_v26 = vpop.f32.mrf.mxu0 }
 0x7b4   :  { %v4630_v55 = vmax.f32 %v4472_v16, %v4608_v26 }
 0x7b5   :  { %v4474_v6 = vpop.f32.mrf.mxu1  ;;  %v4610_v4 = vpop.f32.mrf.mxu0 }
 0x7b6   :  { %v4635_v32 = vpack.c.bf16 %v4630_v55, %v4630_v55 }
 0x7b7   :  { %v4475_v12 = vpop.f32.mrf.mxu1  ;;  %v4611_v58 = vpop.f32.mrf.mxu0 }
 0x7b8   :  { %v4631_v43 = vmax.f32 %v4475_v12, %v4611_v58  ;;  %5833 = vmatmul.mubr.msk.bf16.vlgmr.msra.gmra.mxu0 %vm4688_vm9, %v4635_v32 }
 0x7b9   :  { %5851 = vmatpush3.bf16.msra.mxu0 %v6137_v0  ;;  %v4477_v22 = vpop.f32.mrf.mxu1  ;;  %v4613_v53 = vpop.f32.mrf.mxu0  ;;  %5860 = vmatprep.mubr.msk.bf16.mxu0 %vm6237_vm8, %v6236_v28 }
 0x7ba   :  { %v4646_v35 = vpack.c.bf16 %v4631_v43, %v4631_v43  ;;  %5852 = vmatprep.subr.bf16.mxu0 %v6236_v28 }
 0x7bb   :  { %v4480_v59 = vpop.f32.mrf.mxu1  ;;  %v4616_v14 = vpop.f32.mrf.mxu0 }
 0x7bc   :  { %5819 = vmatmul.mubr.msk.bf16.vlgmr.msra.gmra.mxu1 %vm4688_vm9, %v4646_v35  ;;  %v4632_v54 = vmax.f32 %v4480_v59, %v4616_v14 }
 0x7bd   :  { %5837 = vmatpush3.bf16.msra.mxu1 %v6138_v42  ;;  %5853 = vmatpush3.bf16.msra.mxu0 %v6139_v21  ;;  %v4482_v29 = vpop.f32.mrf.mxu1  ;;  %v4618_v37 = vpop.f32.mrf.mxu0 }
 0x7be   :  { %5838 = vmatprep.subr.bf16.mxu1 %v6236_v28  ;;  %5854 = vmatprep.subr.bf16.mxu0 %v6236_v28  ;;  %v4805_v61 = vpack.c.bf16 %v4632_v54, %v4632_v54 }
 0x7bf   :  { %v4483_v9 = vpop.f32.mrf.mxu1  ;;  %v4619_v52 = vpop.f32.mrf.mxu0  ;;  %5846 = vmatprep.mubr.msk.bf16.mxu1 %vm6237_vm8, %v6236_v28 }
 0x7c0   :  { %v4633_v11 = vmax.f32 %v4483_v9, %v4619_v52 }
 0x7c1   :  { %5839 = vmatpush3.bf16.msra.mxu1 %v6140_v33  ;;  %5855 = vmatpush3.bf16.msra.mxu0 %v6141_v49  ;;  %v4485_v62 = vpop.f32.mrf.mxu1  ;;  %v4621_v50 = vpop.f32.mrf.mxu0  ;;  %v5743_v49 = vld [vmem:[%s8885_s14] ss:$0 sm:$0xff] }
 0x7c2   :  { %5840 = vmatprep.subr.bf16.mxu1 %v6236_v28  ;;  %5856 = vmatprep.subr.bf16.mxu0 %v6236_v28  ;;  %v4891_v51 = vpack.c.bf16 %v4633_v11, %v4633_v11 }
 0x7c3   :  { %v4488_v23 = vpop.f32.mrf.mxu1  ;;  %v4624_v48 = vpop.f32.mrf.mxu0 }
 0x7c4   :  { %v4634_v8 = vmax.f32 %v4488_v23, %v4624_v48  ;;  %v6164_v48 = vld [vmem:[%s8888_s17 + $0x8] sm:$0xff]  }
 0x7c5   :  { %5841 = vmatpush3.bf16.msra.mxu1 %v6142_v20  ;;  %5857 = vmatpush3.bf16.msra.mxu0 %v6143_v10  ;;  %v4490_v30 = vpop.f32.mrf.mxu1  ;;  %v4626_v57 = vpop.f32.mrf.mxu0 }
 0x7c6   :  { %5842 = vmatprep.subr.bf16.mxu1 %v6236_v28  ;;  %5858 = vmatprep.subr.bf16.mxu0 %v6236_v28  ;;  %v4977_v17 = vpack.c.bf16 %v4634_v8, %v4634_v8  ;;  %v6165_v30 = vld [vmem:[%s8888_s17] sm:$0xff]  }
 0x7c7   :  { %v4491_v13 = vpop.f32.mrf.mxu1  ;;  %v4627_v7 = vpop.f32.mrf.mxu0  ;;  %v5744_v57 = vld [vmem:[%s8887_s16] ss:$0 sm:$0xff] }
 0x7c9   :  { %5843 = vmatpush3.bf16.msra.mxu1 %v6144_v56  ;;  %5859 = vmatpush3.bf16.msra.mxu0 %v6145_v24  ;;  %v4492_v47 = vpop.f32.mrf.mxu1  ;;  %v4628_v1 = vpop.f32.mrf.mxu0 }
 0x7ca   :  { %5844 = vmatprep.subr.bf16.mxu1 %v6236_v28  ;;  %5878 = vmatprep.subr.bf16.mxu0 %v6236_v28 }
 0x7cc   :  { %5861 = vmatmul.mubr.msk.bf16.vlgmr.msra.gmra.mxu0 %vm4688_vm9, %v4891_v51 }
 0x7cd   :  { %5845 = vmatpush3.bf16.msra.mxu1 %v6146_v3  ;;  %5894 = vmatprep.mubr.msk.bf16.mxu0 %vm6237_vm8, %v6236_v28 }
 0x7ce   :  { %5864 = vmatprep.subr.bf16.mxu1 %v6236_v28  ;;  %5879 = vmatpush3.bf16.msra.mxu0 %v5145_v39 }
 0x7cf   :  { %5880 = vmatprep.subr.bf16.mxu0 %v6236_v28 }
 0x7d0   :  { %5847 = vmatmul.mubr.msk.bf16.vlgmr.msra.gmra.mxu1 %vm4688_vm9, %v4805_v61 }
 0x7d1   :  { %5865 = vmatpush3.bf16.msra.mxu1 %v6147_v44  ;;  %5874 = vmatprep.mubr.msk.bf16.mxu1 %vm6237_vm8, %v6236_v28 }
 0x7d2   :  { %5866 = vmatprep.subr.bf16.mxu1 %v6236_v28  ;;  %5881 = vmatpush3.bf16.msra.mxu0 %v6153_v5 }
 0x7d3   :  { %5882 = vmatprep.subr.bf16.mxu0 %v6236_v28 }
 0x7d5   :  { %5867 = vmatpush3.bf16.msra.mxu1 %v6148_v18 }
 0x7d6   :  { %5868 = vmatprep.subr.bf16.mxu1 %v6236_v28  ;;  %5883 = vmatpush3.bf16.msra.mxu0 %v6154_v31 }
 0x7d7   :  { %5884 = vmatprep.subr.bf16.mxu0 %v6236_v28 }
 0x7d9   :  { %5869 = vmatpush3.bf16.msra.mxu1 %v6149_v60 }
 0x7da   :  { %5870 = vmatprep.subr.bf16.mxu1 %v6236_v28  ;;  %5885 = vmatpush3.bf16.msra.mxu0 %v6155_v45 }
 0x7db   :  { %5886 = vmatprep.subr.bf16.mxu0 %v6236_v28 }
 0x7dd   :  { %5871 = vmatpush3.bf16.msra.mxu1 %v6150_v41 }
 0x7de   :  { %5872 = vmatprep.subr.bf16.mxu1 %v6236_v28  ;;  %5887 = vmatpush3.bf16.msra.mxu0 %v6156_v46 }
 0x7df   :  { %5888 = vmatprep.subr.bf16.mxu0 %v6236_v28 }
 0x7e1   :  { %5873 = vmatpush3.bf16.msra.mxu1 %v6151_v36 }
 0x7e2   :  { %5898 = vmatprep.subr.bf16.mxu1 %v6236_v28  ;;  %5889 = vmatpush3.bf16.msra.mxu0 %v6157_v2 }
 0x7e3   :  { %5890 = vmatprep.subr.bf16.mxu0 %v6236_v28 }
 0x7e4   :  { %5875 = vmatmul.mubr.msk.bf16.vlgmr.msra.gmra.mxu1 %vm4688_vm9, %v4977_v17 }
 0x7e5   :  { %5910 = vmatprep.mubr.msk.bf16.mxu1 %vm6237_vm8, %v6236_v28  ;;  %5899 = vmatpush3.bf16.msra.mxu1 %v5244_v27 }
 0x7e6   :  { %5891 = vmatpush3.bf16.msra.mxu0 %v6158_v34  ;;  %5900 = vmatprep.subr.bf16.mxu1 %v6236_v28 }
 0x7e7   :  { %5892 = vmatprep.subr.bf16.mxu0 %v6236_v28 }
 0x7e9   :  { %5901 = vmatpush3.bf16.msra.mxu1 %v6161_v15 }
 0x7ea   :  { %5893 = vmatpush3.bf16.msra.mxu0 %v6159_v38  ;;  %5902 = vmatprep.subr.bf16.mxu1 %v6236_v28 }
 0x7ed   :  { %5903 = vmatpush3.bf16.msra.mxu1 %v6162_v19 }
 0x7ee   :  { %5904 = vmatprep.subr.bf16.mxu1 %v6236_v28 }
 0x7f1   :  { %5905 = vmatpush3.bf16.msra.mxu1 %v6163_v25 }
 0x7f2   :  { %5906 = vmatprep.subr.bf16.mxu1 %v6236_v28 }
 0x7f5   :  { %5907 = vmatpush3.bf16.msra.mxu1 %v6164_v48 }
 0x7f6   :  { %5908 = vmatprep.subr.bf16.mxu1 %v6236_v28  ;;  %v5754_v28 = vld [vmem:[%s8889_s18] ss:$0 sm:$0xff] }
 0x7f9   :  { %5909 = vmatpush3.bf16.msra.mxu1 %v6165_v30 }
 0x878   :  { %v4799_v16 = vpop.f32.mrf.mxu0 }
 0x87a   :  { %v5834_v26 = vpop.f32.mrf.mxu0 }
 0x87c   :  { %v4726_v55 = vpop.f32.mrf.mxu1  ;;  %v4802_v6 = vpop.f32.mrf.mxu0 }
 0x87d   :  { %v4800_v14 = vadd.f32 %v4799_v16, %v4726_v55 }
 0x87e   :  { %v5820_v4 = vpop.f32.mrf.mxu1  ;;  %v5835_v0 = vpop.f32.mrf.mxu0 }
 0x880   :  { %v4729_v32 = vpop.f32.mrf.mxu1 }
 0x882   :  { %v5821_v12 = vpop.f32.mrf.mxu1 }
 0x88c   :  { %v4970_v58 = vpop.f32.mrf.mxu0 }
 0x88e   :  { %v5862_v43 = vpop.f32.mrf.mxu0 }
 0x890   :  { %v4884_v22 = vpop.f32.mrf.mxu1  ;;  %v4973_v53 = vpop.f32.mrf.mxu0 }
 0x891   :  { %v4890_v29 = vadd.f32 %v4884_v22, %v4800_v14 }
 0x892   :  { %v5848_v42 = vpop.f32.mrf.mxu1  ;;  %v5863_v21 = vpop.f32.mrf.mxu0 }
 0x893   :  { %v4976_v37 = vadd.f32 %v4970_v58, %v4890_v29 }
 0x894   :  { %v4887_v35 = vpop.f32.mrf.mxu1 }
 0x896   :  { %v5849_v59 = vpop.f32.mrf.mxu1 }
 0x8a4   :  { %v5056_v33 = vpop.f32.mrf.mxu1 }
 0x8a5   :  { %v5062_v9 = vadd.f32 %v5056_v33, %v4976_v37 }
 0x8a6   :  { %v5876_v52 = vpop.f32.mrf.mxu1 }
 0x8a7   :  { %v5070_v62 = vadd.f32 %v5743_v49, %v5062_v9 }
 0x8a8   :  { %v5059_v50 = vpop.f32.mrf.mxu1 }
 0x8a9   :  { %v5071_v20 = vmax.f32 %v5070_v62, 0.0 }
 0x8aa   :  { %v5877_v10 = vpop.f32.mrf.mxu1 }
 0x8ab   :  { %v5072_v23 = vpack.c.bf16 %v5071_v20, %v5071_v20 }
 0x8ad   :  { %5895 = vmatmul.mubr.msk.bf16.vlgmr.msra.gmra.mxu0 %vm5140_vm10, %v5072_v23 }
 0x96d   :  { %v5181_v56 = vpop.f32.mrf.mxu0 }
 0x96e   :  { %v5182_v24 = vadd.f32 %v5744_v57, %v5181_v56 }
 0x96f   :  { %v5896_v11 = vpop.f32.mrf.mxu0 }
 0x970   :  { %v5187_v13 = vmax.f32 %v5182_v24, 0.0 }
 0x971   :  { %v5184_v7 = vpop.f32.mrf.mxu0 }
 0x972   :  { %v5188_v47 = vpack.c.bf16 %v5187_v13, %v5187_v13 }
 0x973   :  { %v5897_v1 = vpop.f32.mrf.mxu0 }
 0x974   :  { %5911 = vmatmul.mubr.msk.bf16.vlgmr.msra.gmra.mxu1 %vm2879_vm6, %v5188_v47 }
 0xa34   :  { %v5280_v3 = vpop.f32.mrf.mxu1 }
 0xa35   :  { %v5281_v54 = vadd.f32 %v5754_v28, %v5280_v3 }
 0xa36   :  { %v5912_v51 = vpop.f32.mrf.mxu1 }
 0xa37   :  { %5286 = vst [vmem:[%s8890_s19] sm:$0xff] %v5281_v54 }
 0xa38   :  { %v5283_v44 = vpop.f32.mrf.mxu1 }
 0xa3a   :  { %v5913_v61 = vpop.f32.mrf.mxu1 }
 0xa3b   :  { %5291 = vsyncpa [#allocation4], 1 }
 0xa3c   :  { %5292 = vsyncpa [#allocation6], 1 }

</bundles_post_ra>
